<compile_context>
chip_gen: v7x
topology: tpu7x:2x2x1
jax: 0.10.0
libtpu: 0.0.40
codegen_flags: <defaults>
</compile_context>

<pallas_src>
import numpy as np
import jax
import jax.numpy as jnp
from jax import lax
from jax.experimental import pallas as pl
from jax.experimental.pallas import tpu as pltpu


# ----------------------------- Pallas kernel -----------------------------

def bigru_kernel(x_ref,       # (T*Bb, D)      bf16  time-major, per-batch-block
                 lens_ref,    # (Bb, 1)        int32
                 w_ih_ref,    # (D, 6*Hp)      bf16  [fwd gates | bwd gates]
                 w_hh_f_ref,  # (Hp, 3*Hp)     bf16
                 w_hh_b_ref,  # (Hp, 3*Hp)     bf16
                 b_gi_ref,    # (1, 6*Hp)      f32   b_ih + (r,z part of b_hh)
                 b_gh_ref,    # (1, 6*Hp)      f32   n-gate part of b_hh only
                 out_ref,     # (T, Bb, 2*Hp)  f32   fwd -> lanes [:Hp], bwd -> [Hp:]
                 hT_ref,      # (Bb, 2*Hp)     f32   [h_fwd_final | h_bwd_final]
                 gi_scr):     # (T*Bb, 6*Hp)   f32   scratch
    T, B, Hp2 = out_ref.shape
    Hp = Hp2 // 2
    G = 3 * Hp                       # per-direction gate width

    # ---- hoisted input projection: one MXU matmul for all t and both dirs ----
    gi_scr[...] = jnp.dot(x_ref[...], w_ih_ref[...],
                          preferred_element_type=jnp.float32) + b_gi_ref[...]

    # Hoisted loads / broadcasts (kept off the serial per-step chain).
    w_hh_f = w_hh_f_ref[...]
    w_hh_b = w_hh_b_ref[...]
    b_gh_f = jnp.broadcast_to(b_gh_ref[:, :G], (B, G))
    b_gh_b = jnp.broadcast_to(b_gh_ref[:, G:], (B, G))
    lens = jnp.broadcast_to(lens_ref[...], (B, Hp))

    def gru_gates(gi_d, gh_d, h_d):
        # PyTorch GRU cell; b_ih and b_hr/b_hz already folded into gi_d,
        # gh_d carries W_h h (+ b_hn in its n slab).
        rz = jax.nn.sigmoid(gi_d[:, :2 * Hp] + gh_d[:, :2 * Hp])   # one EUP pass
        r = rz[:, :Hp]
        z = rz[:, Hp:]
        n = jnp.tanh(gi_d[:, 2 * Hp:] + r * gh_d[:, 2 * Hp:])
        return (1.0 - z) * n + z * h_d

    def step(i, carry):
        h_f, h_b = carry             # (B, Hp) f32 each; no per-step concat
        t_f = i
        t_b = T - 1 - i

        # Only the hidden projections remain on the serial critical path.
        gh_f = jnp.dot(h_f.astype(jnp.bfloat16), w_hh_f,
                       preferred_element_type=jnp.float32) + b_gh_f
        gh_b = jnp.dot(h_b.astype(jnp.bfloat16), w_hh_b,
                       preferred_element_type=jnp.float32) + b_gh_b

        gi_f = gi_scr[pl.ds(pl.multiple_of(t_f * B, B), B), :G]    # (B, 3Hp)
        gi_b = gi_scr[pl.ds(pl.multiple_of(t_b * B, B), B), G:]

        h_f_new = gru_gates(gi_f, gh_f, h_f)
        h_b_new = gru_gates(gi_b, gh_b, h_b)

        mask_f = t_f < lens                                        # (B, Hp)
        mask_b = t_b < lens

        # pack/pad semantics: zero outputs past each sequence's length.
        # Both stores are lane-dense 128-wide slabs at 128-aligned lane offsets.
        out_ref[t_f, :, :Hp] = jnp.where(mask_f, h_f_new, 0.0)
        out_ref[t_b, :, Hp:] = jnp.where(mask_b, h_b_new, 0.0)

        # Freeze h past the end (fwd) / before the start (bwd) of each sequence.
        return (jnp.where(mask_f, h_f_new, h_f),
                jnp.where(mask_b, h_b_new, h_b))

    h0 = jnp.zeros((B, Hp), jnp.float32)
    h_f, h_b = lax.fori_loop(0, T, step, (h0, h0), unroll=min(T, 8))
    hT_ref[:, :Hp] = h_f
    hT_ref[:, Hp:] = h_b


# ----------------------------- parameter packing -----------------------------

def pack_params(params, H, Hp):
    """Pad each gate slab H -> Hp lanes, fuse directions where useful,
    pre-fold biases into the input projection."""
    f32 = jnp.float32

    def pad_gates(w):
        # (..., 3H) -> (..., 3Hp): zero-pad each of the r/z/n slabs to Hp lanes.
        lead = w.shape[:-1]
        w3 = w.reshape(lead + (3, H))
        w3 = jnp.pad(w3, [(0, 0)] * len(lead) + [(0, 0), (0, Hp - H)])
        return w3.reshape(lead + (3 * Hp,))

    # input-to-hidden, both directions side by side: (D, 6Hp)
    w_ih = jnp.concatenate([pad_gates(params["w_ih_f"]),
                            pad_gates(params["w_ih_b"])], axis=-1)

    # hidden-to-hidden per direction (Hp, 3Hp); kept split (no zero blocks).
    def pad_hh(w):
        return jnp.pad(pad_gates(w), ((0, Hp - H), (0, 0)))

    w_hh_f = pad_hh(params["w_hh_f"])
    w_hh_b = pad_hh(params["w_hh_b"])

    # Biases: r/z hidden biases add linearly -> fold into the precomputed input
    # projection; only the n-gate hidden bias must stay inside r * (.) per step.
    def biases(b_ih, b_hh):
        n_mask = jnp.zeros((1, 3 * H), f32).at[:, 2 * H:].set(1.0)
        b_gi = pad_gates(b_ih + b_hh * (1.0 - n_mask))
        b_gh = pad_gates(b_hh * n_mask)
        return b_gi, b_gh

    b_gi_f, b_gh_f = biases(params["b_ih_f"], params["b_hh_f"])
    b_gi_b, b_gh_b = biases(params["b_ih_b"], params["b_hh_b"])
    b_gi = jnp.concatenate([b_gi_f, b_gi_b], axis=-1)           # (1, 6Hp)
    b_gh = jnp.concatenate([b_gh_f, b_gh_b], axis=-1)           # (1, 6Hp)

    return (w_ih.astype(jnp.bfloat16), w_hh_f.astype(jnp.bfloat16),
            w_hh_b.astype(jnp.bfloat16), b_gi.astype(f32), b_gh.astype(f32))


# ----------------------------- wrapper (jitted glue) -----------------------------

@jax.jit
def _encoder_forward_jit(x, lens, params):
    B, T, D = x.shape
    H = params["w_hh_f"].shape[0]
    Hp = max(128, ((H + 127) // 128) * 128)          # lane-aligned hidden width

    w_ih, w_hh_f, w_hh_b, b_gi, b_gh = pack_params(params, H, Hp)

    # Batch tiling: one batch block per grid step; "parallel" lets v7x's two
    # TensorCores split the blocks. Padded rows get len 0 -> zero everywhere.
    B8 = ((B + 7) // 8) * 8
    B_blk = min(B8, 64)
    n_blk = pl.cdiv(B8, B_blk)
    Bp = n_blk * B_blk

    # bf16 cast BEFORE the transpose (halves bytes moved), then pad batch and
    # pre-flatten each batch block to (T*B_blk, D) so the kernel needs no reshape.
    x2 = jnp.transpose(x.astype(jnp.bfloat16), (1, 0, 2))              # (T, B, D)
    x2 = jnp.pad(x2, ((0, 0), (0, Bp - B), (0, 0)))                    # (T, Bp, D)
    x2 = x2.reshape(T, n_blk, B_blk, D).transpose(1, 0, 2, 3)          # (nb, T, Bb, D)
    x2 = x2.reshape(n_blk, T * B_blk, D)
    lens_p = jnp.pad(lens.reshape(B, 1).astype(jnp.int32), ((0, Bp - B), (0, 0)))

    # Explicit VMEM budget: resident blocks + scratch, with double-buffer margin.
    resident = (T * B_blk * D * 2 + B_blk * 4                          # x, lens
                + D * 6 * Hp * 2 + 2 * Hp * 3 * Hp * 2 + 2 * 6 * Hp * 4  # weights
                + T * B_blk * 2 * Hp * 4 + B_blk * 2 * Hp * 4          # outputs
                + T * B_blk * 6 * Hp * 4)                              # gi scratch
    vmem_limit = int(min(60 << 20, max(32 << 20, 2 * resident + (4 << 20))))
    # TODO(synk): for production T*B the f32 gi scratch should move to bf16 or
    # HBM + double-buffered per-step DMA to stay inside v7x's 64 MiB VMEM.

    out, hT = pl.pallas_call(
        bigru_kernel,
        grid=(n_blk,),
        in_specs=[
            pl.BlockSpec((None, T * B_blk, D), lambda b: (b, 0, 0)),   # x (block b)
            pl.BlockSpec((B_blk, 1), lambda b: (b, 0)),                # lens
            pl.BlockSpec((D, 6 * Hp), lambda b: (0, 0)),               # w_ih
            pl.BlockSpec((Hp, 3 * Hp), lambda b: (0, 0)),              # w_hh_f
            pl.BlockSpec((Hp, 3 * Hp), lambda b: (0, 0)),              # w_hh_b
            pl.BlockSpec((1, 6 * Hp), lambda b: (0, 0)),               # b_gi
            pl.BlockSpec((1, 6 * Hp), lambda b: (0, 0)),               # b_gh
        ],
        out_specs=(
            pl.BlockSpec((T, B_blk, 2 * Hp), lambda b: (0, b, 0)),
            pl.BlockSpec((B_blk, 2 * Hp), lambda b: (b, 0)),
        ),
        out_shape=(
            jax.ShapeDtypeStruct((T, Bp, 2 * Hp), jnp.float32),   # fused outputs
            jax.ShapeDtypeStruct((Bp, 2 * Hp), jnp.float32),      # final hidden
        ),
        scratch_shapes=[pltpu.VMEM((T * B_blk, 6 * Hp), jnp.float32)],
        compiler_params=pltpu.CompilerParams(
            dimension_semantics=("parallel",),
            vmem_limit_bytes=vmem_limit),
    )(x2, lens_p, w_ih, w_hh_f, w_hh_b, b_gi, b_gh)

    # Repack to the module's layout inside the same jit (one fused copy).
    outputs = jnp.concatenate([out[:, :B, :H], out[:, :B, Hp:Hp + H]], axis=-1)
    outputs = jnp.transpose(outputs, (1, 0, 2))                        # (B, T, 2H)
    en_hidden = jnp.stack([hT[:B, :H], hT[:B, Hp:Hp + H]], axis=0)     # (2, B, H)
    return outputs, en_hidden


def encoder_forward(input_embedding, input_lens, params):
    """input_embedding: (B, T, D) float32, input_lens: list/array of ints with
    max(input_lens) == T. Returns (outputs (B, T, 2H), en_hidden (2, B, H))."""
    lens_np = np.asarray(input_lens)
    assert int(lens_np.max()) <= input_embedding.shape[1], \
        "T must be >= max(input_lens) (pad_packed_sequence pads to batch max)"
    lens = jnp.asarray(lens_np, jnp.int32)
    return _encoder_forward_jit(jnp.asarray(input_embedding, jnp.float32),
                                lens, params)


# ----------------------------- parameter init -----------------------------

def init_params(key, input_dim, rnn_hidden):
    """nn.GRU-shaped params (stored pre-transposed): weight_ih (D,3H),
    weight_hh (H,3H), biases (1,3H) for each direction."""
    H = rnn_hidden
    k = 1.0 / np.sqrt(H)
    keys = jax.random.split(key, 8)

    def u(kk, shape):
        return jax.random.uniform(kk, shape, jnp.float32, -k, k)

    return {
        "w_ih_f": u(keys[0], (input_dim, 3 * H)),
        "w_hh_f": u(keys[1], (H, 3 * H)),
        "b_ih_f": u(keys[2], (1, 3 * H)),
        "b_hh_f": u(keys[3], (1, 3 * H)),
        "w_ih_b": u(keys[4], (input_dim, 3 * H)),
        "w_hh_b": u(keys[5], (H, 3 * H)),
        "b_ih_b": u(keys[6], (1, 3 * H)),
        "b_hh_b": u(keys[7], (1, 3 * H)),
    }


# ----------------------------- pure-JAX reference -----------------------------

def _ref_direction(x, lens, w_ih, w_hh, b_ih, b_hh, reverse):
    B, T, D = x.shape
    H = w_hh.shape[0]
    h = jnp.zeros((B, H), jnp.float32)
    outs = [None] * T
    ts = range(T - 1, -1, -1) if reverse else range(T)
    lens = lens.reshape(B, 1)
    for t in ts:
        x_t = x[:, t, :]
        gi = x_t @ w_ih + b_ih
        gh = h @ w_hh + b_hh
        r = jax.nn.sigmoid(gi[:, :H] + gh[:, :H])
        z = jax.nn.sigmoid(gi[:, H:2 * H] + gh[:, H:2 * H])
        n = jnp.tanh(gi[:, 2 * H:] + r * gh[:, 2 * H:])
        h_new = (1.0 - z) * n + z * h
        valid = t < lens
        outs[t] = jnp.where(valid, h_new, 0.0)
        h = jnp.where(valid, h_new, h)
    return jnp.stack(outs, axis=1), h


def encoder_reference(x, input_lens, params):
    lens = jnp.asarray(np.array(input_lens), jnp.int32)
    of, hf = _ref_direction(x, lens, params["w_ih_f"], params["w_hh_f"],
                            params["b_ih_f"], params["b_hh_f"], reverse=False)
    ob, hb = _ref_direction(x, lens, params["w_ih_b"], params["w_hh_b"],
                            params["b_ih_b"], params["b_hh_b"], reverse=True)
    return jnp.concatenate([of, ob], axis=-1), jnp.stack([hf, hb], axis=0)


# ----------------------------- main -----------------------------

if __name__ == "__main__":
    B, T, D, H = 8, 8, 32, 32               # batch, max seq len, input dim, rnn_hidden
    input_lens = [8, 5, 7, 3, 8, 2, 6, 4]   # max(lens) == T

    key = jax.random.PRNGKey(0)
    k_x, k_p = jax.random.split(key)
    x = jax.random.normal(k_x, (B, T, D), jnp.float32)
    params = init_params(k_p, D, H)

    outputs, en_hidden = encoder_forward(x, input_lens, params)
    outputs = jax.block_until_ready(outputs)
    en_hidden = jax.block_until_ready(en_hidden)

    assert outputs.shape == (B, T, 2 * H)
    assert en_hidden.shape == (2, B, H)

    # Correctness vs. a pure-f32 JAX reference. The kernel uses bf16 MXU
    # operands (f32 accumulate / f32 elementwise), so allow bf16-level slack.
    ref_out, ref_hid = encoder_reference(x, input_lens, params)
    np.testing.assert_allclose(np.asarray(outputs), np.asarray(ref_out),
                               rtol=2e-2, atol=2e-2)
    np.testing.assert_allclose(np.asarray(en_hidden), np.asarray(ref_hid),
                               rtol=2e-2, atol=2e-2)

    print("KERNEL_OK")
</pallas_src>

<mosaic_0001>
module attributes {stable_mosaic.version = 11 : i64} {
  func.func @bigru_kernel(%arg0: i32, %arg1: memref<1x64x32xbf16, #tpu.memory_space<vmem>>, %arg2: memref<8x1xi32, #tpu.memory_space<vmem>>, %arg3: memref<32x768xbf16, #tpu.memory_space<vmem>>, %arg4: memref<128x384xbf16, #tpu.memory_space<vmem>>, %arg5: memref<128x384xbf16, #tpu.memory_space<vmem>>, %arg6: memref<1x768xf32, #tpu.memory_space<vmem>>, %arg7: memref<1x768xf32, #tpu.memory_space<vmem>>, %arg8: memref<8x8x256xf32, #tpu.memory_space<vmem>>, %arg9: memref<8x256xf32, #tpu.memory_space<vmem>>, %arg10: memref<64x768xf32, #tpu.memory_space<vmem>>) attributes {dimension_semantics = [#tpu.dimension_semantics<parallel>], iteration_bounds = array<i64: 1>, scalar_prefetch = 0 : i64, scratch_operands = 1 : i64, tpu.core_type = #tpu.core_type<tc>, window_params = [{transform_indices = @transform_0, window_bounds = array<i64: 1, 64, 32>}, {transform_indices = @transform_1, window_bounds = array<i64: 8, 1>}, {pipeline_mode = #tpu.pipeline_mode<synchronous>, transform_indices = @transform_2, window_bounds = array<i64: 32, 768>}, {pipeline_mode = #tpu.pipeline_mode<synchronous>, transform_indices = @transform_3, window_bounds = array<i64: 128, 384>}, {pipeline_mode = #tpu.pipeline_mode<synchronous>, transform_indices = @transform_4, window_bounds = array<i64: 128, 384>}, {pipeline_mode = #tpu.pipeline_mode<synchronous>, transform_indices = @transform_5, window_bounds = array<i64: 1, 768>}, {pipeline_mode = #tpu.pipeline_mode<synchronous>, transform_indices = @transform_6, window_bounds = array<i64: 1, 768>}, {transform_indices = @transform_7, window_bounds = array<i64: 8, 8, 256>}, {transform_indices = @transform_8, window_bounds = array<i64: 8, 256>}]} {
    %c0 = arith.constant 0 : index
    %c0_0 = arith.constant 0 : index
    %c0_1 = arith.constant 0 : index
    %0 = vector.load %arg1[%c0, %c0_0, %c0_1] : memref<1x64x32xbf16, #tpu.memory_space<vmem>>, vector<1x64x32xbf16>
    %1 = vector.shape_cast %0 : vector<1x64x32xbf16> to vector<64x32xbf16>
    %c0_2 = arith.constant 0 : index
    %c0_3 = arith.constant 0 : index
    %2 = vector.load %arg3[%c0_2, %c0_3] : memref<32x768xbf16, #tpu.memory_space<vmem>>, vector<32x768xbf16>
    %cst = arith.constant dense<0.000000e+00> : vector<64x768xf32>
    %3 = tpu.matmul %1, %2, %cst {dimension_numbers = #tpu.dot_dimension_numbers<[1], [0], [0], [1], [0, 0, 1, 1], [], []>} : vector<64x32xbf16>, vector<32x768xbf16>, vector<64x768xf32> -> vector<64x768xf32>
    %c0_4 = arith.constant 0 : index
    %c0_5 = arith.constant 0 : index
    %4 = vector.load %arg6[%c0_4, %c0_5] : memref<1x768xf32, #tpu.memory_space<vmem>>, vector<1x768xf32>
    %5 = vector.broadcast %4 : vector<1x768xf32> to vector<64x768xf32>
    %6 = arith.addf %3, %5 : vector<64x768xf32>
    %c0_6 = arith.constant 0 : index
    %c0_7 = arith.constant 0 : index
    %7 = vector.load %arg10[%c0_6, %c0_7] : memref<64x768xf32, #tpu.memory_space<vmem>>, vector<64x768xf32>
    tpu.vector_store %arg10[%c0_6, %c0_7], %6 {strides = array<i32>} : memref<64x768xf32, #tpu.memory_space<vmem>>, vector<64x768xf32>,
    %c0_8 = arith.constant 0 : index
    %c0_9 = arith.constant 0 : index
    %8 = vector.load %arg4[%c0_8, %c0_9] : memref<128x384xbf16, #tpu.memory_space<vmem>>, vector<128x384xbf16>
    %c0_10 = arith.constant 0 : index
    %c0_11 = arith.constant 0 : index
    %9 = vector.load %arg5[%c0_10, %c0_11] : memref<128x384xbf16, #tpu.memory_space<vmem>>, vector<128x384xbf16>
    %c0_12 = arith.constant 0 : index
    %c0_13 = arith.constant 0 : index
    %10 = vector.load %arg7[%c0_12, %c0_13] : memref<1x768xf32, #tpu.memory_space<vmem>>, vector<1x384xf32>
    %11 = vector.shape_cast %10 : vector<1x384xf32> to vector<1x384xf32>
    %12 = vector.broadcast %11 : vector<1x384xf32> to vector<8x384xf32>
    %c0_14 = arith.constant 0 : index
    %c384 = arith.constant 384 : index
    %13 = vector.load %arg7[%c0_14, %c384] : memref<1x768xf32, #tpu.memory_space<vmem>>, vector<1x384xf32>
    %14 = vector.shape_cast %13 : vector<1x384xf32> to vector<1x384xf32>
    %15 = vector.broadcast %14 : vector<1x384xf32> to vector<8x384xf32>
    %c0_15 = arith.constant 0 : index
    %c0_16 = arith.constant 0 : index
    %16 = vector.load %arg2[%c0_15, %c0_16] : memref<8x1xi32, #tpu.memory_space<vmem>>, vector<8x1xi32>
    %17 = vector.shape_cast %16 : vector<8x1xi32> to vector<8x1xi32>
    %18 = vector.broadcast %17 : vector<8x1xi32> to vector<8x128xi32>
    %cst_17 = arith.constant 0.000000e+00 : f32
    %19 = vector.broadcast %cst_17 : f32 to vector<8x128xf32>
    %c0_i32 = arith.constant 0 : i32
    %c7_i32 = arith.constant 7 : i32
    %20 = arith.subi %c7_i32, %c0_i32 : i32
    %21 = arith.truncf %19 : vector<8x128xf32> to vector<8x128xbf16>
    %cst_18 = arith.constant dense<0.000000e+00> : vector<8x384xf32>
    %22 = tpu.matmul %21, %8, %cst_18 {dimension_numbers = #tpu.dot_dimension_numbers<[1], [0], [0], [1], [0, 0, 1, 1], [], []>} : vector<8x128xbf16>, vector<128x384xbf16>, vector<8x384xf32> -> vector<8x384xf32>
    %23 = arith.addf %22, %12 : vector<8x384xf32>
    %24 = arith.truncf %19 : vector<8x128xf32> to vector<8x128xbf16>
    %cst_19 = arith.constant dense<0.000000e+00> : vector<8x384xf32>
    %25 = tpu.matmul %24, %9, %cst_19 {dimension_numbers = #tpu.dot_dimension_numbers<[1], [0], [0], [1], [0, 0, 1, 1], [], []>} : vector<8x128xbf16>, vector<128x384xbf16>, vector<8x384xf32> -> vector<8x384xf32>
    %26 = arith.addf %25, %15 : vector<8x384xf32>
    %c8_i32 = arith.constant 8 : i32
    %27 = arith.muli %c0_i32, %c8_i32 : i32
    %28 = tpu.assume_multiple %27, 8 : i32
    %29 = arith.index_cast %28 : i32 to index
    %c0_20 = arith.constant 0 : index
    %30 = vector.load %arg10[%29, %c0_20] : memref<64x768xf32, #tpu.memory_space<vmem>>, vector<8x384xf32>
    %c8_i32_21 = arith.constant 8 : i32
    %31 = arith.muli %20, %c8_i32_21 : i32
    %32 = tpu.assume_multiple %31, 8 : i32
    %33 = arith.index_cast %32 : i32 to index
    %c384_22 = arith.constant 384 : index
    %34 = vector.load %arg10[%33, %c384_22] : memref<64x768xf32, #tpu.memory_space<vmem>>, vector<8x384xf32>
    %35 = vector.extract_strided_slice %30 {offsets = [0, 0], sizes = [8, 256], strides = [1, 1]} : vector<8x384xf32> to vector<8x256xf32>
    %36 = vector.extract_strided_slice %23 {offsets = [0, 0], sizes = [8, 256], strides = [1, 1]} : vector<8x384xf32> to vector<8x256xf32>
    %37 = arith.addf %35, %36 : vector<8x256xf32>
    %38 = arith.negf %37 : vector<8x256xf32>
    %39 = math.exp %38 : vector<8x256xf32>
    %cst_23 = arith.constant 1.000000e+00 : f32
    %40 = vector.broadcast %cst_23 : f32 to vector<8x256xf32>
    %41 = arith.addf %40, %39 : vector<8x256xf32>
    %42 = arith.divf %40, %41 : vector<8x256xf32>
    %43 = vector.extract_strided_slice %42 {offsets = [0, 0], sizes = [8, 128], strides = [1, 1]} : vector<8x256xf32> to vector<8x128xf32>
    %44 = vector.extract_strided_slice %42 {offsets = [0, 128], sizes = [8, 128], strides = [1, 1]} : vector<8x256xf32> to vector<8x128xf32>
    %45 = vector.extract_strided_slice %30 {offsets = [0, 256], sizes = [8, 128], strides = [1, 1]} : vector<8x384xf32> to vector<8x128xf32>
    %46 = vector.extract_strided_slice %23 {offsets = [0, 256], sizes = [8, 128], strides = [1, 1]} : vector<8x384xf32> to vector<8x128xf32>
    %47 = arith.mulf %43, %46 : vector<8x128xf32>
    %48 = arith.addf %45, %47 : vector<8x128xf32>
    %49 = math.tanh %48 : vector<8x128xf32>
    %cst_24 = arith.constant 1.000000e+00 : f32
    %50 = vector.broadcast %cst_24 : f32 to vector<8x128xf32>
    %51 = arith.subf %50, %44 : vector<8x128xf32>
    %52 = arith.mulf %51, %49 : vector<8x128xf32>
    %53 = arith.mulf %44, %19 : vector<8x128xf32>
    %54 = arith.addf %52, %53 : vector<8x128xf32>
    %55 = vector.extract_strided_slice %34 {offsets = [0, 0], sizes = [8, 256], strides = [1, 1]} : vector<8x384xf32> to vector<8x256xf32>
    %56 = vector.extract_strided_slice %26 {offsets = [0, 0], sizes = [8, 256], strides = [1, 1]} : vector<8x384xf32> to vector<8x256xf32>
    %57 = arith.addf %55, %56 : vector<8x256xf32>
    %58 = arith.negf %57 : vector<8x256xf32>
    %59 = math.exp %58 : vector<8x256xf32>
    %cst_25 = arith.constant 1.000000e+00 : f32
    %60 = vector.broadcast %cst_25 : f32 to vector<8x256xf32>
    %61 = arith.addf %60, %59 : vector<8x256xf32>
    %62 = arith.divf %60, %61 : vector<8x256xf32>
    %63 = vector.extract_strided_slice %62 {offsets = [0, 0], sizes = [8, 128], strides = [1, 1]} : vector<8x256xf32> to vector<8x128xf32>
    %64 = vector.extract_strided_slice %62 {offsets = [0, 128], sizes = [8, 128], strides = [1, 1]} : vector<8x256xf32> to vector<8x128xf32>
    %65 = vector.extract_strided_slice %34 {offsets = [0, 256], sizes = [8, 128], strides = [1, 1]} : vector<8x384xf32> to vector<8x128xf32>
    %66 = vector.extract_strided_slice %26 {offsets = [0, 256], sizes = [8, 128], strides = [1, 1]} : vector<8x384xf32> to vector<8x128xf32>
    %67 = arith.mulf %63, %66 : vector<8x128xf32>
    %68 = arith.addf %65, %67 : vector<8x128xf32>
    %69 = math.tanh %68 : vector<8x128xf32>
    %cst_26 = arith.constant 1.000000e+00 : f32
    %70 = vector.broadcast %cst_26 : f32 to vector<8x128xf32>
    %71 = arith.subf %70, %64 : vector<8x128xf32>
    %72 = arith.mulf %71, %69 : vector<8x128xf32>
    %73 = arith.mulf %64, %19 : vector<8x128xf32>
    %74 = arith.addf %72, %73 : vector<8x128xf32>
    %75 = vector.broadcast %c0_i32 : i32 to vector<8x128xi32>
    %76 = arith.cmpi slt, %75, %18 : vector<8x128xi32>
    %77 = vector.broadcast %20 : i32 to vector<8x128xi32>
    %78 = arith.cmpi slt, %77, %18 : vector<8x128xi32>
    %cst_27 = arith.constant 0.000000e+00 : f32
    %79 = vector.broadcast %cst_27 : f32 to vector<8x128xf32>
    %80 = arith.select %76, %54, %79 : vector<8x128xi1>, vector<8x128xf32>
    %81 = arith.index_cast %c0_i32 : i32 to index
    %c0_28 = arith.constant 0 : index
    %c0_29 = arith.constant 0 : index
    %82 = vector.load %arg8[%81, %c0_28, %c0_29] : memref<8x8x256xf32, #tpu.memory_space<vmem>>, vector<1x8x128xf32>
    %83 = vector.shape_cast %82 : vector<1x8x128xf32> to vector<8x128xf32>
    %84 = vector.shape_cast %80 : vector<8x128xf32> to vector<1x8x128xf32>
    tpu.vector_store %arg8[%81, %c0_28, %c0_29], %84 {strides = array<i32>} : memref<8x8x256xf32, #tpu.memory_space<vmem>>, vector<1x8x128xf32>,
    %cst_30 = arith.constant 0.000000e+00 : f32
    %85 = vector.broadcast %cst_30 : f32 to vector<8x128xf32>
    %86 = arith.select %78, %74, %85 : vector<8x128xi1>, vector<8x128xf32>
    %87 = arith.index_cast %20 : i32 to index
    %c0_31 = arith.constant 0 : index
    %c128 = arith.constant 128 : index
    %88 = vector.load %arg8[%87, %c0_31, %c128] : memref<8x8x256xf32, #tpu.memory_space<vmem>>, vector<1x8x128xf32>
    %89 = vector.shape_cast %88 : vector<1x8x128xf32> to vector<8x128xf32>
    %90 = vector.shape_cast %86 : vector<8x128xf32> to vector<1x8x128xf32>
    tpu.vector_store %arg8[%87, %c0_31, %c128], %90 {strides = array<i32>} : memref<8x8x256xf32, #tpu.memory_space<vmem>>, vector<1x8x128xf32>,
    %91 = arith.select %76, %54, %19 : vector<8x128xi1>, vector<8x128xf32>
    %92 = arith.select %78, %74, %19 : vector<8x128xi1>, vector<8x128xf32>
    %c1_i32 = arith.constant 1 : i32
    %c7_i32_32 = arith.constant 7 : i32
    %93 = arith.subi %c7_i32_32, %c1_i32 : i32
    %94 = arith.truncf %91 : vector<8x128xf32> to vector<8x128xbf16>
    %cst_33 = arith.constant dense<0.000000e+00> : vector<8x384xf32>
    %95 = tpu.matmul %94, %8, %cst_33 {dimension_numbers = #tpu.dot_dimension_numbers<[1], [0], [0], [1], [0, 0, 1, 1], [], []>} : vector<8x128xbf16>, vector<128x384xbf16>, vector<8x384xf32> -> vector<8x384xf32>
    %96 = arith.addf %95, %12 : vector<8x384xf32>
    %97 = arith.truncf %92 : vector<8x128xf32> to vector<8x128xbf16>
    %cst_34 = arith.constant dense<0.000000e+00> : vector<8x384xf32>
    %98 = tpu.matmul %97, %9, %cst_34 {dimension_numbers = #tpu.dot_dimension_numbers<[1], [0], [0], [1], [0, 0, 1, 1], [], []>} : vector<8x128xbf16>, vector<128x384xbf16>, vector<8x384xf32> -> vector<8x384xf32>
    %99 = arith.addf %98, %15 : vector<8x384xf32>
    %c8_i32_35 = arith.constant 8 : i32
    %100 = arith.muli %c1_i32, %c8_i32_35 : i32
    %101 = tpu.assume_multiple %100, 8 : i32
    %102 = arith.index_cast %101 : i32 to index
    %c0_36 = arith.constant 0 : index
    %103 = vector.load %arg10[%102, %c0_36] : memref<64x768xf32, #tpu.memory_space<vmem>>, vector<8x384xf32>
    %c8_i32_37 = arith.constant 8 : i32
    %104 = arith.muli %93, %c8_i32_37 : i32
    %105 = tpu.assume_multiple %104, 8 : i32
    %106 = arith.index_cast %105 : i32 to index
    %c384_38 = arith.constant 384 : index
    %107 = vector.load %arg10[%106, %c384_38] : memref<64x768xf32, #tpu.memory_space<vmem>>, vector<8x384xf32>
    %108 = vector.extract_strided_slice %103 {offsets = [0, 0], sizes = [8, 256], strides = [1, 1]} : vector<8x384xf32> to vector<8x256xf32>
    %109 = vector.extract_strided_slice %96 {offsets = [0, 0], sizes = [8, 256], strides = [1, 1]} : vector<8x384xf32> to vector<8x256xf32>
    %110 = arith.addf %108, %109 : vector<8x256xf32>
    %111 = arith.negf %110 : vector<8x256xf32>
    %112 = math.exp %111 : vector<8x256xf32>
    %cst_39 = arith.constant 1.000000e+00 : f32
    %113 = vector.broadcast %cst_39 : f32 to vector<8x256xf32>
    %114 = arith.addf %113, %112 : vector<8x256xf32>
    %115 = arith.divf %113, %114 : vector<8x256xf32>
    %116 = vector.extract_strided_slice %115 {offsets = [0, 0], sizes = [8, 128], strides = [1, 1]} : vector<8x256xf32> to vector<8x128xf32>
    %117 = vector.extract_strided_slice %115 {offsets = [0, 128], sizes = [8, 128], strides = [1, 1]} : vector<8x256xf32> to vector<8x128xf32>
    %118 = vector.extract_strided_slice %103 {offsets = [0, 256], sizes = [8, 128], strides = [1, 1]} : vector<8x384xf32> to vector<8x128xf32>
    %119 = vector.extract_strided_slice %96 {offsets = [0, 256], sizes = [8, 128], strides = [1, 1]} : vector<8x384xf32> to vector<8x128xf32>
    %120 = arith.mulf %116, %119 : vector<8x128xf32>
    %121 = arith.addf %118, %120 : vector<8x128xf32>
    %122 = math.tanh %121 : vector<8x128xf32>
    %cst_40 = arith.constant 1.000000e+00 : f32
    %123 = vector.broadcast %cst_40 : f32 to vector<8x128xf32>
    %124 = arith.subf %123, %117 : vector<8x128xf32>
    %125 = arith.mulf %124, %122 : vector<8x128xf32>
    %126 = arith.mulf %117, %91 : vector<8x128xf32>
    %127 = arith.addf %125, %126 : vector<8x128xf32>
    %128 = vector.extract_strided_slice %107 {offsets = [0, 0], sizes = [8, 256], strides = [1, 1]} : vector<8x384xf32> to vector<8x256xf32>
    %129 = vector.extract_strided_slice %99 {offsets = [0, 0], sizes = [8, 256], strides = [1, 1]} : vector<8x384xf32> to vector<8x256xf32>
    %130 = arith.addf %128, %129 : vector<8x256xf32>
    %131 = arith.negf %130 : vector<8x256xf32>
    %132 = math.exp %131 : vector<8x256xf32>
    %cst_41 = arith.constant 1.000000e+00 : f32
    %133 = vector.broadcast %cst_41 : f32 to vector<8x256xf32>
    %134 = arith.addf %133, %132 : vector<8x256xf32>
    %135 = arith.divf %133, %134 : vector<8x256xf32>
    %136 = vector.extract_strided_slice %135 {offsets = [0, 0], sizes = [8, 128], strides = [1, 1]} : vector<8x256xf32> to vector<8x128xf32>
    %137 = vector.extract_strided_slice %135 {offsets = [0, 128], sizes = [8, 128], strides = [1, 1]} : vector<8x256xf32> to vector<8x128xf32>
    %138 = vector.extract_strided_slice %107 {offsets = [0, 256], sizes = [8, 128], strides = [1, 1]} : vector<8x384xf32> to vector<8x128xf32>
    %139 = vector.extract_strided_slice %99 {offsets = [0, 256], sizes = [8, 128], strides = [1, 1]} : vector<8x384xf32> to vector<8x128xf32>
    %140 = arith.mulf %136, %139 : vector<8x128xf32>
    %141 = arith.addf %138, %140 : vector<8x128xf32>
    %142 = math.tanh %141 : vector<8x128xf32>
    %cst_42 = arith.constant 1.000000e+00 : f32
    %143 = vector.broadcast %cst_42 : f32 to vector<8x128xf32>
    %144 = arith.subf %143, %137 : vector<8x128xf32>
    %145 = arith.mulf %144, %142 : vector<8x128xf32>
    %146 = arith.mulf %137, %92 : vector<8x128xf32>
    %147 = arith.addf %145, %146 : vector<8x128xf32>
    %148 = vector.broadcast %c1_i32 : i32 to vector<8x128xi32>
    %149 = arith.cmpi slt, %148, %18 : vector<8x128xi32>
    %150 = vector.broadcast %93 : i32 to vector<8x128xi32>
    %151 = arith.cmpi slt, %150, %18 : vector<8x128xi32>
    %cst_43 = arith.constant 0.000000e+00 : f32
    %152 = vector.broadcast %cst_43 : f32 to vector<8x128xf32>
    %153 = arith.select %149, %127, %152 : vector<8x128xi1>, vector<8x128xf32>
    %154 = arith.index_cast %c1_i32 : i32 to index
    %c0_44 = arith.constant 0 : index
    %c0_45 = arith.constant 0 : index
    %155 = vector.load %arg8[%154, %c0_44, %c0_45] : memref<8x8x256xf32, #tpu.memory_space<vmem>>, vector<1x8x128xf32>
    %156 = vector.shape_cast %155 : vector<1x8x128xf32> to vector<8x128xf32>
    %157 = vector.shape_cast %153 : vector<8x128xf32> to vector<1x8x128xf32>
    tpu.vector_store %arg8[%154, %c0_44, %c0_45], %157 {strides = array<i32>} : memref<8x8x256xf32, #tpu.memory_space<vmem>>, vector<1x8x128xf32>,
    %cst_46 = arith.constant 0.000000e+00 : f32
    %158 = vector.broadcast %cst_46 : f32 to vector<8x128xf32>
    %159 = arith.select %151, %147, %158 : vector<8x128xi1>, vector<8x128xf32>
    %160 = arith.index_cast %93 : i32 to index
    %c0_47 = arith.constant 0 : index
    %c128_48 = arith.constant 128 : index
    %161 = vector.load %arg8[%160, %c0_47, %c128_48] : memref<8x8x256xf32, #tpu.memory_space<vmem>>, vector<1x8x128xf32>
    %162 = vector.shape_cast %161 : vector<1x8x128xf32> to vector<8x128xf32>
    %163 = vector.shape_cast %159 : vector<8x128xf32> to vector<1x8x128xf32>
    tpu.vector_store %arg8[%160, %c0_47, %c128_48], %163 {strides = array<i32>} : memref<8x8x256xf32, #tpu.memory_space<vmem>>, vector<1x8x128xf32>,
    %164 = arith.select %149, %127, %91 : vector<8x128xi1>, vector<8x128xf32>
    %165 = arith.select %151, %147, %92 : vector<8x128xi1>, vector<8x128xf32>
    %c2_i32 = arith.constant 2 : i32
    %c7_i32_49 = arith.constant 7 : i32
    %166 = arith.subi %c7_i32_49, %c2_i32 : i32
    %167 = arith.truncf %164 : vector<8x128xf32> to vector<8x128xbf16>
    %cst_50 = arith.constant dense<0.000000e+00> : vector<8x384xf32>
    %168 = tpu.matmul %167, %8, %cst_50 {dimension_numbers = #tpu.dot_dimension_numbers<[1], [0], [0], [1], [0, 0, 1, 1], [], []>} : vector<8x128xbf16>, vector<128x384xbf16>, vector<8x384xf32> -> vector<8x384xf32>
    %169 = arith.addf %168, %12 : vector<8x384xf32>
    %170 = arith.truncf %165 : vector<8x128xf32> to vector<8x128xbf16>
    %cst_51 = arith.constant dense<0.000000e+00> : vector<8x384xf32>
    %171 = tpu.matmul %170, %9, %cst_51 {dimension_numbers = #tpu.dot_dimension_numbers<[1], [0], [0], [1], [0, 0, 1, 1], [], []>} : vector<8x128xbf16>, vector<128x384xbf16>, vector<8x384xf32> -> vector<8x384xf32>
    %172 = arith.addf %171, %15 : vector<8x384xf32>
    %c8_i32_52 = arith.constant 8 : i32
    %173 = arith.muli %c2_i32, %c8_i32_52 : i32
    %174 = tpu.assume_multiple %173, 8 : i32
    %175 = arith.index_cast %174 : i32 to index
    %c0_53 = arith.constant 0 : index
    %176 = vector.load %arg10[%175, %c0_53] : memref<64x768xf32, #tpu.memory_space<vmem>>, vector<8x384xf32>
    %c8_i32_54 = arith.constant 8 : i32
    %177 = arith.muli %166, %c8_i32_54 : i32
    %178 = tpu.assume_multiple %177, 8 : i32
    %179 = arith.index_cast %178 : i32 to index
    %c384_55 = arith.constant 384 : index
    %180 = vector.load %arg10[%179, %c384_55] : memref<64x768xf32, #tpu.memory_space<vmem>>, vector<8x384xf32>
    %181 = vector.extract_strided_slice %176 {offsets = [0, 0], sizes = [8, 256], strides = [1, 1]} : vector<8x384xf32> to vector<8x256xf32>
    %182 = vector.extract_strided_slice %169 {offsets = [0, 0], sizes = [8, 256], strides = [1, 1]} : vector<8x384xf32> to vector<8x256xf32>
    %183 = arith.addf %181, %182 : vector<8x256xf32>
    %184 = arith.negf %183 : vector<8x256xf32>
    %185 = math.exp %184 : vector<8x256xf32>
    %cst_56 = arith.constant 1.000000e+00 : f32
    %186 = vector.broadcast %cst_56 : f32 to vector<8x256xf32>
    %187 = arith.addf %186, %185 : vector<8x256xf32>
    %188 = arith.divf %186, %187 : vector<8x256xf32>
    %189 = vector.extract_strided_slice %188 {offsets = [0, 0], sizes = [8, 128], strides = [1, 1]} : vector<8x256xf32> to vector<8x128xf32>
    %190 = vector.extract_strided_slice %188 {offsets = [0, 128], sizes = [8, 128], strides = [1, 1]} : vector<8x256xf32> to vector<8x128xf32>
    %191 = vector.extract_strided_slice %176 {offsets = [0, 256], sizes = [8, 128], strides = [1, 1]} : vector<8x384xf32> to vector<8x128xf32>
    %192 = vector.extract_strided_slice %169 {offsets = [0, 256], sizes = [8, 128], strides = [1, 1]} : vector<8x384xf32> to vector<8x128xf32>
    %193 = arith.mulf %189, %192 : vector<8x128xf32>
    %194 = arith.addf %191, %193 : vector<8x128xf32>
    %195 = math.tanh %194 : vector<8x128xf32>
    %cst_57 = arith.constant 1.000000e+00 : f32
    %196 = vector.broadcast %cst_57 : f32 to vector<8x128xf32>
    %197 = arith.subf %196, %190 : vector<8x128xf32>
    %198 = arith.mulf %197, %195 : vector<8x128xf32>
    %199 = arith.mulf %190, %164 : vector<8x128xf32>
    %200 = arith.addf %198, %199 : vector<8x128xf32>
    %201 = vector.extract_strided_slice %180 {offsets = [0, 0], sizes = [8, 256], strides = [1, 1]} : vector<8x384xf32> to vector<8x256xf32>
    %202 = vector.extract_strided_slice %172 {offsets = [0, 0], sizes = [8, 256], strides = [1, 1]} : vector<8x384xf32> to vector<8x256xf32>
    %203 = arith.addf %201, %202 : vector<8x256xf32>
    %204 = arith.negf %203 : vector<8x256xf32>
    %205 = math.exp %204 : vector<8x256xf32>
    %cst_58 = arith.constant 1.000000e+00 : f32
    %206 = vector.broadcast %cst_58 : f32 to vector<8x256xf32>
    %207 = arith.addf %206, %205 : vector<8x256xf32>
    %208 = arith.divf %206, %207 : vector<8x256xf32>
    %209 = vector.extract_strided_slice %208 {offsets = [0, 0], sizes = [8, 128], strides = [1, 1]} : vector<8x256xf32> to vector<8x128xf32>
    %210 = vector.extract_strided_slice %208 {offsets = [0, 128], sizes = [8, 128], strides = [1, 1]} : vector<8x256xf32> to vector<8x128xf32>
    %211 = vector.extract_strided_slice %180 {offsets = [0, 256], sizes = [8, 128], strides = [1, 1]} : vector<8x384xf32> to vector<8x128xf32>
    %212 = vector.extract_strided_slice %172 {offsets = [0, 256], sizes = [8, 128], strides = [1, 1]} : vector<8x384xf32> to vector<8x128xf32>
    %213 = arith.mulf %209, %212 : vector<8x128xf32>
    %214 = arith.addf %211, %213 : vector<8x128xf32>
    %215 = math.tanh %214 : vector<8x128xf32>
    %cst_59 = arith.constant 1.000000e+00 : f32
    %216 = vector.broadcast %cst_59 : f32 to vector<8x128xf32>
    %217 = arith.subf %216, %210 : vector<8x128xf32>
    %218 = arith.mulf %217, %215 : vector<8x128xf32>
    %219 = arith.mulf %210, %165 : vector<8x128xf32>
    %220 = arith.addf %218, %219 : vector<8x128xf32>
    %221 = vector.broadcast %c2_i32 : i32 to vector<8x128xi32>
    %222 = arith.cmpi slt, %221, %18 : vector<8x128xi32>
    %223 = vector.broadcast %166 : i32 to vector<8x128xi32>
    %224 = arith.cmpi slt, %223, %18 : vector<8x128xi32>
    %cst_60 = arith.constant 0.000000e+00 : f32
    %225 = vector.broadcast %cst_60 : f32 to vector<8x128xf32>
    %226 = arith.select %222, %200, %225 : vector<8x128xi1>, vector<8x128xf32>
    %227 = arith.index_cast %c2_i32 : i32 to index
    %c0_61 = arith.constant 0 : index
    %c0_62 = arith.constant 0 : index
    %228 = vector.load %arg8[%227, %c0_61, %c0_62] : memref<8x8x256xf32, #tpu.memory_space<vmem>>, vector<1x8x128xf32>
    %229 = vector.shape_cast %228 : vector<1x8x128xf32> to vector<8x128xf32>
    %230 = vector.shape_cast %226 : vector<8x128xf32> to vector<1x8x128xf32>
    tpu.vector_store %arg8[%227, %c0_61, %c0_62], %230 {strides = array<i32>} : memref<8x8x256xf32, #tpu.memory_space<vmem>>, vector<1x8x128xf32>,
    %cst_63 = arith.constant 0.000000e+00 : f32
    %231 = vector.broadcast %cst_63 : f32 to vector<8x128xf32>
    %232 = arith.select %224, %220, %231 : vector<8x128xi1>, vector<8x128xf32>
    %233 = arith.index_cast %166 : i32 to index
    %c0_64 = arith.constant 0 : index
    %c128_65 = arith.constant 128 : index
    %234 = vector.load %arg8[%233, %c0_64, %c128_65] : memref<8x8x256xf32, #tpu.memory_space<vmem>>, vector<1x8x128xf32>
    %235 = vector.shape_cast %234 : vector<1x8x128xf32> to vector<8x128xf32>
    %236 = vector.shape_cast %232 : vector<8x128xf32> to vector<1x8x128xf32>
    tpu.vector_store %arg8[%233, %c0_64, %c128_65], %236 {strides = array<i32>} : memref<8x8x256xf32, #tpu.memory_space<vmem>>, vector<1x8x128xf32>,
    %237 = arith.select %222, %200, %164 : vector<8x128xi1>, vector<8x128xf32>
    %238 = arith.select %224, %220, %165 : vector<8x128xi1>, vector<8x128xf32>
    %c3_i32 = arith.constant 3 : i32
    %c7_i32_66 = arith.constant 7 : i32
    %239 = arith.subi %c7_i32_66, %c3_i32 : i32
    %240 = arith.truncf %237 : vector<8x128xf32> to vector<8x128xbf16>
    %cst_67 = arith.constant dense<0.000000e+00> : vector<8x384xf32>
    %241 = tpu.matmul %240, %8, %cst_67 {dimension_numbers = #tpu.dot_dimension_numbers<[1], [0], [0], [1], [0, 0, 1, 1], [], []>} : vector<8x128xbf16>, vector<128x384xbf16>, vector<8x384xf32> -> vector<8x384xf32>
    %242 = arith.addf %241, %12 : vector<8x384xf32>
    %243 = arith.truncf %238 : vector<8x128xf32> to vector<8x128xbf16>
    %cst_68 = arith.constant dense<0.000000e+00> : vector<8x384xf32>
    %244 = tpu.matmul %243, %9, %cst_68 {dimension_numbers = #tpu.dot_dimension_numbers<[1], [0], [0], [1], [0, 0, 1, 1], [], []>} : vector<8x128xbf16>, vector<128x384xbf16>, vector<8x384xf32> -> vector<8x384xf32>
    %245 = arith.addf %244, %15 : vector<8x384xf32>
    %c8_i32_69 = arith.constant 8 : i32
    %246 = arith.muli %c3_i32, %c8_i32_69 : i32
    %247 = tpu.assume_multiple %246, 8 : i32
    %248 = arith.index_cast %247 : i32 to index
    %c0_70 = arith.constant 0 : index
    %249 = vector.load %arg10[%248, %c0_70] : memref<64x768xf32, #tpu.memory_space<vmem>>, vector<8x384xf32>
    %c8_i32_71 = arith.constant 8 : i32
    %250 = arith.muli %239, %c8_i32_71 : i32
    %251 = tpu.assume_multiple %250, 8 : i32
    %252 = arith.index_cast %251 : i32 to index
    %c384_72 = arith.constant 384 : index
    %253 = vector.load %arg10[%252, %c384_72] : memref<64x768xf32, #tpu.memory_space<vmem>>, vector<8x384xf32>
    %254 = vector.extract_strided_slice %249 {offsets = [0, 0], sizes = [8, 256], strides = [1, 1]} : vector<8x384xf32> to vector<8x256xf32>
    %255 = vector.extract_strided_slice %242 {offsets = [0, 0], sizes = [8, 256], strides = [1, 1]} : vector<8x384xf32> to vector<8x256xf32>
    %256 = arith.addf %254, %255 : vector<8x256xf32>
    %257 = arith.negf %256 : vector<8x256xf32>
    %258 = math.exp %257 : vector<8x256xf32>
    %cst_73 = arith.constant 1.000000e+00 : f32
    %259 = vector.broadcast %cst_73 : f32 to vector<8x256xf32>
    %260 = arith.addf %259, %258 : vector<8x256xf32>
    %261 = arith.divf %259, %260 : vector<8x256xf32>
    %262 = vector.extract_strided_slice %261 {offsets = [0, 0], sizes = [8, 128], strides = [1, 1]} : vector<8x256xf32> to vector<8x128xf32>
    %263 = vector.extract_strided_slice %261 {offsets = [0, 128], sizes = [8, 128], strides = [1, 1]} : vector<8x256xf32> to vector<8x128xf32>
    %264 = vector.extract_strided_slice %249 {offsets = [0, 256], sizes = [8, 128], strides = [1, 1]} : vector<8x384xf32> to vector<8x128xf32>
    %265 = vector.extract_strided_slice %242 {offsets = [0, 256], sizes = [8, 128], strides = [1, 1]} : vector<8x384xf32> to vector<8x128xf32>
    %266 = arith.mulf %262, %265 : vector<8x128xf32>
    %267 = arith.addf %264, %266 : vector<8x128xf32>
    %268 = math.tanh %267 : vector<8x128xf32>
    %cst_74 = arith.constant 1.000000e+00 : f32
    %269 = vector.broadcast %cst_74 : f32 to vector<8x128xf32>
    %270 = arith.subf %269, %263 : vector<8x128xf32>
    %271 = arith.mulf %270, %268 : vector<8x128xf32>
    %272 = arith.mulf %263, %237 : vector<8x128xf32>
    %273 = arith.addf %271, %272 : vector<8x128xf32>
    %274 = vector.extract_strided_slice %253 {offsets = [0, 0], sizes = [8, 256], strides = [1, 1]} : vector<8x384xf32> to vector<8x256xf32>
    %275 = vector.extract_strided_slice %245 {offsets = [0, 0], sizes = [8, 256], strides = [1, 1]} : vector<8x384xf32> to vector<8x256xf32>
    %276 = arith.addf %274, %275 : vector<8x256xf32>
    %277 = arith.negf %276 : vector<8x256xf32>
    %278 = math.exp %277 : vector<8x256xf32>
    %cst_75 = arith.constant 1.000000e+00 : f32
    %279 = vector.broadcast %cst_75 : f32 to vector<8x256xf32>
    %280 = arith.addf %279, %278 : vector<8x256xf32>
    %281 = arith.divf %279, %280 : vector<8x256xf32>
    %282 = vector.extract_strided_slice %281 {offsets = [0, 0], sizes = [8, 128], strides = [1, 1]} : vector<8x256xf32> to vector<8x128xf32>
    %283 = vector.extract_strided_slice %281 {offsets = [0, 128], sizes = [8, 128], strides = [1, 1]} : vector<8x256xf32> to vector<8x128xf32>
    %284 = vector.extract_strided_slice %253 {offsets = [0, 256], sizes = [8, 128], strides = [1, 1]} : vector<8x384xf32> to vector<8x128xf32>
    %285 = vector.extract_strided_slice %245 {offsets = [0, 256], sizes = [8, 128], strides = [1, 1]} : vector<8x384xf32> to vector<8x128xf32>
    %286 = arith.mulf %282, %285 : vector<8x128xf32>
    %287 = arith.addf %284, %286 : vector<8x128xf32>
    %288 = math.tanh %287 : vector<8x128xf32>
    %cst_76 = arith.constant 1.000000e+00 : f32
    %289 = vector.broadcast %cst_76 : f32 to vector<8x128xf32>
    %290 = arith.subf %289, %283 : vector<8x128xf32>
    %291 = arith.mulf %290, %288 : vector<8x128xf32>
    %292 = arith.mulf %283, %238 : vector<8x128xf32>
    %293 = arith.addf %291, %292 : vector<8x128xf32>
    %294 = vector.broadcast %c3_i32 : i32 to vector<8x128xi32>
    %295 = arith.cmpi slt, %294, %18 : vector<8x128xi32>
    %296 = vector.broadcast %239 : i32 to vector<8x128xi32>
    %297 = arith.cmpi slt, %296, %18 : vector<8x128xi32>
    %cst_77 = arith.constant 0.000000e+00 : f32
    %298 = vector.broadcast %cst_77 : f32 to vector<8x128xf32>
    %299 = arith.select %295, %273, %298 : vector<8x128xi1>, vector<8x128xf32>
    %300 = arith.index_cast %c3_i32 : i32 to index
    %c0_78 = arith.constant 0 : index
    %c0_79 = arith.constant 0 : index
    %301 = vector.load %arg8[%300, %c0_78, %c0_79] : memref<8x8x256xf32, #tpu.memory_space<vmem>>, vector<1x8x128xf32>
    %302 = vector.shape_cast %301 : vector<1x8x128xf32> to vector<8x128xf32>
    %303 = vector.shape_cast %299 : vector<8x128xf32> to vector<1x8x128xf32>
    tpu.vector_store %arg8[%300, %c0_78, %c0_79], %303 {strides = array<i32>} : memref<8x8x256xf32, #tpu.memory_space<vmem>>, vector<1x8x128xf32>,
    %cst_80 = arith.constant 0.000000e+00 : f32
    %304 = vector.broadcast %cst_80 : f32 to vector<8x128xf32>
    %305 = arith.select %297, %293, %304 : vector<8x128xi1>, vector<8x128xf32>
    %306 = arith.index_cast %239 : i32 to index
    %c0_81 = arith.constant 0 : index
    %c128_82 = arith.constant 128 : index
    %307 = vector.load %arg8[%306, %c0_81, %c128_82] : memref<8x8x256xf32, #tpu.memory_space<vmem>>, vector<1x8x128xf32>
    %308 = vector.shape_cast %307 : vector<1x8x128xf32> to vector<8x128xf32>
    %309 = vector.shape_cast %305 : vector<8x128xf32> to vector<1x8x128xf32>
    tpu.vector_store %arg8[%306, %c0_81, %c128_82], %309 {strides = array<i32>} : memref<8x8x256xf32, #tpu.memory_space<vmem>>, vector<1x8x128xf32>,
    %310 = arith.select %295, %273, %237 : vector<8x128xi1>, vector<8x128xf32>
    %311 = arith.select %297, %293, %238 : vector<8x128xi1>, vector<8x128xf32>
    %c4_i32 = arith.constant 4 : i32
    %c7_i32_83 = arith.constant 7 : i32
    %312 = arith.subi %c7_i32_83, %c4_i32 : i32
    %313 = arith.truncf %310 : vector<8x128xf32> to vector<8x128xbf16>
    %cst_84 = arith.constant dense<0.000000e+00> : vector<8x384xf32>
    %314 = tpu.matmul %313, %8, %cst_84 {dimension_numbers = #tpu.dot_dimension_numbers<[1], [0], [0], [1], [0, 0, 1, 1], [], []>} : vector<8x128xbf16>, vector<128x384xbf16>, vector<8x384xf32> -> vector<8x384xf32>
    %315 = arith.addf %314, %12 : vector<8x384xf32>
    %316 = arith.truncf %311 : vector<8x128xf32> to vector<8x128xbf16>
    %cst_85 = arith.constant dense<0.000000e+00> : vector<8x384xf32>
    %317 = tpu.matmul %316, %9, %cst_85 {dimension_numbers = #tpu.dot_dimension_numbers<[1], [0], [0], [1], [0, 0, 1, 1], [], []>} : vector<8x128xbf16>, vector<128x384xbf16>, vector<8x384xf32> -> vector<8x384xf32>
    %318 = arith.addf %317, %15 : vector<8x384xf32>
    %c8_i32_86 = arith.constant 8 : i32
    %319 = arith.muli %c4_i32, %c8_i32_86 : i32
    %320 = tpu.assume_multiple %319, 8 : i32
    %321 = arith.index_cast %320 : i32 to index
    %c0_87 = arith.constant 0 : index
    %322 = vector.load %arg10[%321, %c0_87] : memref<64x768xf32, #tpu.memory_space<vmem>>, vector<8x384xf32>
    %c8_i32_88 = arith.constant 8 : i32
    %323 = arith.muli %312, %c8_i32_88 : i32
    %324 = tpu.assume_multiple %323, 8 : i32
    %325 = arith.index_cast %324 : i32 to index
    %c384_89 = arith.constant 384 : index
    %326 = vector.load %arg10[%325, %c384_89] : memref<64x768xf32, #tpu.memory_space<vmem>>, vector<8x384xf32>
    %327 = vector.extract_strided_slice %322 {offsets = [0, 0], sizes = [8, 256], strides = [1, 1]} : vector<8x384xf32> to vector<8x256xf32>
    %328 = vector.extract_strided_slice %315 {offsets = [0, 0], sizes = [8, 256], strides = [1, 1]} : vector<8x384xf32> to vector<8x256xf32>
    %329 = arith.addf %327, %328 : vector<8x256xf32>
    %330 = arith.negf %329 : vector<8x256xf32>
    %331 = math.exp %330 : vector<8x256xf32>
    %cst_90 = arith.constant 1.000000e+00 : f32
    %332 = vector.broadcast %cst_90 : f32 to vector<8x256xf32>
    %333 = arith.addf %332, %331 : vector<8x256xf32>
    %334 = arith.divf %332, %333 : vector<8x256xf32>
    %335 = vector.extract_strided_slice %334 {offsets = [0, 0], sizes = [8, 128], strides = [1, 1]} : vector<8x256xf32> to vector<8x128xf32>
    %336 = vector.extract_strided_slice %334 {offsets = [0, 128], sizes = [8, 128], strides = [1, 1]} : vector<8x256xf32> to vector<8x128xf32>
    %337 = vector.extract_strided_slice %322 {offsets = [0, 256], sizes = [8, 128], strides = [1, 1]} : vector<8x384xf32> to vector<8x128xf32>
    %338 = vector.extract_strided_slice %315 {offsets = [0, 256], sizes = [8, 128], strides = [1, 1]} : vector<8x384xf32> to vector<8x128xf32>
    %339 = arith.mulf %335, %338 : vector<8x128xf32>
    %340 = arith.addf %337, %339 : vector<8x128xf32>
    %341 = math.tanh %340 : vector<8x128xf32>
    %cst_91 = arith.constant 1.000000e+00 : f32
    %342 = vector.broadcast %cst_91 : f32 to vector<8x128xf32>
    %343 = arith.subf %342, %336 : vector<8x128xf32>
    %344 = arith.mulf %343, %341 : vector<8x128xf32>
    %345 = arith.mulf %336, %310 : vector<8x128xf32>
    %346 = arith.addf %344, %345 : vector<8x128xf32>
    %347 = vector.extract_strided_slice %326 {offsets = [0, 0], sizes = [8, 256], strides = [1, 1]} : vector<8x384xf32> to vector<8x256xf32>
    %348 = vector.extract_strided_slice %318 {offsets = [0, 0], sizes = [8, 256], strides = [1, 1]} : vector<8x384xf32> to vector<8x256xf32>
    %349 = arith.addf %347, %348 : vector<8x256xf32>
    %350 = arith.negf %349 : vector<8x256xf32>
    %351 = math.exp %350 : vector<8x256xf32>
    %cst_92 = arith.constant 1.000000e+00 : f32
    %352 = vector.broadcast %cst_92 : f32 to vector<8x256xf32>
    %353 = arith.addf %352, %351 : vector<8x256xf32>
    %354 = arith.divf %352, %353 : vector<8x256xf32>
    %355 = vector.extract_strided_slice %354 {offsets = [0, 0], sizes = [8, 128], strides = [1, 1]} : vector<8x256xf32> to vector<8x128xf32>
    %356 = vector.extract_strided_slice %354 {offsets = [0, 128], sizes = [8, 128], strides = [1, 1]} : vector<8x256xf32> to vector<8x128xf32>
    %357 = vector.extract_strided_slice %326 {offsets = [0, 256], sizes = [8, 128], strides = [1, 1]} : vector<8x384xf32> to vector<8x128xf32>
    %358 = vector.extract_strided_slice %318 {offsets = [0, 256], sizes = [8, 128], strides = [1, 1]} : vector<8x384xf32> to vector<8x128xf32>
    %359 = arith.mulf %355, %358 : vector<8x128xf32>
    %360 = arith.addf %357, %359 : vector<8x128xf32>
    %361 = math.tanh %360 : vector<8x128xf32>
    %cst_93 = arith.constant 1.000000e+00 : f32
    %362 = vector.broadcast %cst_93 : f32 to vector<8x128xf32>
    %363 = arith.subf %362, %356 : vector<8x128xf32>
    %364 = arith.mulf %363, %361 : vector<8x128xf32>
    %365 = arith.mulf %356, %311 : vector<8x128xf32>
    %366 = arith.addf %364, %365 : vector<8x128xf32>
    %367 = vector.broadcast %c4_i32 : i32 to vector<8x128xi32>
    %368 = arith.cmpi slt, %367, %18 : vector<8x128xi32>
    %369 = vector.broadcast %312 : i32 to vector<8x128xi32>
    %370 = arith.cmpi slt, %369, %18 : vector<8x128xi32>
    %cst_94 = arith.constant 0.000000e+00 : f32
    %371 = vector.broadcast %cst_94 : f32 to vector<8x128xf32>
    %372 = arith.select %368, %346, %371 : vector<8x128xi1>, vector<8x128xf32>
    %373 = arith.index_cast %c4_i32 : i32 to index
    %c0_95 = arith.constant 0 : index
    %c0_96 = arith.constant 0 : index
    %374 = vector.load %arg8[%373, %c0_95, %c0_96] : memref<8x8x256xf32, #tpu.memory_space<vmem>>, vector<1x8x128xf32>
    %375 = vector.shape_cast %374 : vector<1x8x128xf32> to vector<8x128xf32>
    %376 = vector.shape_cast %372 : vector<8x128xf32> to vector<1x8x128xf32>
    tpu.vector_store %arg8[%373, %c0_95, %c0_96], %376 {strides = array<i32>} : memref<8x8x256xf32, #tpu.memory_space<vmem>>, vector<1x8x128xf32>,
    %cst_97 = arith.constant 0.000000e+00 : f32
    %377 = vector.broadcast %cst_97 : f32 to vector<8x128xf32>
    %378 = arith.select %370, %366, %377 : vector<8x128xi1>, vector<8x128xf32>
    %379 = arith.index_cast %312 : i32 to index
    %c0_98 = arith.constant 0 : index
    %c128_99 = arith.constant 128 : index
    %380 = vector.load %arg8[%379, %c0_98, %c128_99] : memref<8x8x256xf32, #tpu.memory_space<vmem>>, vector<1x8x128xf32>
    %381 = vector.shape_cast %380 : vector<1x8x128xf32> to vector<8x128xf32>
    %382 = vector.shape_cast %378 : vector<8x128xf32> to vector<1x8x128xf32>
    tpu.vector_store %arg8[%379, %c0_98, %c128_99], %382 {strides = array<i32>} : memref<8x8x256xf32, #tpu.memory_space<vmem>>, vector<1x8x128xf32>,
    %383 = arith.select %368, %346, %310 : vector<8x128xi1>, vector<8x128xf32>
    %384 = arith.select %370, %366, %311 : vector<8x128xi1>, vector<8x128xf32>
    %c5_i32 = arith.constant 5 : i32
    %c7_i32_100 = arith.constant 7 : i32
    %385 = arith.subi %c7_i32_100, %c5_i32 : i32
    %386 = arith.truncf %383 : vector<8x128xf32> to vector<8x128xbf16>
    %cst_101 = arith.constant dense<0.000000e+00> : vector<8x384xf32>
    %387 = tpu.matmul %386, %8, %cst_101 {dimension_numbers = #tpu.dot_dimension_numbers<[1], [0], [0], [1], [0, 0, 1, 1], [], []>} : vector<8x128xbf16>, vector<128x384xbf16>, vector<8x384xf32> -> vector<8x384xf32>
    %388 = arith.addf %387, %12 : vector<8x384xf32>
    %389 = arith.truncf %384 : vector<8x128xf32> to vector<8x128xbf16>
    %cst_102 = arith.constant dense<0.000000e+00> : vector<8x384xf32>
    %390 = tpu.matmul %389, %9, %cst_102 {dimension_numbers = #tpu.dot_dimension_numbers<[1], [0], [0], [1], [0, 0, 1, 1], [], []>} : vector<8x128xbf16>, vector<128x384xbf16>, vector<8x384xf32> -> vector<8x384xf32>
    %391 = arith.addf %390, %15 : vector<8x384xf32>
    %c8_i32_103 = arith.constant 8 : i32
    %392 = arith.muli %c5_i32, %c8_i32_103 : i32
    %393 = tpu.assume_multiple %392, 8 : i32
    %394 = arith.index_cast %393 : i32 to index
    %c0_104 = arith.constant 0 : index
    %395 = vector.load %arg10[%394, %c0_104] : memref<64x768xf32, #tpu.memory_space<vmem>>, vector<8x384xf32>
    %c8_i32_105 = arith.constant 8 : i32
    %396 = arith.muli %385, %c8_i32_105 : i32
    %397 = tpu.assume_multiple %396, 8 : i32
    %398 = arith.index_cast %397 : i32 to index
    %c384_106 = arith.constant 384 : index
    %399 = vector.load %arg10[%398, %c384_106] : memref<64x768xf32, #tpu.memory_space<vmem>>, vector<8x384xf32>
    %400 = vector.extract_strided_slice %395 {offsets = [0, 0], sizes = [8, 256], strides = [1, 1]} : vector<8x384xf32> to vector<8x256xf32>
    %401 = vector.extract_strided_slice %388 {offsets = [0, 0], sizes = [8, 256], strides = [1, 1]} : vector<8x384xf32> to vector<8x256xf32>
    %402 = arith.addf %400, %401 : vector<8x256xf32>
    %403 = arith.negf %402 : vector<8x256xf32>
    %404 = math.exp %403 : vector<8x256xf32>
    %cst_107 = arith.constant 1.000000e+00 : f32
    %405 = vector.broadcast %cst_107 : f32 to vector<8x256xf32>
    %406 = arith.addf %405, %404 : vector<8x256xf32>
    %407 = arith.divf %405, %406 : vector<8x256xf32>
    %408 = vector.extract_strided_slice %407 {offsets = [0, 0], sizes = [8, 128], strides = [1, 1]} : vector<8x256xf32> to vector<8x128xf32>
    %409 = vector.extract_strided_slice %407 {offsets = [0, 128], sizes = [8, 128], strides = [1, 1]} : vector<8x256xf32> to vector<8x128xf32>
    %410 = vector.extract_strided_slice %395 {offsets = [0, 256], sizes = [8, 128], strides = [1, 1]} : vector<8x384xf32> to vector<8x128xf32>
    %411 = vector.extract_strided_slice %388 {offsets = [0, 256], sizes = [8, 128], strides = [1, 1]} : vector<8x384xf32> to vector<8x128xf32>
    %412 = arith.mulf %408, %411 : vector<8x128xf32>
    %413 = arith.addf %410, %412 : vector<8x128xf32>
    %414 = math.tanh %413 : vector<8x128xf32>
    %cst_108 = arith.constant 1.000000e+00 : f32
    %415 = vector.broadcast %cst_108 : f32 to vector<8x128xf32>
    %416 = arith.subf %415, %409 : vector<8x128xf32>
    %417 = arith.mulf %416, %414 : vector<8x128xf32>
    %418 = arith.mulf %409, %383 : vector<8x128xf32>
    %419 = arith.addf %417, %418 : vector<8x128xf32>
    %420 = vector.extract_strided_slice %399 {offsets = [0, 0], sizes = [8, 256], strides = [1, 1]} : vector<8x384xf32> to vector<8x256xf32>
    %421 = vector.extract_strided_slice %391 {offsets = [0, 0], sizes = [8, 256], strides = [1, 1]} : vector<8x384xf32> to vector<8x256xf32>
    %422 = arith.addf %420, %421 : vector<8x256xf32>
    %423 = arith.negf %422 : vector<8x256xf32>
    %424 = math.exp %423 : vector<8x256xf32>
    %cst_109 = arith.constant 1.000000e+00 : f32
    %425 = vector.broadcast %cst_109 : f32 to vector<8x256xf32>
    %426 = arith.addf %425, %424 : vector<8x256xf32>
    %427 = arith.divf %425, %426 : vector<8x256xf32>
    %428 = vector.extract_strided_slice %427 {offsets = [0, 0], sizes = [8, 128], strides = [1, 1]} : vector<8x256xf32> to vector<8x128xf32>
    %429 = vector.extract_strided_slice %427 {offsets = [0, 128], sizes = [8, 128], strides = [1, 1]} : vector<8x256xf32> to vector<8x128xf32>
    %430 = vector.extract_strided_slice %399 {offsets = [0, 256], sizes = [8, 128], strides = [1, 1]} : vector<8x384xf32> to vector<8x128xf32>
    %431 = vector.extract_strided_slice %391 {offsets = [0, 256], sizes = [8, 128], strides = [1, 1]} : vector<8x384xf32> to vector<8x128xf32>
    %432 = arith.mulf %428, %431 : vector<8x128xf32>
    %433 = arith.addf %430, %432 : vector<8x128xf32>
    %434 = math.tanh %433 : vector<8x128xf32>
    %cst_110 = arith.constant 1.000000e+00 : f32
    %435 = vector.broadcast %cst_110 : f32 to vector<8x128xf32>
    %436 = arith.subf %435, %429 : vector<8x128xf32>
    %437 = arith.mulf %436, %434 : vector<8x128xf32>
    %438 = arith.mulf %429, %384 : vector<8x128xf32>
    %439 = arith.addf %437, %438 : vector<8x128xf32>
    %440 = vector.broadcast %c5_i32 : i32 to vector<8x128xi32>
    %441 = arith.cmpi slt, %440, %18 : vector<8x128xi32>
    %442 = vector.broadcast %385 : i32 to vector<8x128xi32>
    %443 = arith.cmpi slt, %442, %18 : vector<8x128xi32>
    %cst_111 = arith.constant 0.000000e+00 : f32
    %444 = vector.broadcast %cst_111 : f32 to vector<8x128xf32>
    %445 = arith.select %441, %419, %444 : vector<8x128xi1>, vector<8x128xf32>
    %446 = arith.index_cast %c5_i32 : i32 to index
    %c0_112 = arith.constant 0 : index
    %c0_113 = arith.constant 0 : index
    %447 = vector.load %arg8[%446, %c0_112, %c0_113] : memref<8x8x256xf32, #tpu.memory_space<vmem>>, vector<1x8x128xf32>
    %448 = vector.shape_cast %447 : vector<1x8x128xf32> to vector<8x128xf32>
    %449 = vector.shape_cast %445 : vector<8x128xf32> to vector<1x8x128xf32>
    tpu.vector_store %arg8[%446, %c0_112, %c0_113], %449 {strides = array<i32>} : memref<8x8x256xf32, #tpu.memory_space<vmem>>, vector<1x8x128xf32>,
    %cst_114 = arith.constant 0.000000e+00 : f32
    %450 = vector.broadcast %cst_114 : f32 to vector<8x128xf32>
    %451 = arith.select %443, %439, %450 : vector<8x128xi1>, vector<8x128xf32>
    %452 = arith.index_cast %385 : i32 to index
    %c0_115 = arith.constant 0 : index
    %c128_116 = arith.constant 128 : index
    %453 = vector.load %arg8[%452, %c0_115, %c128_116] : memref<8x8x256xf32, #tpu.memory_space<vmem>>, vector<1x8x128xf32>
    %454 = vector.shape_cast %453 : vector<1x8x128xf32> to vector<8x128xf32>
    %455 = vector.shape_cast %451 : vector<8x128xf32> to vector<1x8x128xf32>
    tpu.vector_store %arg8[%452, %c0_115, %c128_116], %455 {strides = array<i32>} : memref<8x8x256xf32, #tpu.memory_space<vmem>>, vector<1x8x128xf32>,
    %456 = arith.select %441, %419, %383 : vector<8x128xi1>, vector<8x128xf32>
    %457 = arith.select %443, %439, %384 : vector<8x128xi1>, vector<8x128xf32>
    %c6_i32 = arith.constant 6 : i32
    %c7_i32_117 = arith.constant 7 : i32
    %458 = arith.subi %c7_i32_117, %c6_i32 : i32
    %459 = arith.truncf %456 : vector<8x128xf32> to vector<8x128xbf16>
    %cst_118 = arith.constant dense<0.000000e+00> : vector<8x384xf32>
    %460 = tpu.matmul %459, %8, %cst_118 {dimension_numbers = #tpu.dot_dimension_numbers<[1], [0], [0], [1], [0, 0, 1, 1], [], []>} : vector<8x128xbf16>, vector<128x384xbf16>, vector<8x384xf32> -> vector<8x384xf32>
    %461 = arith.addf %460, %12 : vector<8x384xf32>
    %462 = arith.truncf %457 : vector<8x128xf32> to vector<8x128xbf16>
    %cst_119 = arith.constant dense<0.000000e+00> : vector<8x384xf32>
    %463 = tpu.matmul %462, %9, %cst_119 {dimension_numbers = #tpu.dot_dimension_numbers<[1], [0], [0], [1], [0, 0, 1, 1], [], []>} : vector<8x128xbf16>, vector<128x384xbf16>, vector<8x384xf32> -> vector<8x384xf32>
    %464 = arith.addf %463, %15 : vector<8x384xf32>
    %c8_i32_120 = arith.constant 8 : i32
    %465 = arith.muli %c6_i32, %c8_i32_120 : i32
    %466 = tpu.assume_multiple %465, 8 : i32
    %467 = arith.index_cast %466 : i32 to index
    %c0_121 = arith.constant 0 : index
    %468 = vector.load %arg10[%467, %c0_121] : memref<64x768xf32, #tpu.memory_space<vmem>>, vector<8x384xf32>
    %c8_i32_122 = arith.constant 8 : i32
    %469 = arith.muli %458, %c8_i32_122 : i32
    %470 = tpu.assume_multiple %469, 8 : i32
    %471 = arith.index_cast %470 : i32 to index
    %c384_123 = arith.constant 384 : index
    %472 = vector.load %arg10[%471, %c384_123] : memref<64x768xf32, #tpu.memory_space<vmem>>, vector<8x384xf32>
    %473 = vector.extract_strided_slice %468 {offsets = [0, 0], sizes = [8, 256], strides = [1, 1]} : vector<8x384xf32> to vector<8x256xf32>
    %474 = vector.extract_strided_slice %461 {offsets = [0, 0], sizes = [8, 256], strides = [1, 1]} : vector<8x384xf32> to vector<8x256xf32>
    %475 = arith.addf %473, %474 : vector<8x256xf32>
    %476 = arith.negf %475 : vector<8x256xf32>
    %477 = math.exp %476 : vector<8x256xf32>
    %cst_124 = arith.constant 1.000000e+00 : f32
    %478 = vector.broadcast %cst_124 : f32 to vector<8x256xf32>
    %479 = arith.addf %478, %477 : vector<8x256xf32>
    %480 = arith.divf %478, %479 : vector<8x256xf32>
    %481 = vector.extract_strided_slice %480 {offsets = [0, 0], sizes = [8, 128], strides = [1, 1]} : vector<8x256xf32> to vector<8x128xf32>
    %482 = vector.extract_strided_slice %480 {offsets = [0, 128], sizes = [8, 128], strides = [1, 1]} : vector<8x256xf32> to vector<8x128xf32>
    %483 = vector.extract_strided_slice %468 {offsets = [0, 256], sizes = [8, 128], strides = [1, 1]} : vector<8x384xf32> to vector<8x128xf32>
    %484 = vector.extract_strided_slice %461 {offsets = [0, 256], sizes = [8, 128], strides = [1, 1]} : vector<8x384xf32> to vector<8x128xf32>
    %485 = arith.mulf %481, %484 : vector<8x128xf32>
    %486 = arith.addf %483, %485 : vector<8x128xf32>
    %487 = math.tanh %486 : vector<8x128xf32>
    %cst_125 = arith.constant 1.000000e+00 : f32
    %488 = vector.broadcast %cst_125 : f32 to vector<8x128xf32>
    %489 = arith.subf %488, %482 : vector<8x128xf32>
    %490 = arith.mulf %489, %487 : vector<8x128xf32>
    %491 = arith.mulf %482, %456 : vector<8x128xf32>
    %492 = arith.addf %490, %491 : vector<8x128xf32>
    %493 = vector.extract_strided_slice %472 {offsets = [0, 0], sizes = [8, 256], strides = [1, 1]} : vector<8x384xf32> to vector<8x256xf32>
    %494 = vector.extract_strided_slice %464 {offsets = [0, 0], sizes = [8, 256], strides = [1, 1]} : vector<8x384xf32> to vector<8x256xf32>
    %495 = arith.addf %493, %494 : vector<8x256xf32>
    %496 = arith.negf %495 : vector<8x256xf32>
    %497 = math.exp %496 : vector<8x256xf32>
    %cst_126 = arith.constant 1.000000e+00 : f32
    %498 = vector.broadcast %cst_126 : f32 to vector<8x256xf32>
    %499 = arith.addf %498, %497 : vector<8x256xf32>
    %500 = arith.divf %498, %499 : vector<8x256xf32>
    %501 = vector.extract_strided_slice %500 {offsets = [0, 0], sizes = [8, 128], strides = [1, 1]} : vector<8x256xf32> to vector<8x128xf32>
    %502 = vector.extract_strided_slice %500 {offsets = [0, 128], sizes = [8, 128], strides = [1, 1]} : vector<8x256xf32> to vector<8x128xf32>
    %503 = vector.extract_strided_slice %472 {offsets = [0, 256], sizes = [8, 128], strides = [1, 1]} : vector<8x384xf32> to vector<8x128xf32>
    %504 = vector.extract_strided_slice %464 {offsets = [0, 256], sizes = [8, 128], strides = [1, 1]} : vector<8x384xf32> to vector<8x128xf32>
    %505 = arith.mulf %501, %504 : vector<8x128xf32>
    %506 = arith.addf %503, %505 : vector<8x128xf32>
    %507 = math.tanh %506 : vector<8x128xf32>
    %cst_127 = arith.constant 1.000000e+00 : f32
    %508 = vector.broadcast %cst_127 : f32 to vector<8x128xf32>
    %509 = arith.subf %508, %502 : vector<8x128xf32>
    %510 = arith.mulf %509, %507 : vector<8x128xf32>
    %511 = arith.mulf %502, %457 : vector<8x128xf32>
    %512 = arith.addf %510, %511 : vector<8x128xf32>
    %513 = vector.broadcast %c6_i32 : i32 to vector<8x128xi32>
    %514 = arith.cmpi slt, %513, %18 : vector<8x128xi32>
    %515 = vector.broadcast %458 : i32 to vector<8x128xi32>
    %516 = arith.cmpi slt, %515, %18 : vector<8x128xi32>
    %cst_128 = arith.constant 0.000000e+00 : f32
    %517 = vector.broadcast %cst_128 : f32 to vector<8x128xf32>
    %518 = arith.select %514, %492, %517 : vector<8x128xi1>, vector<8x128xf32>
    %519 = arith.index_cast %c6_i32 : i32 to index
    %c0_129 = arith.constant 0 : index
    %c0_130 = arith.constant 0 : index
    %520 = vector.load %arg8[%519, %c0_129, %c0_130] : memref<8x8x256xf32, #tpu.memory_space<vmem>>, vector<1x8x128xf32>
    %521 = vector.shape_cast %520 : vector<1x8x128xf32> to vector<8x128xf32>
    %522 = vector.shape_cast %518 : vector<8x128xf32> to vector<1x8x128xf32>
    tpu.vector_store %arg8[%519, %c0_129, %c0_130], %522 {strides = array<i32>} : memref<8x8x256xf32, #tpu.memory_space<vmem>>, vector<1x8x128xf32>,
    %cst_131 = arith.constant 0.000000e+00 : f32
    %523 = vector.broadcast %cst_131 : f32 to vector<8x128xf32>
    %524 = arith.select %516, %512, %523 : vector<8x128xi1>, vector<8x128xf32>
    %525 = arith.index_cast %458 : i32 to index
    %c0_132 = arith.constant 0 : index
    %c128_133 = arith.constant 128 : index
    %526 = vector.load %arg8[%525, %c0_132, %c128_133] : memref<8x8x256xf32, #tpu.memory_space<vmem>>, vector<1x8x128xf32>
    %527 = vector.shape_cast %526 : vector<1x8x128xf32> to vector<8x128xf32>
    %528 = vector.shape_cast %524 : vector<8x128xf32> to vector<1x8x128xf32>
    tpu.vector_store %arg8[%525, %c0_132, %c128_133], %528 {strides = array<i32>} : memref<8x8x256xf32, #tpu.memory_space<vmem>>, vector<1x8x128xf32>,
    %529 = arith.select %514, %492, %456 : vector<8x128xi1>, vector<8x128xf32>
    %530 = arith.select %516, %512, %457 : vector<8x128xi1>, vector<8x128xf32>
    %c7_i32_134 = arith.constant 7 : i32
    %c7_i32_135 = arith.constant 7 : i32
    %531 = arith.subi %c7_i32_135, %c7_i32_134 : i32
    %532 = arith.truncf %529 : vector<8x128xf32> to vector<8x128xbf16>
    %cst_136 = arith.constant dense<0.000000e+00> : vector<8x384xf32>
    %533 = tpu.matmul %532, %8, %cst_136 {dimension_numbers = #tpu.dot_dimension_numbers<[1], [0], [0], [1], [0, 0, 1, 1], [], []>} : vector<8x128xbf16>, vector<128x384xbf16>, vector<8x384xf32> -> vector<8x384xf32>
    %534 = arith.addf %533, %12 : vector<8x384xf32>
    %535 = arith.truncf %530 : vector<8x128xf32> to vector<8x128xbf16>
    %cst_137 = arith.constant dense<0.000000e+00> : vector<8x384xf32>
    %536 = tpu.matmul %535, %9, %cst_137 {dimension_numbers = #tpu.dot_dimension_numbers<[1], [0], [0], [1], [0, 0, 1, 1], [], []>} : vector<8x128xbf16>, vector<128x384xbf16>, vector<8x384xf32> -> vector<8x384xf32>
    %537 = arith.addf %536, %15 : vector<8x384xf32>
    %c8_i32_138 = arith.constant 8 : i32
    %538 = arith.muli %c7_i32_134, %c8_i32_138 : i32
    %539 = tpu.assume_multiple %538, 8 : i32
    %540 = arith.index_cast %539 : i32 to index
    %c0_139 = arith.constant 0 : index
    %541 = vector.load %arg10[%540, %c0_139] : memref<64x768xf32, #tpu.memory_space<vmem>>, vector<8x384xf32>
    %c8_i32_140 = arith.constant 8 : i32
    %542 = arith.muli %531, %c8_i32_140 : i32
    %543 = tpu.assume_multiple %542, 8 : i32
    %544 = arith.index_cast %543 : i32 to index
    %c384_141 = arith.constant 384 : index
    %545 = vector.load %arg10[%544, %c384_141] : memref<64x768xf32, #tpu.memory_space<vmem>>, vector<8x384xf32>
    %546 = vector.extract_strided_slice %541 {offsets = [0, 0], sizes = [8, 256], strides = [1, 1]} : vector<8x384xf32> to vector<8x256xf32>
    %547 = vector.extract_strided_slice %534 {offsets = [0, 0], sizes = [8, 256], strides = [1, 1]} : vector<8x384xf32> to vector<8x256xf32>
    %548 = arith.addf %546, %547 : vector<8x256xf32>
    %549 = arith.negf %548 : vector<8x256xf32>
    %550 = math.exp %549 : vector<8x256xf32>
    %cst_142 = arith.constant 1.000000e+00 : f32
    %551 = vector.broadcast %cst_142 : f32 to vector<8x256xf32>
    %552 = arith.addf %551, %550 : vector<8x256xf32>
    %553 = arith.divf %551, %552 : vector<8x256xf32>
    %554 = vector.extract_strided_slice %553 {offsets = [0, 0], sizes = [8, 128], strides = [1, 1]} : vector<8x256xf32> to vector<8x128xf32>
    %555 = vector.extract_strided_slice %553 {offsets = [0, 128], sizes = [8, 128], strides = [1, 1]} : vector<8x256xf32> to vector<8x128xf32>
    %556 = vector.extract_strided_slice %541 {offsets = [0, 256], sizes = [8, 128], strides = [1, 1]} : vector<8x384xf32> to vector<8x128xf32>
    %557 = vector.extract_strided_slice %534 {offsets = [0, 256], sizes = [8, 128], strides = [1, 1]} : vector<8x384xf32> to vector<8x128xf32>
    %558 = arith.mulf %554, %557 : vector<8x128xf32>
    %559 = arith.addf %556, %558 : vector<8x128xf32>
    %560 = math.tanh %559 : vector<8x128xf32>
    %cst_143 = arith.constant 1.000000e+00 : f32
    %561 = vector.broadcast %cst_143 : f32 to vector<8x128xf32>
    %562 = arith.subf %561, %555 : vector<8x128xf32>
    %563 = arith.mulf %562, %560 : vector<8x128xf32>
    %564 = arith.mulf %555, %529 : vector<8x128xf32>
    %565 = arith.addf %563, %564 : vector<8x128xf32>
    %566 = vector.extract_strided_slice %545 {offsets = [0, 0], sizes = [8, 256], strides = [1, 1]} : vector<8x384xf32> to vector<8x256xf32>
    %567 = vector.extract_strided_slice %537 {offsets = [0, 0], sizes = [8, 256], strides = [1, 1]} : vector<8x384xf32> to vector<8x256xf32>
    %568 = arith.addf %566, %567 : vector<8x256xf32>
    %569 = arith.negf %568 : vector<8x256xf32>
    %570 = math.exp %569 : vector<8x256xf32>
    %cst_144 = arith.constant 1.000000e+00 : f32
    %571 = vector.broadcast %cst_144 : f32 to vector<8x256xf32>
    %572 = arith.addf %571, %570 : vector<8x256xf32>
    %573 = arith.divf %571, %572 : vector<8x256xf32>
    %574 = vector.extract_strided_slice %573 {offsets = [0, 0], sizes = [8, 128], strides = [1, 1]} : vector<8x256xf32> to vector<8x128xf32>
    %575 = vector.extract_strided_slice %573 {offsets = [0, 128], sizes = [8, 128], strides = [1, 1]} : vector<8x256xf32> to vector<8x128xf32>
    %576 = vector.extract_strided_slice %545 {offsets = [0, 256], sizes = [8, 128], strides = [1, 1]} : vector<8x384xf32> to vector<8x128xf32>
    %577 = vector.extract_strided_slice %537 {offsets = [0, 256], sizes = [8, 128], strides = [1, 1]} : vector<8x384xf32> to vector<8x128xf32>
    %578 = arith.mulf %574, %577 : vector<8x128xf32>
    %579 = arith.addf %576, %578 : vector<8x128xf32>
    %580 = math.tanh %579 : vector<8x128xf32>
    %cst_145 = arith.constant 1.000000e+00 : f32
    %581 = vector.broadcast %cst_145 : f32 to vector<8x128xf32>
    %582 = arith.subf %581, %575 : vector<8x128xf32>
    %583 = arith.mulf %582, %580 : vector<8x128xf32>
    %584 = arith.mulf %575, %530 : vector<8x128xf32>
    %585 = arith.addf %583, %584 : vector<8x128xf32>
    %586 = vector.broadcast %c7_i32_134 : i32 to vector<8x128xi32>
    %587 = arith.cmpi slt, %586, %18 : vector<8x128xi32>
    %588 = vector.broadcast %531 : i32 to vector<8x128xi32>
    %589 = arith.cmpi slt, %588, %18 : vector<8x128xi32>
    %cst_146 = arith.constant 0.000000e+00 : f32
    %590 = vector.broadcast %cst_146 : f32 to vector<8x128xf32>
    %591 = arith.select %587, %565, %590 : vector<8x128xi1>, vector<8x128xf32>
    %592 = arith.index_cast %c7_i32_134 : i32 to index
    %c0_147 = arith.constant 0 : index
    %c0_148 = arith.constant 0 : index
    %593 = vector.load %arg8[%592, %c0_147, %c0_148] : memref<8x8x256xf32, #tpu.memory_space<vmem>>, vector<1x8x128xf32>
    %594 = vector.shape_cast %593 : vector<1x8x128xf32> to vector<8x128xf32>
    %595 = vector.shape_cast %591 : vector<8x128xf32> to vector<1x8x128xf32>
    tpu.vector_store %arg8[%592, %c0_147, %c0_148], %595 {strides = array<i32>} : memref<8x8x256xf32, #tpu.memory_space<vmem>>, vector<1x8x128xf32>,
    %cst_149 = arith.constant 0.000000e+00 : f32
    %596 = vector.broadcast %cst_149 : f32 to vector<8x128xf32>
    %597 = arith.select %589, %585, %596 : vector<8x128xi1>, vector<8x128xf32>
    %598 = arith.index_cast %531 : i32 to index
    %c0_150 = arith.constant 0 : index
    %c128_151 = arith.constant 128 : index
    %599 = vector.load %arg8[%598, %c0_150, %c128_151] : memref<8x8x256xf32, #tpu.memory_space<vmem>>, vector<1x8x128xf32>
    %600 = vector.shape_cast %599 : vector<1x8x128xf32> to vector<8x128xf32>
    %601 = vector.shape_cast %597 : vector<8x128xf32> to vector<1x8x128xf32>
    tpu.vector_store %arg8[%598, %c0_150, %c128_151], %601 {strides = array<i32>} : memref<8x8x256xf32, #tpu.memory_space<vmem>>, vector<1x8x128xf32>,
    %602 = arith.select %587, %565, %529 : vector<8x128xi1>, vector<8x128xf32>
    %603 = arith.select %589, %585, %530 : vector<8x128xi1>, vector<8x128xf32>
    %c8_i32_152 = arith.constant 8 : i32
    %c0_153 = arith.constant 0 : index
    %c0_154 = arith.constant 0 : index
    %604 = vector.load %arg9[%c0_153, %c0_154] : memref<8x256xf32, #tpu.memory_space<vmem>>, vector<8x128xf32>
    tpu.vector_store %arg9[%c0_153, %c0_154], %602 {strides = array<i32>} : memref<8x256xf32, #tpu.memory_space<vmem>>, vector<8x128xf32>,
    %c0_155 = arith.constant 0 : index
    %c128_156 = arith.constant 128 : index
    %605 = vector.load %arg9[%c0_155, %c128_156] : memref<8x256xf32, #tpu.memory_space<vmem>>, vector<8x128xf32>
    tpu.vector_store %arg9[%c0_155, %c128_156], %603 {strides = array<i32>} : memref<8x256xf32, #tpu.memory_space<vmem>>, vector<8x128xf32>,
    return
  }
  func.func @transform_0(%arg0: i32) -> (i32, i32, i32) {
    %c0_i32 = arith.constant 0 : i32
    %c0_i32_0 = arith.constant 0 : i32
    %c0_i32_1 = arith.constant 0 : i32
    return %arg0, %c0_i32, %c0_i32_0 : i32, i32, i32
  }
  func.func @transform_1(%arg0: i32) -> (i32, i32) {
    %c0_i32 = arith.constant 0 : i32
    %c0_i32_0 = arith.constant 0 : i32
    return %arg0, %c0_i32 : i32, i32
  }
  func.func @transform_2(%arg0: i32) -> (i32, i32) {
    %c0_i32 = arith.constant 0 : i32
    %c0_i32_0 = arith.constant 0 : i32
    %c0_i32_1 = arith.constant 0 : i32
    return %c0_i32, %c0_i32_0 : i32, i32
  }
  func.func @transform_3(%arg0: i32) -> (i32, i32) {
    %c0_i32 = arith.constant 0 : i32
    %c0_i32_0 = arith.constant 0 : i32
    %c0_i32_1 = arith.constant 0 : i32
    return %c0_i32, %c0_i32_0 : i32, i32
  }
  func.func @transform_4(%arg0: i32) -> (i32, i32) {
    %c0_i32 = arith.constant 0 : i32
    %c0_i32_0 = arith.constant 0 : i32
    %c0_i32_1 = arith.constant 0 : i32
    return %c0_i32, %c0_i32_0 : i32, i32
  }
  func.func @transform_5(%arg0: i32) -> (i32, i32) {
    %c0_i32 = arith.constant 0 : i32
    %c0_i32_0 = arith.constant 0 : i32
    %c0_i32_1 = arith.constant 0 : i32
    return %c0_i32, %c0_i32_0 : i32, i32
  }
  func.func @transform_6(%arg0: i32) -> (i32, i32) {
    %c0_i32 = arith.constant 0 : i32
    %c0_i32_0 = arith.constant 0 : i32
    %c0_i32_1 = arith.constant 0 : i32
    return %c0_i32, %c0_i32_0 : i32, i32
  }
  func.func @transform_7(%arg0: i32) -> (i32, i32, i32) {
    %c0_i32 = arith.constant 0 : i32
    %c0_i32_0 = arith.constant 0 : i32
    %c0_i32_1 = arith.constant 0 : i32
    return %c0_i32, %arg0, %c0_i32_0 : i32, i32, i32
  }
  func.func @transform_8(%arg0: i32) -> (i32, i32) {
    %c0_i32 = arith.constant 0 : i32
    %c0_i32_0 = arith.constant 0 : i32
    return %arg0, %c0_i32 : i32, i32
  }
}

</mosaic_0001>

<bundles_post_ra>
// kernel: _encoder_forward_jit.1
= control target key start
LH: loop header
LB: loop body
LE: loop exit
PB: predicated region body
PF: predicated region fallthrough
CT: control target
= control target key end

     0   :  { %v5320_v1 = vmov 0   ;;  %vm161_vm0 = vcmask 261120   ;;  %v5322_v19 = vmov 0.0   ;;  %vm3545_vm1 = vmmov 0   ;;  %s5311_s2 = inlined_call_operand.vmem [shape: bf16[32,768], index: 2, kind: input, shape index: {}]   ;;  %s5312_s0 = inlined_call_operand.vmem [shape: bf16[1,64,32], index: 0, kind: input, shape index: {}]   ;;  %s5313_s3 = inlined_call_operand.vmem [shape: bf16[128,384], index: 3, kind: input, shape index: {}]   ;;  %s5314_s4 = inlined_call_operand.vmem [shape: bf16[128,384], index: 4, kind: input, shape index: {}]   ;;  %s5315_s1 = inlined_call_operand.vmem [shape: s32[8,1], index: 1, kind: input, shape index: {}]   ;;  %s5316_s5 = inlined_call_operand.vmem [shape: f32[1,768], index: 5, kind: input, shape index: {}]   ;;  %s5317_s6 = inlined_call_operand.vmem [shape: f32[1,768], index: 6, kind: input, shape index: {}]   ;;  %s5318_s7 = inlined_call_operand.vmem [shape: f32[8,8,256], index: 7, kind: output, shape index: {0}]   ;;  %s5319_s8 = inlined_call_operand.vmem [shape: f32[8,256], index: 8, kind: output, shape index: {1}]  }
   0x1   :  { %v3201_v0 = vld [vmem:[%s5311_s2 + $0x4] ss:$24 sps:$4 sm:$0xff]   ;;  %226 = vmatprep.mubr.bf16.mxu1 %v5320_v1  ;;  %206 = vmatprep.mubr.bf16.mxu0 %v5320_v1  ;;  %v3203_v2 = vld [vmem:[%s5311_s2] ss:$24 sps:$4 sm:$0xff]   ;;  %v3204_v3 = vld [vmem:[%s5311_s2 + $0x34] ss:$24 sps:$4 sm:$0xff]  }
   0x2   :  { %3200 = vset.pattern.permute.xlu0 %v5320_v1  ;;  %3193 = vmatprep.subr.bf16.mxu1 %v3201_v0  ;;  %v3206_v4 = vld [vmem:[%s5311_s2 + $0x30] ss:$24 sps:$4 sm:$0xff]   ;;  %v3210_v5 = vld [vmem:[%s5311_s2 + $0xc] ss:$24 sps:$4 sm:$0xff]   ;;  %v3214_v8 = vld [vmem:[%s5311_s2 + $0x3c] ss:$24 sps:$4 sm:$0xff]  }
   0x3   :  { %174 = vmatprep.subr.bf16.mxu0 %v3201_v0  ;;  %3195 = vmatpush1.bf16.msra.mxu1 %v3203_v2  ;;  %v3612_v6 = vld [vmem:[%s5312_s0 + $0x10] sm:$0xff]   ;;  %v3208_v7 = vld [vmem:[%s5311_s2 + $0x8] ss:$24 sps:$4 sm:$0xff]   ;;  %v3639_v12 = vld [vmem:[%s5312_s0 + $0x18] sm:$0xff]  }
   0x4   :  { %175 = vmatpush1.bf16.msra.mxu0 %v3203_v2  ;;  %3194 = vmatprep.subr.bf16.mxu1 %v3204_v3  ;;  %v3217_v9 = vld [vmem:[%s5312_s0] sm:$0xff]   ;;  %v3212_v10 = vld [vmem:[%s5311_s2 + $0x38] ss:$24 sps:$4 sm:$0xff]   ;;  %v3230_v14 = vld [vmem:[%s5311_s2 + $0x14] ss:$24 sps:$4 sm:$0xff]  }
   0x5   :  { %176 = vmatprep.subr.bf16.mxu0 %v3204_v3  ;;  %v3632_v11 = vld [vmem:[%s5313_s3 + $0x4] ss:$12 sps:$4 sm:$0xff]   ;;  %v3224_v15 = vld [vmem:[%s5312_s0 + $0x8] sm:$0xff]   ;;  %v3237_v16 = vld [vmem:[%s5311_s2 + $0x40] ss:$24 sps:$4 sm:$0xff]  }
   0x6   :  { %v3228_v13 = vld [vmem:[%s5311_s2 + $0x10] ss:$24 sps:$4 sm:$0xff]   ;;  %v3239_v17 = vld [vmem:[%s5311_s2 + $0x44] ss:$24 sps:$4 sm:$0xff]   ;;  %v3665_v18 = vld [vmem:[%s5313_s3] ss:$12 sps:$4 sm:$0xff]  }
   0x7   :  { %3196 = vmatpush1.bf16.msra.mxu1 %v3206_v4  ;;  %v3671_v20 = vld [vmem:[%s5313_s3 + $0x1c] ss:$12 sps:$4 sm:$0xff]   ;;  %v3683_v22 = vld [vmem:[%s5313_s3 + $0x18] ss:$12 sps:$4 sm:$0xff]   ;;  %v3690_v23 = vld [vmem:[%s5313_s3 + $0x34] ss:$12 sps:$4 sm:$0xff]  }
   0x8   :  { %177 = vmatpush1.bf16.msra.mxu0 %v3206_v4  ;;  %247 = vmatprep.subr.bf16.mxu1 %v3210_v5  ;;  %v3676_v21 = vld [vmem:[%s5313_s3 + $0x8] ss:$12 sps:$4 sm:$0xff]   ;;  %v3697_v24 = vld [vmem:[%s5313_s3 + $0x20] ss:$12 sps:$4 sm:$0xff]   ;;  %v3705_v25 = vld [vmem:[%s5313_s3 + $0x30] ss:$12 sps:$4 sm:$0xff]   ;;  %v51_v4 = vlaneseq }
   0x9   :  { %320 = vmatprep.subr.bf16.mxu0 %v3230_v14  ;;  %5372 = vst [vmem:[#allocation3_spill] sm:$0xff] %v3705_v25  ;;  %v3711_v26 = vld [vmem:[%s5313_s3 + $0x4c] ss:$12 sps:$4 sm:$0xff]   ;;  %v3725_v28 = vld [vmem:[%s5313_s3 + $0x48] ss:$12 sps:$4 sm:$0xff]   ;;  %v539_v41 = vld [vmem:[%s5315_s1] sm:$0xff] }
   0xa   :  { %2613 = vmatmul.mubr.msk.bf16.vlgmr.msra.gmra.mrb[0].mxu1 %vm161_vm0, %v3612_v6  ;;  %5373 = vst [vmem:[#allocation4_spill] sm:$0xff] %v3711_v26  ;;  %v3717_v27 = vld [vmem:[%s5313_s3 + $0x38] ss:$12 sps:$4 sm:$0xff]   ;;  %5375 = vst [vmem:[#allocation6_spill] sm:$0xff] %v3725_v28  ;;  %v3739_v30 = vld [vmem:[%s5313_s3 + $0x50] ss:$12 sps:$4 sm:$0xff]   ;;  %541 = vperm.xlu0 %3200, %v539_v41  }
   0xb   :  { %248 = vmatpush1.bf16.msra.mxu1 %v3208_v7  ;;  %236 = vmatprep.mubr.bf16.mxu1 %v5320_v1  ;;  %5374 = vst [vmem:[#allocation5_spill] sm:$0xff] %v3717_v27  ;;  %v3732_v29 = vld [vmem:[%s5313_s3 + $0x64] ss:$12 sps:$4 sm:$0xff]   ;;  %5377 = vst [vmem:[#allocation8_spill] sm:$0xff] %v3739_v30  ;;  %v3747_v31 = vld [vmem:[%s5313_s3 + $0x60] ss:$12 sps:$4 sm:$0xff]  }
   0xc   :  { %249 = vmatprep.subr.bf16.mxu1 %v3214_v8  ;;  %2611 = vmatmul.mubr.msk.bf16.vlgmr.msra.gmra.mrb[0].mxu0 %vm161_vm0, %v3217_v9  ;;  %5376 = vst [vmem:[#allocation7_spill] sm:$0xff] %v3732_v29  ;;  %5378 = vst [vmem:[#allocation9_spill] sm:$0xff] %v3747_v31  ;;  %v3753_v32 = vld [vmem:[%s5313_s3 + $0x7c] ss:$12 sps:$4 sm:$0xff]   ;;  %v3768_v34 = vld [vmem:[%s5313_s3 + $0x78] ss:$12 sps:$4 sm:$0xff]  }
   0xd   :  { %216 = vmatprep.mubr.bf16.mxu0 %v5320_v1  ;;  %321 = vmatpush1.bf16.msra.mxu0 %v3228_v13  ;;  %5379 = vst [vmem:[#allocation10_spill] sm:$0xff] %v3753_v32  ;;  %v3759_v33 = vld [vmem:[%s5313_s3 + $0x68] ss:$12 sps:$4 sm:$0xff]   ;;  %5381 = vst [vmem:[#allocation12_spill] sm:$0xff] %v3768_v34  ;;  %v3783_v36 = vld [vmem:[%s5313_s3 + $0x80] ss:$12 sps:$4 sm:$0xff]  }
   0xe   :  { %322 = vmatprep.subr.bf16.mxu0 %v3239_v17  ;;  %5380 = vst [vmem:[#allocation11_spill] sm:$0xff] %v3759_v33  ;;  %v3775_v35 = vld [vmem:[%s5313_s3 + $0x94] ss:$12 sps:$4 sm:$0xff]   ;;  %5383 = vst [vmem:[#allocation14_spill] sm:$0xff] %v3783_v36  ;;  %v3791_v37 = vld [vmem:[%s5313_s3 + $0x90] ss:$12 sps:$4 sm:$0xff]  }
   0xf   :  { %250 = vmatpush1.bf16.msra.mxu1 %v3212_v10  ;;  %5382 = vst [vmem:[#allocation13_spill] sm:$0xff] %v3775_v35  ;;  %5384 = vst [vmem:[#allocation15_spill] sm:$0xff] %v3791_v37  ;;  %v3797_v38 = vld [vmem:[%s5313_s3 + $0xac] ss:$12 sps:$4 sm:$0xff]   ;;  %v3812_v40 = vld [vmem:[%s5313_s3 + $0xa8] ss:$12 sps:$4 sm:$0xff]  }
  0x10   :  { %671 = vmatprep.subr.bf16.mxu1 %v3632_v11  ;;  %5385 = vst [vmem:[#allocation16_spill] sm:$0xff] %v3797_v38  ;;  %v3803_v39 = vld [vmem:[%s5313_s3 + $0x98] ss:$12 sps:$4 sm:$0xff]   ;;  %5387 = vst [vmem:[#allocation18_spill] sm:$0xff] %v3812_v40  ;;  %v3830_v43 = vld [vmem:[%s5313_s3 + $0xb0] ss:$12 sps:$4 sm:$0xff]  }
  0x11   :  { %323 = vmatpush1.bf16.msra.mxu0 %v3237_v16  ;;  %5386 = vst [vmem:[#allocation17_spill] sm:$0xff] %v3803_v39  ;;  %v3822_v42 = vld [vmem:[%s5314_s4 + $0x4] ss:$12 sps:$4 sm:$0xff]   ;;  %5389 = vst [vmem:[#allocation20_spill] sm:$0xff] %v3830_v43  ;;  %v3839_v44 = vld [vmem:[%s5314_s4] ss:$12 sps:$4 sm:$0xff]  }
  0x12   :  { %2614 = vmatmul.mubr.msk.bf16.gmra.mrb[4].mxu1 %vm161_vm0, %v3639_v12  ;;  %2873 = vmatprep.subr.bf16.mxu0 %v5322_v19  ;;  %5388 = vst [vmem:[#allocation19_spill] sm:$0xff] %v3822_v42  ;;  %v3845_v45 = vld [vmem:[%s5314_s4 + $0x1c] ss:$12 sps:$4 sm:$0xff]   ;;  %v3859_v47 = vld [vmem:[%s5314_s4 + $0x18] ss:$12 sps:$4 sm:$0xff]   ;;  %v52_v5 = vshrl.u32 %v51_v4, 7 }
  0x13   :  { %279 = vmatprep.mubr.bf16.mxu1 %v5320_v1  ;;  %v3851_v46 = vld [vmem:[%s5314_s4 + $0x8] ss:$12 sps:$4 sm:$0xff]   ;;  %v3873_v49 = vld [vmem:[%s5314_s4 + $0x20] ss:$12 sps:$4 sm:$0xff]   ;;  %v3882_v50 = vld [vmem:[%s5314_s4 + $0x30] ss:$12 sps:$4 sm:$0xff]  }
  0x14   :  { %2612 = vmatmul.mubr.msk.bf16.gmra.mrb[4].mxu0 %vm161_vm0, %v3224_v15  ;;  %v3866_v48 = vld [vmem:[%s5314_s4 + $0x34] ss:$12 sps:$4 sm:$0xff]   ;;  %v3888_v51 = vld [vmem:[%s5314_s4 + $0x4c] ss:$12 sps:$4 sm:$0xff]   ;;  %v3907_v54 = vld [vmem:[%s5314_s4 + $0x64] ss:$12 sps:$4 sm:$0xff]  }
  0x15   :  { %352 = vmatprep.mubr.bf16.mxu0 %v5320_v1  ;;  %v3894_v52 = vld [vmem:[%s5314_s4 + $0x38] ss:$12 sps:$4 sm:$0xff]   ;;  %v3901_v53 = vld [vmem:[%s5314_s4 + $0x48] ss:$12 sps:$4 sm:$0xff]   ;;  %v3913_v55 = vld [vmem:[%s5314_s4 + $0x50] ss:$12 sps:$4 sm:$0xff]  }
  0x16   :  { %v3920_v56 = vld [vmem:[%s5314_s4 + $0x60] ss:$12 sps:$4 sm:$0xff]   ;;  %v3926_v57 = vld [vmem:[%s5314_s4 + $0x7c] ss:$12 sps:$4 sm:$0xff]   ;;  %v3939_v59 = vld [vmem:[%s5314_s4 + $0x78] ss:$12 sps:$4 sm:$0xff]  }
  0x17   :  { %v3932_v58 = vld [vmem:[%s5314_s4 + $0x68] ss:$12 sps:$4 sm:$0xff]   ;;  %v3951_v61 = vld [vmem:[%s5314_s4 + $0x80] ss:$12 sps:$4 sm:$0xff]   ;;  %v3958_v62 = vld [vmem:[%s5314_s4 + $0x90] ss:$12 sps:$4 sm:$0xff]  }
  0x18   :  { %v3945_v60 = vld [vmem:[%s5314_s4 + $0x94] ss:$12 sps:$4 sm:$0xff]   ;;  %v3964_v63 = vld [vmem:[%s5314_s4 + $0xac] ss:$12 sps:$4 sm:$0xff]   ;;  %v3984_v3 = vld [vmem:[%s5314_s4 + $0xb0] ss:$12 sps:$4 sm:$0xff]  }
  0x19   :  { %v3970_v0 = vld [vmem:[%s5314_s4 + $0x98] ss:$12 sps:$4 sm:$0xff]   ;;  %v3977_v2 = vld [vmem:[%s5314_s4 + $0xa8] ss:$12 sps:$4 sm:$0xff]   ;;  %v4033_v8 = vsub.s32 1, %v52_v5 }
  0x1a   :  { %2615 = vmatmul.mubr.msk.bf16.vlgmr.msra.gmra.mrb[8].mxu1 %vm161_vm0, %v3217_v9  ;;  %v49_v7 = vld [vmem:[%s5316_s5] sm:$0x3f] }
  0x1b   :  { %672 = vmatpush1.bf16.msra.mxu1 %v3665_v18  ;;  %289 = vmatprep.mubr.bf16.mxu1 %v5320_v1  ;;  %v4039_v10 = vrot.slane %v49_v7, %v4033_v8 }
  0x1c   :  { %673 = vmatprep.subr.bf16.mxu1 %v3671_v20  ;;  %2619 = vmatmul.mubr.msk.bf16.vlgmr.msra.gmra.mrb[8].mxu0 %vm161_vm0, %v3217_v9 }
  0x1d   :  { %2874 = vmatpush3.bf16.msra.mxu0 %v3676_v21  ;;  %362 = vmatprep.mubr.bf16.mxu0 %v5320_v1 }
  0x1e   :  { %2875 = vmatprep.subr.bf16.mxu0 %v5322_v19 }
  0x1f   :  { %674 = vmatpush1.bf16.msra.mxu1 %v3683_v22 }
  0x20   :  { %675 = vmatprep.subr.bf16.mxu1 %v3690_v23 }
  0x21   :  { %2876 = vmatpush3.bf16.msra.mxu0 %v3697_v24 }
  0x22   :  { %2616 = vmatmul.mubr.msk.bf16.gmra.mrb[12].mxu1 %vm161_vm0, %v3224_v15  ;;  %2877 = vmatprep.subr.bf16.mxu0 %v5322_v19 }
  0x23   :  { %676 = vmatpush1.bf16.msra.mxu1 %v3705_v25  ;;  %299 = vmatprep.mubr.bf16.mxu1 %v5320_v1 }
  0x24   :  { %677 = vmatprep.subr.bf16.mxu1 %v3711_v26  ;;  %2620 = vmatmul.mubr.msk.bf16.gmra.mrb[12].mxu0 %vm161_vm0, %v3224_v15 }
  0x25   :  { %2878 = vmatpush3.bf16.msra.mxu0 %v3717_v27  ;;  %372 = vmatprep.mubr.bf16.mxu0 %v5320_v1 }
  0x26   :  { %2879 = vmatprep.subr.bf16.mxu0 %v5322_v19 }
  0x27   :  { %678 = vmatpush1.bf16.msra.mxu1 %v3725_v28 }
  0x28   :  { %679 = vmatprep.subr.bf16.mxu1 %v3732_v29 }
  0x29   :  { %2880 = vmatpush3.bf16.msra.mxu0 %v3739_v30 }
  0x2a   :  { %2617 = vmatmul.mubr.msk.bf16.gmra.mrb[16].mxu1 %vm161_vm0, %v3612_v6  ;;  %2881 = vmatprep.subr.bf16.mxu0 %v5322_v19 }
  0x2b   :  { %680 = vmatpush1.bf16.msra.mxu1 %v3747_v31  ;;  %309 = vmatprep.mubr.bf16.mxu1 %v5320_v1 }
  0x2c   :  { %681 = vmatprep.subr.bf16.mxu1 %v3753_v32  ;;  %2621 = vmatmul.mubr.msk.bf16.gmra.mrb[16].mxu0 %vm161_vm0, %v3612_v6  ;;  %v4028_v6 = vsub.s32 0, %v52_v5 }
  0x2d   :  { %2882 = vmatpush3.bf16.msra.mxu0 %v3759_v33  ;;  %382 = vmatprep.mubr.bf16.mxu0 %v5320_v1 }
  0x2e   :  { %2883 = vmatprep.subr.bf16.mxu0 %v5322_v19  ;;  %v4036_v9 = vrot.slane %v49_v7, %v4028_v6 }
  0x2f   :  { %682 = vmatpush1.bf16.msra.mxu1 %v3768_v34 }
  0x30   :  { %683 = vmatprep.subr.bf16.mxu1 %v3775_v35 }
  0x31   :  { %2884 = vmatpush3.bf16.msra.mxu0 %v3783_v36 }
  0x32   :  { %2618 = vmatmul.mubr.msk.bf16.gmra.mrb[20].mxu1 %vm161_vm0, %v3639_v12  ;;  %2885 = vmatprep.subr.bf16.mxu0 %v5322_v19 }
  0x33   :  { %684 = vmatpush1.bf16.msra.mxu1 %v3791_v37  ;;  %703 = vmatprep.mubr.bf16.mxu1 %v5320_v1 }
  0x34   :  { %685 = vmatprep.subr.bf16.mxu1 %v3797_v38  ;;  %2622 = vmatmul.mubr.msk.bf16.gmra.mrb[20].mxu0 %vm161_vm0, %v3639_v12 }
  0x35   :  { %2886 = vmatpush3.bf16.msra.mxu0 %v3803_v39  ;;  %2889 = vmatprep.mubr.msk.bf16.mxu0 %vm3545_vm1, %v5322_v19 }
  0x36   :  { %2887 = vmatprep.subr.bf16.mxu0 %v5322_v19 }
  0x37   :  { %686 = vmatpush1.bf16.msra.mxu1 %v3812_v40 }
  0x38   :  { %880 = vmatprep.subr.bf16.mxu1 %v3822_v42 }
  0x39   :  { %2888 = vmatpush3.bf16.msra.mxu0 %v3830_v43 }
  0x3a   :  { %704 = vmatmul.mubr.bf16.vlgmr.msra.gmra.mrb[24].mxu1 %v5320_v1  ;;  %2893 = vmatprep.subr.bf16.mxu0 %v5322_v19 }
  0x3b   :  { %881 = vmatpush1.bf16.msra.mxu1 %v3839_v44  ;;  %912 = vmatprep.mubr.bf16.mxu1 %v5320_v1 }
  0x3c   :  { %882 = vmatprep.subr.bf16.mxu1 %v3845_v45  ;;  %2890 = vmatmul.mubr.bf16.vlgmr.msra.gmra.mrb[24].mxu0 %v5320_v1 }
  0x3d   :  { %2894 = vmatpush3.bf16.msra.mxu0 %v3851_v46  ;;  %2909 = vmatprep.mubr.msk.bf16.mxu0 %vm3545_vm1, %v5322_v19 }
  0x3e   :  { %2895 = vmatprep.subr.bf16.mxu0 %v5322_v19 }
  0x3f   :  { %883 = vmatpush1.bf16.msra.mxu1 %v3859_v47 }
  0x40   :  { %884 = vmatprep.subr.bf16.mxu1 %v3866_v48 }
  0x41   :  { %2896 = vmatpush3.bf16.msra.mxu0 %v3873_v49 }
  0x42   :  { %2897 = vmatprep.subr.bf16.mxu0 %v5322_v19 }
  0x43   :  { %885 = vmatpush1.bf16.msra.mxu1 %v3882_v50 }
  0x44   :  { %886 = vmatprep.subr.bf16.mxu1 %v3888_v51 }
  0x45   :  { %2898 = vmatpush3.bf16.msra.mxu0 %v3894_v52 }
  0x46   :  { %2899 = vmatprep.subr.bf16.mxu0 %v5322_v19 }
  0x47   :  { %887 = vmatpush1.bf16.msra.mxu1 %v3901_v53 }
  0x48   :  { %888 = vmatprep.subr.bf16.mxu1 %v3907_v54 }
  0x49   :  { %2900 = vmatpush3.bf16.msra.mxu0 %v3913_v55 }
  0x4a   :  { %2901 = vmatprep.subr.bf16.mxu0 %v5322_v19 }
  0x4b   :  { %889 = vmatpush1.bf16.msra.mxu1 %v3920_v56 }
  0x4c   :  { %890 = vmatprep.subr.bf16.mxu1 %v3926_v57 }
  0x4d   :  { %2902 = vmatpush3.bf16.msra.mxu0 %v3932_v58 }
  0x4e   :  { %2903 = vmatprep.subr.bf16.mxu0 %v5322_v19 }
  0x4f   :  { %891 = vmatpush1.bf16.msra.mxu1 %v3939_v59 }
  0x50   :  { %892 = vmatprep.subr.bf16.mxu1 %v3945_v60 }
  0x51   :  { %2904 = vmatpush3.bf16.msra.mxu0 %v3951_v61 }
  0x52   :  { %2905 = vmatprep.subr.bf16.mxu0 %v5322_v19 }
  0x53   :  { %893 = vmatpush1.bf16.msra.mxu1 %v3958_v62 }
  0x54   :  { %894 = vmatprep.subr.bf16.mxu1 %v3964_v63 }
  0x55   :  { %2906 = vmatpush3.bf16.msra.mxu0 %v3970_v0 }
  0x56   :  { %2907 = vmatprep.subr.bf16.mxu0 %v5322_v19 }
  0x57   :  { %895 = vmatpush1.bf16.msra.mxu1 %v3977_v2 }
  0x58   :  { %1023 = vmatprep.subr.bf16.mxu1 %v3632_v11 }
  0x59   :  { %2908 = vmatpush3.bf16.msra.mxu0 %v3984_v3 }
  0x5a   :  { %913 = vmatmul.mubr.bf16.vlgmr.msra.gmra.mrb[28].mxu1 %v5320_v1  ;;  %2913 = vmatprep.subr.bf16.mxu0 %v5322_v19 }
  0x5b   :  { %1024 = vmatpush1.bf16.msra.mxu1 %v3665_v18  ;;  %1055 = vmatprep.mubr.bf16.mxu1 %v5320_v1 }
  0x5c   :  { %2910 = vmatmul.mubr.bf16.vlgmr.msra.gmra.mrb[28].mxu0 %v5320_v1  ;;  %1025 = vmatprep.subr.bf16.mxu1 %v3671_v20 }
  0x5d   :  { %2914 = vmatpush3.bf16.msra.mxu0 %v3676_v21  ;;  %2929 = vmatprep.mubr.msk.bf16.mxu0 %vm3545_vm1, %v5322_v19 }
  0x5e   :  { %2915 = vmatprep.subr.bf16.mxu0 %v5322_v19 }
  0x5f   :  { %1026 = vmatpush1.bf16.msra.mxu1 %v3683_v22 }
  0x60   :  { %1027 = vmatprep.subr.bf16.mxu1 %v3690_v23 }
  0x61   :  { %2916 = vmatpush3.bf16.msra.mxu0 %v3697_v24 }
  0x62   :  { %2917 = vmatprep.subr.bf16.mxu0 %v5322_v19 }
  0x63   :  { %1028 = vmatpush1.bf16.msra.mxu1 %v3705_v25 }
  0x64   :  { %1029 = vmatprep.subr.bf16.mxu1 %v3711_v26 }
  0x65   :  { %2918 = vmatpush3.bf16.msra.mxu0 %v3717_v27 }
  0x66   :  { %2919 = vmatprep.subr.bf16.mxu0 %v5322_v19 }
  0x67   :  { %1030 = vmatpush1.bf16.msra.mxu1 %v3725_v28 }
  0x68   :  { %1031 = vmatprep.subr.bf16.mxu1 %v3732_v29 }
  0x69   :  { %2920 = vmatpush3.bf16.msra.mxu0 %v3739_v30 }
  0x6a   :  { %2921 = vmatprep.subr.bf16.mxu0 %v5322_v19 }
  0x6b   :  { %1032 = vmatpush1.bf16.msra.mxu1 %v3747_v31 }
  0x6c   :  { %1033 = vmatprep.subr.bf16.mxu1 %v3753_v32 }
  0x6d   :  { %2922 = vmatpush3.bf16.msra.mxu0 %v3759_v33 }
  0x6e   :  { %2923 = vmatprep.subr.bf16.mxu0 %v5322_v19 }
  0x6f   :  { %1034 = vmatpush1.bf16.msra.mxu1 %v3768_v34 }
  0x70   :  { %1035 = vmatprep.subr.bf16.mxu1 %v3775_v35 }
  0x71   :  { %2924 = vmatpush3.bf16.msra.mxu0 %v3783_v36 }
  0x72   :  { %2925 = vmatprep.subr.bf16.mxu0 %v5322_v19 }
  0x73   :  { %1036 = vmatpush1.bf16.msra.mxu1 %v3791_v37 }
  0x74   :  { %1037 = vmatprep.subr.bf16.mxu1 %v3797_v38  ;;  %v65_v38 = vsub.s32 3, %v52_v5 }
  0x75   :  { %2926 = vmatpush3.bf16.msra.mxu0 %v3803_v39 }
  0x76   :  { %2927 = vmatprep.subr.bf16.mxu0 %v5322_v19 }
  0x77   :  { %1038 = vmatpush1.bf16.msra.mxu1 %v3812_v40 }
  0x78   :  { %1105 = vmatprep.subr.bf16.mxu1 %v3822_v42 }
  0x79   :  { %2928 = vmatpush3.bf16.msra.mxu0 %v3830_v43 }
  0x7a   :  { %2933 = vmatprep.subr.bf16.mxu0 %v5322_v19 }
  0xdd   :  { %v228_v12 = vpop.f32.mrb[0].mxu1 }
  0xde   :  { %v4042_v13 = vadd.f32 %v228_v12, %v4036_v9  ;;  %v230_v14 = vpop.f32.mrb[1].mxu1 }
  0xdf   :  { %v4045_v15 = vadd.f32 %v230_v14, %v4039_v10  ;;  %v232_v16 = vpop.f32.mrb[2].mxu1  ;;  %v4047_v17 = vpop.f32.mrb[0].mxu0 }
  0xe0   :  { %5390 = vst [vmem:[#allocation21_spill] sm:$0xff] %v4042_v13  ;;  %v4050_v41 = vadd.f32 %v232_v16, %v4036_v9  ;;  %v234_v4 = vpop.f32.mrb[3].mxu1  ;;  %v4052_v1 = vpop.f32.mrb[1].mxu0 }
  0xe1   :  { %5391 = vst [vmem:[#allocation22_spill] sm:$0xff] %v4045_v15  ;;  %v4055_v19 = vadd.f32 %v234_v4, %v4039_v10  ;;  %v212_v42 = vpop.f32.mrb[2].mxu0 }
  0xe2   :  { %5392 = vst [vmem:[#allocation23_spill] sm:$0xff] %v4050_v41  ;;  %v4058_v12 = vadd.f32 %v212_v42, %v4036_v9  ;;  %v214_v13 = vpop.f32.mrb[3].mxu0 }
  0xe3   :  { %5393 = vst [vmem:[#allocation24_spill] sm:$0xff] %v4055_v19  ;;  %v4061_v14 = vadd.f32 %v214_v13, %v4039_v10 }
  0xe4   :  { %5394 = vst [vmem:[#allocation25_spill] sm:$0xff] %v4058_v12 }
  0xe5   :  { %5395 = vst [vmem:[#allocation26_spill] sm:$0xff] %v4061_v14  ;;  %v238_v15 = vpop.f32.mrb[4].mxu1  ;;  %v69_v14 = vsub.s32 4, %v52_v5 }
  0xe6   :  { %v4064_v43 = vadd.f32 %v238_v15, %v4036_v9  ;;  %v240_v16 = vpop.f32.mrb[5].mxu1 }
  0xe7   :  { %v4067_v41 = vadd.f32 %v240_v16, %v4039_v10  ;;  %v242_v40 = vpop.f32.mrb[6].mxu1  ;;  %v218_v4 = vpop.f32.mrb[4].mxu0 }
  0xe8   :  { %5396 = vst [vmem:[#allocation27_spill] sm:$0xff] %v4064_v43  ;;  %v4070_v19 = vadd.f32 %v242_v40, %v4036_v9  ;;  %v244_v42 = vpop.f32.mrb[7].mxu1  ;;  %v4073_v12 = vadd.f32 %v218_v4, %v4036_v9  ;;  %v220_v13 = vpop.f32.mrb[5].mxu0  ;;  %v4081_v43 = vsub.s32 2, %v52_v5 }
  0xe9   :  { %5397 = vst [vmem:[#allocation28_spill] sm:$0xff] %v4067_v41  ;;  %v4076_v39 = vadd.f32 %v244_v42, %v4039_v10  ;;  %v4079_v15 = vadd.f32 %v220_v13, %v4039_v10  ;;  %v222_v16 = vpop.f32.mrb[6].mxu0  ;;  %v73_v41 = vsub.s32 5, %v52_v5 }
  0xea   :  { %5398 = vst [vmem:[#allocation29_spill] sm:$0xff] %v4070_v19  ;;  %5399 = vst [vmem:[#allocation30_spill] sm:$0xff] %v4073_v12  ;;  %v4084_v37 = vadd.f32 %v222_v16, %v4036_v9  ;;  %v224_v40 = vpop.f32.mrb[7].mxu0  ;;  %v4086_v19 = vrot.slane %v49_v7, %v65_v38  ;;  %v4091_v12 = vrot.slane %v49_v7, %v69_v14 }
  0xeb   :  { %5400 = vst [vmem:[#allocation31_spill] sm:$0xff] %v4076_v39  ;;  %5401 = vst [vmem:[#allocation32_spill] sm:$0xff] %v4079_v15  ;;  %v4089_v4 = vadd.f32 %v224_v40, %v4039_v10  ;;  %v4095_v39 = vrot.slane %v49_v7, %v73_v41  ;;  %v4098_v13 = vrot.slane %v49_v7, %v4081_v43 }
  0xec   :  { %5402 = vst [vmem:[#allocation33_spill] sm:$0xff] %v4084_v37 }
  0xed   :  { %5403 = vst [vmem:[#allocation34_spill] sm:$0xff] %v4089_v4  ;;  %v4093_v42 = vpop.f32.mrb[8].mxu1 }
  0xee   :  { %v283_v5 = vpop.f32.mrb[9].mxu1 }
  0xef   :  { %v4101_v15 = vadd.f32 %v283_v5, %v4086_v19  ;;  %v285_v16 = vpop.f32.mrb[10].mxu1  ;;  %v354_v37 = vpop.f32.mrb[8].mxu0 }
  0xf0   :  { %v4104_v38 = vadd.f32 %v285_v16, %v4098_v13  ;;  %v287_v40 = vpop.f32.mrb[11].mxu1  ;;  %v4107_v14 = vadd.f32 %v354_v37, %v4091_v12  ;;  %v356_v4 = vpop.f32.mrb[9].mxu0 }
  0xf1   :  { %5404 = vst [vmem:[#allocation35_spill] sm:$0xff] %v4101_v15  ;;  %v4110_v41 = vadd.f32 %v287_v40, %v4086_v19  ;;  %v4113_v7 = vadd.f32 %v356_v4, %v4095_v39  ;;  %v358_v35 = vpop.f32.mrb[10].mxu0 }
  0xf2   :  { %5405 = vst [vmem:[#allocation36_spill] sm:$0xff] %v4104_v38  ;;  %5406 = vst [vmem:[#allocation37_spill] sm:$0xff] %v4107_v14  ;;  %v4116_v5 = vadd.f32 %v358_v35, %v4091_v12  ;;  %v360_v15 = vpop.f32.mrb[11].mxu0 }
  0xf3   :  { %5407 = vst [vmem:[#allocation38_spill] sm:$0xff] %v4110_v41  ;;  %5408 = vst [vmem:[#allocation39_spill] sm:$0xff] %v4113_v7  ;;  %v4119_v36 = vadd.f32 %v360_v15, %v4095_v39 }
  0xf4   :  { %5409 = vst [vmem:[#allocation40_spill] sm:$0xff] %v4116_v5 }
  0xf5   :  { %5410 = vst [vmem:[#allocation41_spill] sm:$0xff] %v4119_v36  ;;  %v291_v16 = vpop.f32.mrb[12].mxu1 }
  0xf6   :  { %v4122_v38 = vadd.f32 %v291_v16, %v4098_v13  ;;  %v293_v37 = vpop.f32.mrb[13].mxu1 }
  0xf7   :  { %v4125_v14 = vadd.f32 %v293_v37, %v4086_v19  ;;  %v295_v40 = vpop.f32.mrb[14].mxu1  ;;  %v364_v41 = vpop.f32.mrb[12].mxu0 }
  0xf8   :  { %5411 = vst [vmem:[#allocation42_spill] sm:$0xff] %v4122_v38  ;;  %v4128_v4 = vadd.f32 %v295_v40, %v4098_v13  ;;  %v297_v7 = vpop.f32.mrb[15].mxu1  ;;  %v4131_v35 = vadd.f32 %v364_v41, %v4091_v12  ;;  %v366_v5 = vpop.f32.mrb[13].mxu0 }
  0xf9   :  { %5412 = vst [vmem:[#allocation43_spill] sm:$0xff] %v4125_v14  ;;  %v4134_v15 = vadd.f32 %v297_v7, %v4086_v19  ;;  %v4137_v16 = vadd.f32 %v366_v5, %v4095_v39  ;;  %v368_v36 = vpop.f32.mrb[14].mxu0 }
  0xfa   :  { %5413 = vst [vmem:[#allocation44_spill] sm:$0xff] %v4128_v4  ;;  %5414 = vst [vmem:[#allocation45_spill] sm:$0xff] %v4131_v35  ;;  %v4140_v37 = vadd.f32 %v368_v36, %v4091_v12  ;;  %v370_v14 = vpop.f32.mrb[15].mxu0 }
  0xfb   :  { %5415 = vst [vmem:[#allocation46_spill] sm:$0xff] %v4134_v15  ;;  %5416 = vst [vmem:[#allocation47_spill] sm:$0xff] %v4137_v16  ;;  %v4143_v38 = vadd.f32 %v370_v14, %v4095_v39 }
  0xfc   :  { %5417 = vst [vmem:[#allocation48_spill] sm:$0xff] %v4140_v37 }
  0xfd   :  { %5418 = vst [vmem:[#allocation49_spill] sm:$0xff] %v4143_v38  ;;  %v301_v40 = vpop.f32.mrb[16].mxu1 }
  0xfe   :  { %v4146_v4 = vadd.f32 %v301_v40, %v4098_v13  ;;  %v303_v41 = vpop.f32.mrb[17].mxu1 }
  0xff   :  { %v4149_v35 = vadd.f32 %v303_v41, %v4086_v19  ;;  %v305_v7 = vpop.f32.mrb[18].mxu1  ;;  %v374_v15 = vpop.f32.mrb[16].mxu0 }
 0x100   :  { %5419 = vst [vmem:[#allocation50_spill] sm:$0xff] %v4146_v4  ;;  %v4152_v5 = vadd.f32 %v305_v7, %v4098_v13  ;;  %v307_v16 = vpop.f32.mrb[19].mxu1  ;;  %v4155_v36 = vadd.f32 %v374_v15, %v4091_v12  ;;  %v376_v37 = vpop.f32.mrb[17].mxu0 }
 0x101   :  { %5420 = vst [vmem:[#allocation51_spill] sm:$0xff] %v4149_v35  ;;  %v4158_v14 = vadd.f32 %v307_v16, %v4086_v19  ;;  %v4161_v40 = vadd.f32 %v376_v37, %v4095_v39  ;;  %v378_v38 = vpop.f32.mrb[18].mxu0  ;;  %v505_v37 = vld [vmem:[%s5317_s6] sm:$0x7] }
 0x102   :  { %5421 = vst [vmem:[#allocation52_spill] sm:$0xff] %v4152_v5  ;;  %5422 = vst [vmem:[#allocation53_spill] sm:$0xff] %v4155_v36  ;;  %v4164_v41 = vadd.f32 %v378_v38, %v4091_v12  ;;  %v380_v4 = vpop.f32.mrb[19].mxu0 }
 0x103   :  { %5423 = vst [vmem:[#allocation54_spill] sm:$0xff] %v4158_v14  ;;  %5424 = vst [vmem:[#allocation55_spill] sm:$0xff] %v4161_v40  ;;  %v4167_v35 = vadd.f32 %v380_v4, %v4095_v39 }
 0x104   :  { %5425 = vst [vmem:[#allocation56_spill] sm:$0xff] %v4164_v41 }
 0x105   :  { %5426 = vst [vmem:[#allocation57_spill] sm:$0xff] %v4167_v35  ;;  %v311_v7 = vpop.f32.mrb[20].mxu1 }
 0x106   :  { %v4170_v5 = vadd.f32 %v311_v7, %v4098_v13  ;;  %v313_v15 = vpop.f32.mrb[21].mxu1 }
 0x107   :  { %v4173_v36 = vadd.f32 %v313_v15, %v4086_v19  ;;  %v315_v16 = vpop.f32.mrb[22].mxu1  ;;  %v384_v40 = vpop.f32.mrb[20].mxu0  ;;  %v4188_v15 = vrot.slane %v505_v37, %v4028_v6 }
 0x108   :  { %5427 = vst [vmem:[#allocation58_spill] sm:$0xff] %v4170_v5  ;;  %v4179_v38 = vadd.f32 %v315_v16, %v4098_v13  ;;  %v317_v41 = vpop.f32.mrb[23].mxu1  ;;  %v4182_v4 = vadd.f32 %v384_v40, %v4091_v12  ;;  %v386_v35 = vpop.f32.mrb[21].mxu0  ;;  %v209_v16 = vadd.f32 %v4047_v17, %v4036_v9  ;;  %v4202_v17 = vrot.slane %v505_v37, %v4081_v43 }
 0x109   :  { %5428 = vst [vmem:[#allocation59_spill] sm:$0xff] %v4173_v36  ;;  %v4185_v7 = vadd.f32 %v386_v35, %v4095_v39  ;;  %v388_v5 = vpop.f32.mrb[22].mxu0  ;;  %5432 = vst [vmem:[#allocation63_spill] sm:$0xff] %v4188_v15  ;;  %v4193_v36 = vrot.slane %v505_v37, %v4033_v8  ;;  %v211_v35 = vadd.f32 %v4052_v1, %v4039_v10  ;;  %v522_v10 = vld [vmem:[%s5317_s6 + $0x3] sm:$0x7] }
 0x10a   :  { %5429 = vst [vmem:[#allocation60_spill] sm:$0xff] %v4179_v38  ;;  %5430 = vst [vmem:[#allocation61_spill] sm:$0xff] %v4182_v4  ;;  %v4190_v14 = vpop.f32.mrb[23].mxu0  ;;  %v318_v37 = vadd.f32 %v317_v41, %v4086_v19 }
 0x10b   :  { %5431 = vst [vmem:[#allocation62_spill] sm:$0xff] %v4185_v7  ;;  %5433 = vst [vmem:[#allocation64_spill] sm:$0xff] %v4202_v17 }
 0x10d   :  { %v705_v34 = vpop.f32.mrb[24].mxu1 }
 0x10e   :  { %v706_v40 = vadd.f32 %v705_v34, %v4188_v15  ;;  %v707_v38 = vpop.f32.mrb[25].mxu1 }
 0x10f   :  { %v708_v7 = vadd.f32 %v707_v38, %v4193_v36  ;;  %v709_v4 = vpop.f32.mrb[26].mxu1  ;;  %v746_v32 = vpop.f32.mrb[24].mxu0 }
 0x110   :  { %v973_v33 = vadd.f32 %v706_v40, %v209_v16  ;;  %v710_v31 = vpop.f32.mrb[27].mxu1  ;;  %v2891_v29 = vpop.f32.mrb[25].mxu0 }
 0x111   :  { %v974_v30 = vadd.f32 %v708_v7, %v211_v35  ;;  %v749_v28 = vpop.f32.mrb[26].mxu0  ;;  %v747_v29 = vadd.f32 %v746_v32, %v4202_v17  ;;  %v389_v32 = vadd.f32 %v388_v5, %v4091_v12 }
 0x112   :  { %v2671_v26 = vmul.f32 -1.442695, %v973_v33  ;;  %v2892_v27 = vpop.f32.mrb[27].mxu0  ;;  %v4209_v28 = vrot.slane %v522_v10, %v4028_v6 }
 0x113   :  { %v2672_v25 = vmul.f32 -1.442695, %v974_v30  ;;  %v282_v27 = vadd.f32 %v4093_v42, %v4098_v13 }
 0x114   :  { %3287 = vpow2.f32 %v2671_v26 }
 0x115   :  { %3289 = vpow2.f32 %v2672_v25  ;;  %v4212_v25 = vrot.slane %v522_v10, %v4033_v8 }
 0x11e   :  { %v3288_v9 = vpop.eup %3287 }
 0x11f   :  { %v981_v34 = vadd.f32 1.0, %v3288_v9  ;;  %v3290_v1 = vpop.eup %3289 }
 0x120   :  { %v982_v31 = vadd.f32 1.0, %v3290_v1 }
 0x121   :  { %3291 = vrcp.f32 %v981_v34 }
 0x122   :  { %3293 = vrcp.f32 %v982_v31  ;;  %v4220_v31 = vpop.permute.xlu0 %541 }
 0x123   :  { %vm1015_vm2 = vcmp.gt.s32.totalorder %v4220_v31, 0  ;;  %vm1016_vm4 = vcmp.gt.s32.totalorder %v4220_v31, 7  ;;  %vm1240_vm6 = vcmp.gt.s32.totalorder %v4220_v31, 1  ;;  %vm1241_vm7 = vcmp.gt.s32.totalorder %v4220_v31, 6 }
 0x124   :  { %vm2676_vm3 = vmpackc.low %vm1015_vm2, %vm1015_vm2  ;;  %vm1468_vm8 = vcmp.gt.s32.totalorder %v4220_v31, 2  ;;  %vm1469_vm9 = vcmp.gt.s32.totalorder %v4220_v31, 5  ;;  %vm1696_vm10 = vcmp.gt.s32.totalorder %v4220_v31, 3  ;;  %vm1697_vm11 = vcmp.gt.s32.totalorder %v4220_v31, 4 }
 0x125   :  { %vm2682_vm5 = vmpackc.low %vm1016_vm4, %vm1016_vm4 }
 0x12b   :  { %v3292_v26 = vpop.eup %3291 }
 0x12c   :  { %v987_v30 = vmul.f32 %v3292_v26, %v747_v29  ;;  %v3294_v19 = vpop.eup %3293 }
 0x12d   :  { %v914_v33 = vpop.f32.mrb[28].mxu1  ;;  %v990_v29 = vsub.f32 1.0, %v3294_v19  ;;  %v992_v5 = vmul.f32 0.0, %v3294_v19 }
 0x12e   :  { %v988_v38 = vadd.f32 %v987_v30, %v282_v27  ;;  %v915_v4 = vadd.f32 %v914_v33, %v4209_v28  ;;  %v916_v7 = vpop.f32.mrb[29].mxu1 }
 0x12f   :  { %v917_v6 = vadd.f32 %v916_v7, %v4212_v25  ;;  %v918_v16 = vpop.f32.mrb[30].mxu1  ;;  %v955_v40 = vpop.f32.mrb[28].mxu0  ;;  %v4239_v7 = vrot.slane %v522_v10, %v4081_v43  ;;  %v391_v10 = vadd.f32 %v4190_v14, %v4095_v39 }
 0x130   :  { %3295 = vtanh.f32 %v988_v38  ;;  %v994_v8 = vadd.f32 %v915_v4, %v318_v37  ;;  %v919_v35 = vpop.f32.mrb[31].mxu1  ;;  %v2911_v9 = vpop.f32.mrb[29].mxu0  ;;  %v5434_v4 = vmov 0.0  }
 0x131   :  { %v995_v42 = vadd.f32 %v917_v6, %v389_v32  ;;  %v958_v13 = vpop.f32.mrb[30].mxu0  ;;  %v5435_v32 = vmov 0  }
 0x132   :  { %v2673_v34 = vmul.f32 -1.442695, %v994_v8  ;;  %v2912_v1 = vpop.f32.mrb[31].mxu0  ;;  %v956_v8 = vadd.f32 %v955_v40, %v4239_v7 }
 0x133   :  { %v2674_v41 = vmul.f32 -1.442695, %v995_v42 }
 0x134   :  { %3297 = vpow2.f32 %v2673_v34 }
 0x135   :  { %3299 = vpow2.f32 %v2674_v41  ;;  %v5440_v41 = vld [vmem:[#allocation8_spill] sm:$0xff] }
 0x13a   :  { %v3296_v26 = vpop.eup %3295 }
 0x13b   :  { %v991_v12 = vmul.f32 %v3296_v26, %v990_v29  ;;  %v5441_v29 = vld [vmem:[#allocation7_spill] sm:$0xff]  ;;  %v5445_v26 = vld [vmem:[#allocation12_spill] sm:$0xff] }
 0x13d   :  { %v993_v27 = vadd.f32 %v992_v5, %v991_v12  ;;  %v5446_v12 = vld [vmem:[#allocation14_spill] sm:$0xff]  ;;  %v5447_v5 = vld [vmem:[#allocation13_spill] sm:$0xff] }
 0x13e   :  { %v3298_v30 = vpop.eup %3297 }
 0x13f   :  { %v1002_v33 = vadd.f32 1.0, %v3298_v30  ;;  %v2677_v37 = vpack.c.bf16 %v993_v27, %v993_v27  ;;  %v4228_v38 = vsel %vm1015_vm2, %v993_v27, 0.0  ;;  %v3300_v6 = vpop.eup %3299  ;;  %v5448_v27 = vld [vmem:[#allocation15_spill] sm:$0xff]  ;;  %v5449_v30 = vld [vmem:[#allocation17_spill] sm:$0xff] }
 0x140   :  { %1018 = vst [vmem:[%s5318_s7] sm:$0xff] %v4228_v38  ;;  %v1003_v16 = vadd.f32 1.0, %v3300_v6  ;;  %v5452_v6 = vld [vmem:[#allocation20_spill] sm:$0xff] }
 0x141   :  { %3301 = vrcp.f32 %v1002_v33  ;;  %2678 = vmatmul.mubr.msk.bf16.vlgmr.msra.gmra.mrb[32].mxu1 %vm2676_vm3, %v2677_v37  ;;  %2930 = vmatmul.mubr.msk.bf16.vlgmr.msra.gmra.mrb[32].mxu0 %vm2676_vm3, %v2677_v37  ;;  %v5450_v33 = vld [vmem:[#allocation16_spill] sm:$0xff]  ;;  %v5451_v37 = vld [vmem:[#allocation18_spill] sm:$0xff] }
 0x142   :  { %1106 = vmatpush1.bf16.msra.mxu1 %v3839_v44  ;;  %2934 = vmatpush3.bf16.msra.mxu0 %v3851_v46  ;;  %3303 = vrcp.f32 %v1003_v16  ;;  %v5453_v16 = vld [vmem:[#allocation19_spill] sm:$0xff] }
 0x143   :  { %1107 = vmatprep.subr.bf16.mxu1 %v3845_v45  ;;  %2935 = vmatprep.subr.bf16.mxu0 %v5434_v4 }
 0x144   :  { %1137 = vmatprep.mubr.bf16.mxu1 %v5435_v32  ;;  %2949 = vmatprep.mubr.msk.bf16.mxu0 %vm3545_vm1, %v5434_v4 }
 0x146   :  { %1108 = vmatpush1.bf16.msra.mxu1 %v3859_v47  ;;  %2936 = vmatpush3.bf16.msra.mxu0 %v3873_v49 }
 0x147   :  { %1109 = vmatprep.subr.bf16.mxu1 %v3866_v48  ;;  %2937 = vmatprep.subr.bf16.mxu0 %v5434_v4 }
 0x14a   :  { %1110 = vmatpush1.bf16.msra.mxu1 %v3882_v50  ;;  %2938 = vmatpush3.bf16.msra.mxu0 %v3894_v52 }
 0x14b   :  { %v3302_v43 = vpop.eup %3301  ;;  %1111 = vmatprep.subr.bf16.mxu1 %v3888_v51  ;;  %2939 = vmatprep.subr.bf16.mxu0 %v5434_v4 }
 0x14c   :  { %v1008_v35 = vmul.f32 %v3302_v43, %v956_v8  ;;  %v3304_v39 = vpop.eup %3303 }
 0x14d   :  { %v1011_v14 = vsub.f32 1.0, %v3304_v39  ;;  %v1013_v13 = vmul.f32 0.0, %v3304_v39 }
 0x14e   :  { %v1009_v9 = vadd.f32 %v1008_v35, %v391_v10  ;;  %1112 = vmatpush1.bf16.msra.mxu1 %v3901_v53  ;;  %2940 = vmatpush3.bf16.msra.mxu0 %v3913_v55 }
 0x14f   :  { %1113 = vmatprep.subr.bf16.mxu1 %v3907_v54  ;;  %2941 = vmatprep.subr.bf16.mxu0 %v5434_v4 }
 0x150   :  { %3305 = vtanh.f32 %v1009_v9 }
 0x152   :  { %1114 = vmatpush1.bf16.msra.mxu1 %v3920_v56  ;;  %2942 = vmatpush3.bf16.msra.mxu0 %v3932_v58 }
 0x153   :  { %1115 = vmatprep.subr.bf16.mxu1 %v3926_v57  ;;  %2943 = vmatprep.subr.bf16.mxu0 %v5434_v4 }
 0x156   :  { %1116 = vmatpush1.bf16.msra.mxu1 %v3939_v59  ;;  %2944 = vmatpush3.bf16.msra.mxu0 %v3951_v61 }
 0x157   :  { %1117 = vmatprep.subr.bf16.mxu1 %v3945_v60  ;;  %2945 = vmatprep.subr.bf16.mxu0 %v5434_v4 }
 0x15a   :  { %v3306_v40 = vpop.eup %3305  ;;  %1118 = vmatpush1.bf16.msra.mxu1 %v3958_v62  ;;  %2946 = vmatpush3.bf16.msra.mxu0 %v3970_v0 }
 0x15b   :  { %1119 = vmatprep.subr.bf16.mxu1 %v3964_v63  ;;  %2947 = vmatprep.subr.bf16.mxu0 %v5434_v4  ;;  %v1012_v42 = vmul.f32 %v3306_v40, %v1011_v14 }
 0x15d   :  { %v1014_v34 = vadd.f32 %v1013_v13, %v1012_v42  ;;  %v5454_v42 = vld [vmem:[#allocation25_spill] sm:$0xff] }
 0x15e   :  { %1120 = vmatpush1.bf16.msra.mxu1 %v3977_v2  ;;  %2948 = vmatpush3.bf16.msra.mxu0 %v3984_v3 }
 0x15f   :  { %v2683_v1 = vpack.c.bf16 %v1014_v34, %v1014_v34  ;;  %1251 = vmatprep.subr.bf16.mxu1 %v3632_v11  ;;  %2953 = vmatprep.subr.bf16.mxu0 %v5434_v4  ;;  %v4278_v19 = vsel %vm1016_vm4, %v1014_v34, 0.0  ;;  %v5436_v11 = vld [vmem:[#allocation3_spill] sm:$0xff] }
 0x160   :  { %2675 = vst [vmem:[%s5318_s7 + $0x78] sm:$0xff] %v4278_v19 }
 0x161   :  { %2684 = vmatmul.mubr.msk.bf16.vlgmr.msra.gmra.mrb[36].mxu1 %vm2682_vm5, %v2683_v1  ;;  %2950 = vmatmul.mubr.msk.bf16.vlgmr.msra.gmra.mrb[36].mxu0 %vm2682_vm5, %v2683_v1 }
 0x162   :  { %1252 = vmatpush1.bf16.msra.mxu1 %v3665_v18  ;;  %2954 = vmatpush3.bf16.msra.mxu0 %v3676_v21  ;;  %v5437_v18 = vld [vmem:[#allocation5_spill] sm:$0xff]  ;;  %v5439_v21 = vld [vmem:[#allocation6_spill] sm:$0xff] }
 0x163   :  { %1253 = vmatprep.subr.bf16.mxu1 %v3671_v20  ;;  %2955 = vmatprep.subr.bf16.mxu0 %v5434_v4  ;;  %v5438_v20 = vld [vmem:[#allocation4_spill] sm:$0xff] }
 0x164   :  { %1283 = vmatprep.mubr.bf16.mxu1 %v5435_v32  ;;  %2969 = vmatprep.mubr.msk.bf16.mxu0 %vm3545_vm1, %v5434_v4 }
 0x166   :  { %1254 = vmatpush1.bf16.msra.mxu1 %v3683_v22  ;;  %2956 = vmatpush3.bf16.msra.mxu0 %v3697_v24  ;;  %v5442_v22 = vld [vmem:[#allocation9_spill] sm:$0xff]  ;;  %v5444_v24 = vld [vmem:[#allocation10_spill] sm:$0xff] }
 0x167   :  { %1255 = vmatprep.subr.bf16.mxu1 %v3690_v23  ;;  %2957 = vmatprep.subr.bf16.mxu0 %v5434_v4  ;;  %v5443_v23 = vld [vmem:[#allocation11_spill] sm:$0xff] }
 0x16a   :  { %1256 = vmatpush1.bf16.msra.mxu1 %v5436_v11  ;;  %2958 = vmatpush3.bf16.msra.mxu0 %v5437_v18  ;;  %v5455_v11 = vld [vmem:[#allocation26_spill] sm:$0xff] }
 0x16b   :  { %1257 = vmatprep.subr.bf16.mxu1 %v5438_v20  ;;  %2959 = vmatprep.subr.bf16.mxu0 %v5434_v4 }
 0x16e   :  { %1258 = vmatpush1.bf16.msra.mxu1 %v5439_v21  ;;  %2960 = vmatpush3.bf16.msra.mxu0 %v5440_v41 }
 0x16f   :  { %1259 = vmatprep.subr.bf16.mxu1 %v5441_v29  ;;  %2961 = vmatprep.subr.bf16.mxu0 %v5434_v4 }
 0x172   :  { %1260 = vmatpush1.bf16.msra.mxu1 %v5442_v22  ;;  %2962 = vmatpush3.bf16.msra.mxu0 %v5443_v23 }
 0x173   :  { %1261 = vmatprep.subr.bf16.mxu1 %v5444_v24  ;;  %2963 = vmatprep.subr.bf16.mxu0 %v5434_v4 }
 0x176   :  { %1262 = vmatpush1.bf16.msra.mxu1 %v5445_v26  ;;  %2964 = vmatpush3.bf16.msra.mxu0 %v5446_v12 }
 0x177   :  { %1263 = vmatprep.subr.bf16.mxu1 %v5447_v5  ;;  %2965 = vmatprep.subr.bf16.mxu0 %v5434_v4 }
 0x17a   :  { %1264 = vmatpush1.bf16.msra.mxu1 %v5448_v27  ;;  %2966 = vmatpush3.bf16.msra.mxu0 %v5449_v30  ;;  %v5456_v30 = vld [vmem:[#allocation36_spill] sm:$0xff] }
 0x17b   :  { %1265 = vmatprep.subr.bf16.mxu1 %v5450_v33  ;;  %2967 = vmatprep.subr.bf16.mxu0 %v5434_v4 }
 0x17e   :  { %1266 = vmatpush1.bf16.msra.mxu1 %v5451_v37  ;;  %2968 = vmatpush3.bf16.msra.mxu0 %v5452_v6 }
 0x17f   :  { %1333 = vmatprep.subr.bf16.mxu1 %v5453_v16  ;;  %2973 = vmatprep.subr.bf16.mxu0 %v5434_v4 }
 0x214   :  { %v1057_v8 = vpop.f32.mrb[32].mxu1  ;;  %v1098_v43 = vpop.f32.mrb[32].mxu0 }
 0x215   :  { %v1058_v10 = vadd.f32 %v1057_v8, %v4188_v15  ;;  %v1059_v35 = vpop.f32.mrb[33].mxu1  ;;  %v2931_v9 = vpop.f32.mrb[33].mxu0  ;;  %v1099_v24 = vadd.f32 %v1098_v43, %v4202_v17 }
 0x216   :  { %v1060_v39 = vadd.f32 %v1059_v35, %v4193_v36  ;;  %v1061_v14 = vpop.f32.mrb[34].mxu1  ;;  %v1101_v40 = vpop.f32.mrb[34].mxu0  ;;  %v5457_v9 = vld [vmem:[#allocation59_spill] sm:$0xff] }
 0x217   :  { %v1198_v13 = vadd.f32 %v1058_v10, %v5454_v42  ;;  %v1062_v34 = vpop.f32.mrb[35].mxu1  ;;  %v2932_v1 = vpop.f32.mrb[35].mxu0  ;;  %v5458_v40 = vld [vmem:[#allocation61_spill] sm:$0xff] }
 0x218   :  { %v1199_v18 = vadd.f32 %v1060_v39, %v5455_v11 }
 0x219   :  { %v2688_v20 = vmul.f32 -1.442695, %v1198_v13 }
 0x21a   :  { %v2689_v21 = vmul.f32 -1.442695, %v1199_v18 }
 0x21b   :  { %3307 = vpow2.f32 %v2688_v20 }
 0x21c   :  { %3309 = vpow2.f32 %v2689_v21 }
 0x225   :  { %v3308_v41 = vpop.eup %3307 }
 0x226   :  { %v1206_v29 = vadd.f32 1.0, %v3308_v41  ;;  %v3310_v22 = vpop.eup %3309 }
 0x227   :  { %v1207_v23 = vadd.f32 1.0, %v3310_v22 }
 0x228   :  { %3311 = vrcp.f32 %v1206_v29 }
 0x229   :  { %3313 = vrcp.f32 %v1207_v23 }
 0x232   :  { %v3312_v26 = vpop.eup %3311 }
 0x233   :  { %v1212_v12 = vmul.f32 %v3312_v26, %v1099_v24  ;;  %v3314_v34 = vpop.eup %3313 }
 0x234   :  { %v1139_v5 = vpop.f32.mrb[36].mxu1  ;;  %v1180_v27 = vpop.f32.mrb[36].mxu0  ;;  %v1215_v11 = vsub.f32 1.0, %v3314_v34  ;;  %v1217_v21 = vmul.f32 %v3314_v34, %v4228_v38 }
 0x235   :  { %v1213_v33 = vadd.f32 %v1212_v12, %v5456_v30  ;;  %v1140_v37 = vadd.f32 %v1139_v5, %v4209_v28  ;;  %v1141_v6 = vpop.f32.mrb[37].mxu1  ;;  %v2951_v16 = vpop.f32.mrb[37].mxu0  ;;  %v4465_v5 = vld [vmem:[%s5313_s3 + $0x48] ss:$12 sps:$4 sm:$0xff]   ;;  %v4477_v30 = vld [vmem:[%s5313_s3 + $0x64] ss:$12 sps:$4 sm:$0xff]  }
 0x236   :  { %v1142_v8 = vadd.f32 %v1141_v6, %v4212_v25  ;;  %v1143_v10 = vpop.f32.mrb[38].mxu1  ;;  %v1183_v35 = vpop.f32.mrb[38].mxu0  ;;  %5460 = vst [vmem:[#allocation3_spill] sm:$0xff] %v4477_v30  ;;  %v4496_v6 = vld [vmem:[%s5313_s3 + $0x7c] ss:$12 sps:$4 sm:$0xff]  }
 0x237   :  { %3315 = vtanh.f32 %v1213_v33  ;;  %v1219_v39 = vadd.f32 %v1140_v37, %v5457_v9  ;;  %v1144_v14 = vpop.f32.mrb[39].mxu1  ;;  %v2952_v43 = vpop.f32.mrb[39].mxu0  ;;  %v4484_v33 = vld [vmem:[%s5313_s3 + $0x60] ss:$12 sps:$4 sm:$0xff]   ;;  %v4490_v37 = vld [vmem:[%s5313_s3 + $0x68] ss:$12 sps:$4 sm:$0xff]  }
 0x238   :  { %v1220_v42 = vadd.f32 %v1142_v8, %v5458_v40  ;;  %5461 = vst [vmem:[#allocation5_spill] sm:$0xff] %v4484_v33  ;;  %5462 = vst [vmem:[#allocation4_spill] sm:$0xff] %v4490_v37  ;;  %v4503_v16 = vld [vmem:[%s5313_s3 + $0x78] ss:$12 sps:$4 sm:$0xff]   ;;  %v4509_v8 = vld [vmem:[%s5313_s3 + $0x80] ss:$12 sps:$4 sm:$0xff]  }
 0x239   :  { %v2690_v13 = vmul.f32 -1.442695, %v1219_v39  ;;  %5463 = vst [vmem:[#allocation6_spill] sm:$0xff] %v4496_v6  ;;  %5464 = vst [vmem:[#allocation8_spill] sm:$0xff] %v4503_v16  ;;  %v4515_v10 = vld [vmem:[%s5313_s3 + $0x94] ss:$12 sps:$4 sm:$0xff]  }
 0x23a   :  { %v2691_v1 = vmul.f32 -1.442695, %v1220_v42  ;;  %5465 = vst [vmem:[#allocation7_spill] sm:$0xff] %v4509_v8  ;;  %5466 = vst [vmem:[#allocation9_spill] sm:$0xff] %v4515_v10  ;;  %v4522_v35 = vld [vmem:[%s5313_s3 + $0x90] ss:$12 sps:$4 sm:$0xff]  }
 0x23b   :  { %3317 = vpow2.f32 %v2690_v13  ;;  %5467 = vst [vmem:[#allocation11_spill] sm:$0xff] %v4522_v35  ;;  %v4528_v9 = vld [vmem:[%s5313_s3 + $0x98] ss:$12 sps:$4 sm:$0xff]   ;;  %v4541_v14 = vld [vmem:[%s5313_s3 + $0xa8] ss:$12 sps:$4 sm:$0xff]  }
 0x23c   :  { %3319 = vpow2.f32 %v2691_v1  ;;  %5468 = vst [vmem:[#allocation10_spill] sm:$0xff] %v4528_v9  ;;  %v4534_v39 = vld [vmem:[%s5313_s3 + $0xac] ss:$12 sps:$4 sm:$0xff]   ;;  %5470 = vst [vmem:[#allocation14_spill] sm:$0xff] %v4541_v14  ;;  %v4547_v43 = vld [vmem:[%s5313_s3 + $0xb0] ss:$12 sps:$4 sm:$0xff]  }
 0x23d   :  { %5469 = vst [vmem:[#allocation12_spill] sm:$0xff] %v4534_v39  ;;  %5471 = vst [vmem:[#allocation13_spill] sm:$0xff] %v4547_v43  ;;  %v4553_v40 = vld [vmem:[%s5314_s4 + $0x4] ss:$12 sps:$4 sm:$0xff]  }
 0x23e   :  { %5472 = vst [vmem:[#allocation15_spill] sm:$0xff] %v4553_v40 }
 0x241   :  { %v3316_v18 = vpop.eup %3315 }
 0x242   :  { %v1216_v20 = vmul.f32 %v3316_v18, %v1215_v11 }
 0x244   :  { %v1218_v41 = vadd.f32 %v1217_v21, %v1216_v20 }
 0x245   :  { %v3318_v29 = vpop.eup %3317 }
 0x246   :  { %v1227_v22 = vadd.f32 1.0, %v3318_v29  ;;  %v1242_v23 = vsel %vm1240_vm6, %v1218_v41, 0.0  ;;  %v4339_v24 = vsel %vm1240_vm6, %v1218_v41, %v4228_v38  ;;  %v3320_v38 = vpop.eup %3319  ;;  %v5473_v41 = vld [vmem:[#allocation30_spill] sm:$0xff] }
 0x247   :  { %2692 = vst [vmem:[%s5318_s7 + $0x10] sm:$0xff] %v1242_v23  ;;  %v1250_v26 = vpack.c.bf16 %v4339_v24, %v4339_v24  ;;  %v1228_v12 = vadd.f32 1.0, %v3320_v38 }
 0x248   :  { %3321 = vrcp.f32 %v1227_v22 }
 0x249   :  { %1284 = vmatmul.mubr.bf16.vlgmr.msra.gmra.mrb[40].mxu1 %v1250_v26  ;;  %2970 = vmatmul.mubr.bf16.vlgmr.msra.gmra.mrb[40].mxu0 %v1250_v26  ;;  %3323 = vrcp.f32 %v1228_v12  ;;  %v5474_v26 = vld [vmem:[#allocation32_spill] sm:$0xff] }
 0x24a   :  { %1334 = vmatpush1.bf16.msra.mxu1 %v3839_v44  ;;  %2974 = vmatpush3.bf16.msra.mxu0 %v3851_v46  ;;  %v1181_v44 = vadd.f32 %v1180_v27, %v4239_v7  ;;  %v4471_v27 = vld [vmem:[%s5313_s3 + $0x50] ss:$12 sps:$4 sm:$0xff]  }
 0x24b   :  { %1335 = vmatprep.subr.bf16.mxu1 %v3845_v45  ;;  %2975 = vmatprep.subr.bf16.mxu0 %v5434_v4 }
 0x24c   :  { %1365 = vmatprep.mubr.bf16.mxu1 %v5435_v32  ;;  %2989 = vmatprep.mubr.msk.bf16.mxu0 %vm3545_vm1, %v5434_v4 }
 0x24e   :  { %1336 = vmatpush1.bf16.msra.mxu1 %v3859_v47  ;;  %2976 = vmatpush3.bf16.msra.mxu0 %v3873_v49  ;;  %v5459_v47 = vld [vmem:[#allocation62_spill] sm:$0xff] }
 0x24f   :  { %1337 = vmatprep.subr.bf16.mxu1 %v3866_v48  ;;  %2977 = vmatprep.subr.bf16.mxu0 %v5434_v4 }
 0x252   :  { %v3322_v45 = vpop.eup %3321  ;;  %1338 = vmatpush1.bf16.msra.mxu1 %v3882_v50  ;;  %2978 = vmatpush3.bf16.msra.mxu0 %v3894_v52 }
 0x253   :  { %v1233_v46 = vmul.f32 %v3322_v45, %v1181_v44  ;;  %1339 = vmatprep.subr.bf16.mxu1 %v3888_v51  ;;  %2979 = vmatprep.subr.bf16.mxu0 %v5434_v4  ;;  %v3324_v48 = vpop.eup %3323 }
 0x254   :  { %v1236_v50 = vsub.f32 1.0, %v3324_v48 }
 0x255   :  { %v1234_v49 = vadd.f32 %v1233_v46, %v5459_v47 }
 0x256   :  { %1340 = vmatpush1.bf16.msra.mxu1 %v3901_v53  ;;  %2980 = vmatpush3.bf16.msra.mxu0 %v3913_v55  ;;  %v1238_v53 = vmul.f32 %v3324_v48, %v4278_v19 }
 0x257   :  { %3325 = vtanh.f32 %v1234_v49  ;;  %1341 = vmatprep.subr.bf16.mxu1 %v3907_v54  ;;  %2981 = vmatprep.subr.bf16.mxu0 %v5434_v4 }
 0x25a   :  { %1342 = vmatpush1.bf16.msra.mxu1 %v3920_v56  ;;  %2982 = vmatpush3.bf16.msra.mxu0 %v3932_v58  ;;  %v4398_v58 = vld [vmem:[%s5313_s3 + $0x4] ss:$12 sps:$4 sm:$0xff]  }
 0x25b   :  { %1343 = vmatprep.subr.bf16.mxu1 %v3926_v57  ;;  %2983 = vmatprep.subr.bf16.mxu0 %v5434_v4 }
 0x25e   :  { %1344 = vmatpush1.bf16.msra.mxu1 %v3939_v59  ;;  %2984 = vmatpush3.bf16.msra.mxu0 %v3951_v61  ;;  %v4405_v59 = vld [vmem:[%s5313_s3] ss:$12 sps:$4 sm:$0xff]   ;;  %v4417_v61 = vld [vmem:[%s5313_s3 + $0x1c] ss:$12 sps:$4 sm:$0xff]  }
 0x25f   :  { %1345 = vmatprep.subr.bf16.mxu1 %v3945_v60  ;;  %2985 = vmatprep.subr.bf16.mxu0 %v5434_v4  ;;  %v4411_v60 = vld [vmem:[%s5313_s3 + $0x8] ss:$12 sps:$4 sm:$0xff]  }
 0x261   :  { %v3326_v51 = vpop.eup %3325 }
 0x262   :  { %1346 = vmatpush1.bf16.msra.mxu1 %v3958_v62  ;;  %2986 = vmatpush3.bf16.msra.mxu0 %v3970_v0  ;;  %v1237_v52 = vmul.f32 %v3326_v51, %v1236_v50  ;;  %v4427_v62 = vld [vmem:[%s5313_s3 + $0x18] ss:$12 sps:$4 sm:$0xff]   ;;  %v4439_v0 = vld [vmem:[%s5313_s3 + $0x34] ss:$12 sps:$4 sm:$0xff]  }
 0x263   :  { %1347 = vmatprep.subr.bf16.mxu1 %v3964_v63  ;;  %2987 = vmatprep.subr.bf16.mxu0 %v5434_v4  ;;  %v4433_v63 = vld [vmem:[%s5313_s3 + $0x20] ss:$12 sps:$4 sm:$0xff]  }
 0x264   :  { %v1239_v54 = vadd.f32 %v1238_v53, %v1237_v52 }
 0x266   :  { %1348 = vmatpush1.bf16.msra.mxu1 %v3977_v2  ;;  %2988 = vmatpush3.bf16.msra.mxu0 %v3984_v3  ;;  %v1245_v55 = vsel %vm1241_vm7, %v1239_v54, 0.0  ;;  %v4388_v56 = vsel %vm1241_vm7, %v1239_v54, %v4278_v19  ;;  %v4446_v2 = vld [vmem:[%s5313_s3 + $0x30] ss:$12 sps:$4 sm:$0xff]   ;;  %v4452_v3 = vld [vmem:[%s5313_s3 + $0x38] ss:$12 sps:$4 sm:$0xff]  }
 0x267   :  { %2693 = vst [vmem:[%s5318_s7 + $0x68] sm:$0xff] %v1245_v55  ;;  %v1332_v57 = vpack.c.bf16 %v4388_v56, %v4388_v56  ;;  %1479 = vmatprep.subr.bf16.mxu1 %v4398_v58  ;;  %2993 = vmatprep.subr.bf16.mxu0 %v5434_v4  ;;  %v4458_v19 = vld [vmem:[%s5313_s3 + $0x4c] ss:$12 sps:$4 sm:$0xff]  }
 0x268   :  { %v5475_v54 = vld [vmem:[#allocation42_spill] sm:$0xff] }
 0x269   :  { %1366 = vmatmul.mubr.bf16.vlgmr.msra.gmra.mrb[44].mxu1 %v1332_v57  ;;  %2990 = vmatmul.mubr.bf16.vlgmr.msra.gmra.mrb[44].mxu0 %v1332_v57 }
 0x26a   :  { %1480 = vmatpush1.bf16.msra.mxu1 %v4405_v59  ;;  %2994 = vmatpush3.bf16.msra.mxu0 %v4411_v60 }
 0x26b   :  { %1481 = vmatprep.subr.bf16.mxu1 %v4417_v61  ;;  %2995 = vmatprep.subr.bf16.mxu0 %v5434_v4 }
 0x26c   :  { %1511 = vmatprep.mubr.bf16.mxu1 %v5435_v32  ;;  %3009 = vmatprep.mubr.msk.bf16.mxu0 %vm3545_vm1, %v5434_v4 }
 0x26e   :  { %1482 = vmatpush1.bf16.msra.mxu1 %v4427_v62  ;;  %2996 = vmatpush3.bf16.msra.mxu0 %v4433_v63 }
 0x26f   :  { %1483 = vmatprep.subr.bf16.mxu1 %v4439_v0  ;;  %2997 = vmatprep.subr.bf16.mxu0 %v5434_v4 }
 0x272   :  { %1484 = vmatpush1.bf16.msra.mxu1 %v4446_v2  ;;  %2998 = vmatpush3.bf16.msra.mxu0 %v4452_v3 }
 0x273   :  { %1485 = vmatprep.subr.bf16.mxu1 %v4458_v19  ;;  %2999 = vmatprep.subr.bf16.mxu0 %v5434_v4 }
 0x276   :  { %1486 = vmatpush1.bf16.msra.mxu1 %v4465_v5  ;;  %3000 = vmatpush3.bf16.msra.mxu0 %v4471_v27 }
 0x277   :  { %1487 = vmatprep.subr.bf16.mxu1 %v4477_v30  ;;  %3001 = vmatprep.subr.bf16.mxu0 %v5434_v4 }
 0x27a   :  { %1488 = vmatpush1.bf16.msra.mxu1 %v4484_v33  ;;  %3002 = vmatpush3.bf16.msra.mxu0 %v4490_v37 }
 0x27b   :  { %1489 = vmatprep.subr.bf16.mxu1 %v4496_v6  ;;  %3003 = vmatprep.subr.bf16.mxu0 %v5434_v4 }
 0x27e   :  { %1490 = vmatpush1.bf16.msra.mxu1 %v4503_v16  ;;  %3004 = vmatpush3.bf16.msra.mxu0 %v4509_v8 }
 0x27f   :  { %1491 = vmatprep.subr.bf16.mxu1 %v4515_v10  ;;  %3005 = vmatprep.subr.bf16.mxu0 %v5434_v4 }
 0x282   :  { %1492 = vmatpush1.bf16.msra.mxu1 %v4522_v35  ;;  %3006 = vmatpush3.bf16.msra.mxu0 %v4528_v9 }
 0x283   :  { %1493 = vmatprep.subr.bf16.mxu1 %v4534_v39  ;;  %3007 = vmatprep.subr.bf16.mxu0 %v5434_v4 }
 0x286   :  { %1494 = vmatpush1.bf16.msra.mxu1 %v4541_v14  ;;  %3008 = vmatpush3.bf16.msra.mxu0 %v4547_v43 }
 0x287   :  { %1561 = vmatprep.subr.bf16.mxu1 %v4553_v40  ;;  %3013 = vmatprep.subr.bf16.mxu0 %v5434_v4 }
 0x31c   :  { %v1285_v42 = vpop.f32.mrb[40].mxu1  ;;  %v1326_v13 = vpop.f32.mrb[40].mxu0 }
 0x31d   :  { %v1286_v34 = vadd.f32 %v1285_v42, %v4188_v15  ;;  %v1287_v1 = vpop.f32.mrb[41].mxu1  ;;  %v2971_v11 = vpop.f32.mrb[41].mxu0  ;;  %v1327_v48 = vadd.f32 %v1326_v13, %v4202_v17 }
 0x31e   :  { %v1288_v18 = vadd.f32 %v1287_v1, %v4193_v36  ;;  %v1289_v20 = vpop.f32.mrb[42].mxu1  ;;  %v1329_v21 = vpop.f32.mrb[42].mxu0 }
 0x31f   :  { %v1426_v29 = vadd.f32 %v1286_v34, %v5473_v41  ;;  %v1290_v22 = vpop.f32.mrb[43].mxu1  ;;  %v2972_v23 = vpop.f32.mrb[43].mxu0  ;;  %v5476_v20 = vld [vmem:[#allocation54_spill] sm:$0xff] }
 0x320   :  { %v1427_v38 = vadd.f32 %v1288_v18, %v5474_v26 }
 0x321   :  { %v2694_v12 = vmul.f32 -1.442695, %v1426_v29  ;;  %v5477_v29 = vld [vmem:[#allocation56_spill] sm:$0xff] }
 0x322   :  { %v2695_v44 = vmul.f32 -1.442695, %v1427_v38 }
 0x323   :  { %3327 = vpow2.f32 %v2694_v12 }
 0x324   :  { %3329 = vpow2.f32 %v2695_v44 }
 0x32d   :  { %v3328_v45 = vpop.eup %3327 }
 0x32e   :  { %v1434_v46 = vadd.f32 1.0, %v3328_v45  ;;  %v3330_v47 = vpop.eup %3329 }
 0x32f   :  { %v1435_v49 = vadd.f32 1.0, %v3330_v47 }
 0x330   :  { %3331 = vrcp.f32 %v1434_v46 }
 0x331   :  { %3333 = vrcp.f32 %v1435_v49 }
 0x33a   :  { %v3332_v50 = vpop.eup %3331 }
 0x33b   :  { %v1440_v51 = vmul.f32 %v3332_v50, %v1327_v48  ;;  %v3334_v26 = vpop.eup %3333 }
 0x33c   :  { %v1367_v52 = vpop.f32.mrb[44].mxu1  ;;  %v1408_v53 = vpop.f32.mrb[44].mxu0  ;;  %v1443_v12 = vsub.f32 1.0, %v3334_v26  ;;  %v1445_v46 = vmul.f32 %v3334_v26, %v4339_v24  ;;  %v4652_v26 = vld [vmem:[%s5314_s4 + $0x50] ss:$12 sps:$4 sm:$0xff]  }
 0x33d   :  { %v1441_v55 = vadd.f32 %v1440_v51, %v5475_v54  ;;  %v1368_v57 = vadd.f32 %v1367_v52, %v4209_v28  ;;  %v1369_v42 = vpop.f32.mrb[45].mxu1  ;;  %v2991_v34 = vpop.f32.mrb[45].mxu0  ;;  %v4584_v54 = vld [vmem:[%s5314_s4] ss:$12 sps:$4 sm:$0xff]  }
 0x33e   :  { %v1370_v1 = vadd.f32 %v1369_v42, %v4212_v25  ;;  %v1371_v11 = vpop.f32.mrb[46].mxu1  ;;  %v1411_v18 = vpop.f32.mrb[46].mxu0  ;;  %v4606_v42 = vld [vmem:[%s5314_s4 + $0x18] ss:$12 sps:$4 sm:$0xff]   ;;  %v4612_v34 = vld [vmem:[%s5314_s4 + $0x20] ss:$12 sps:$4 sm:$0xff]  }
 0x33f   :  { %3335 = vtanh.f32 %v1441_v55  ;;  %v1447_v21 = vadd.f32 %v1368_v57, %v5476_v20  ;;  %v1372_v41 = vpop.f32.mrb[47].mxu1  ;;  %v2992_v13 = vpop.f32.mrb[47].mxu0  ;;  %v4596_v55 = vld [vmem:[%s5314_s4 + $0x1c] ss:$12 sps:$4 sm:$0xff]   ;;  %v4618_v11 = vld [vmem:[%s5314_s4 + $0x34] ss:$12 sps:$4 sm:$0xff]   ;;  %v1409_v18 = vadd.f32 %v1408_v53, %v4239_v7 }
 0x340   :  { %v1448_v22 = vadd.f32 %v1370_v1, %v5477_v29  ;;  %v4632_v41 = vld [vmem:[%s5314_s4 + $0x38] ss:$12 sps:$4 sm:$0xff]   ;;  %v5478_v29 = vld [vmem:[#allocation57_spill] sm:$0xff] }
 0x341   :  { %v2696_v23 = vmul.f32 -1.442695, %v1447_v21  ;;  %v4626_v21 = vld [vmem:[%s5314_s4 + $0x30] ss:$12 sps:$4 sm:$0xff]   ;;  %v4638_v53 = vld [vmem:[%s5314_s4 + $0x4c] ss:$12 sps:$4 sm:$0xff]  }
 0x342   :  { %v2697_v38 = vmul.f32 -1.442695, %v1448_v22 }
 0x343   :  { %3337 = vpow2.f32 %v2696_v23  ;;  %v4646_v23 = vld [vmem:[%s5314_s4 + $0x48] ss:$12 sps:$4 sm:$0xff]  }
 0x344   :  { %3339 = vpow2.f32 %v2697_v38  ;;  %v4658_v38 = vld [vmem:[%s5314_s4 + $0x64] ss:$12 sps:$4 sm:$0xff]  }
 0x349   :  { %v3336_v44 = vpop.eup %3335 }
 0x34a   :  { %v1444_v45 = vmul.f32 %v3336_v44, %v1443_v12  ;;  %v4665_v12 = vld [vmem:[%s5314_s4 + $0x60] ss:$12 sps:$4 sm:$0xff]   ;;  %v4671_v44 = vld [vmem:[%s5314_s4 + $0x68] ss:$12 sps:$4 sm:$0xff]  }
 0x34c   :  { %v1446_v47 = vadd.f32 %v1445_v46, %v1444_v45  ;;  %v4677_v45 = vld [vmem:[%s5314_s4 + $0x7c] ss:$12 sps:$4 sm:$0xff]  }
 0x34d   :  { %v3338_v49 = vpop.eup %3337 }
 0x34e   :  { %v1455_v48 = vadd.f32 1.0, %v3338_v49  ;;  %v1470_v50 = vsel %vm1468_vm8, %v1446_v47, 0.0  ;;  %v4574_v51 = vsel %vm1468_vm8, %v1446_v47, %v4339_v24  ;;  %v4590_v24 = vld [vmem:[%s5314_s4 + $0x8] ss:$12 sps:$4 sm:$0xff]   ;;  %v3340_v57 = vpop.eup %3339  ;;  %v4684_v47 = vld [vmem:[%s5314_s4 + $0x78] ss:$12 sps:$4 sm:$0xff]  }
 0x34f   :  { %2698 = vst [vmem:[%s5318_s7 + $0x20] sm:$0xff] %v1470_v50  ;;  %v1478_v52 = vpack.c.bf16 %v4574_v51, %v4574_v51  ;;  %v1456_v1 = vadd.f32 1.0, %v3340_v57  ;;  %v4690_v49 = vld [vmem:[%s5314_s4 + $0x80] ss:$12 sps:$4 sm:$0xff]   ;;  %v4703_v57 = vld [vmem:[%s5314_s4 + $0x90] ss:$12 sps:$4 sm:$0xff]  }
 0x350   :  { %3341 = vrcp.f32 %v1455_v48  ;;  %v4696_v48 = vld [vmem:[%s5314_s4 + $0x94] ss:$12 sps:$4 sm:$0xff]  }
 0x351   :  { %1512 = vmatmul.mubr.bf16.vlgmr.msra.gmra.mrb[48].mxu1 %v1478_v52  ;;  %3010 = vmatmul.mubr.bf16.vlgmr.msra.gmra.mrb[48].mxu0 %v1478_v52  ;;  %3343 = vrcp.f32 %v1456_v1  ;;  %v4709_v1 = vld [vmem:[%s5314_s4 + $0x98] ss:$12 sps:$4 sm:$0xff]  }
 0x352   :  { %1562 = vmatpush1.bf16.msra.mxu1 %v4584_v54  ;;  %3014 = vmatpush3.bf16.msra.mxu0 %v4590_v24 }
 0x353   :  { %1563 = vmatprep.subr.bf16.mxu1 %v4596_v55  ;;  %3015 = vmatprep.subr.bf16.mxu0 %v5434_v4 }
 0x354   :  { %1593 = vmatprep.mubr.bf16.mxu1 %v5435_v32  ;;  %3029 = vmatprep.mubr.msk.bf16.mxu0 %vm3545_vm1, %v5434_v4 }
 0x356   :  { %1564 = vmatpush1.bf16.msra.mxu1 %v4606_v42  ;;  %3016 = vmatpush3.bf16.msra.mxu0 %v4612_v34 }
 0x357   :  { %1565 = vmatprep.subr.bf16.mxu1 %v4618_v11  ;;  %3017 = vmatprep.subr.bf16.mxu0 %v5434_v4 }
 0x35a   :  { %v3342_v20 = vpop.eup %3341  ;;  %1566 = vmatpush1.bf16.msra.mxu1 %v4626_v21  ;;  %3018 = vmatpush3.bf16.msra.mxu0 %v4632_v41 }
 0x35b   :  { %v1461_v13 = vmul.f32 %v3342_v20, %v1409_v18  ;;  %1567 = vmatprep.subr.bf16.mxu1 %v4638_v53  ;;  %3019 = vmatprep.subr.bf16.mxu0 %v5434_v4  ;;  %v3344_v46 = vpop.eup %3343 }
 0x35c   :  { %v1464_v50 = vsub.f32 1.0, %v3344_v46  ;;  %v1466_v20 = vmul.f32 %v3344_v46, %v4388_v56  ;;  %v4730_v46 = vld [vmem:[%s5314_s4 + $0xb0] ss:$12 sps:$4 sm:$0xff]  }
 0x35d   :  { %v1462_v22 = vadd.f32 %v1461_v13, %v5478_v29  ;;  %v4716_v13 = vld [vmem:[%s5314_s4 + $0xac] ss:$12 sps:$4 sm:$0xff]  }
 0x35e   :  { %1568 = vmatpush1.bf16.msra.mxu1 %v4646_v23  ;;  %3020 = vmatpush3.bf16.msra.mxu0 %v4652_v26 }
 0x35f   :  { %3345 = vtanh.f32 %v1462_v22  ;;  %1569 = vmatprep.subr.bf16.mxu1 %v4658_v38  ;;  %3021 = vmatprep.subr.bf16.mxu0 %v5434_v4  ;;  %v4724_v22 = vld [vmem:[%s5314_s4 + $0xa8] ss:$12 sps:$4 sm:$0xff]  }
 0x362   :  { %1570 = vmatpush1.bf16.msra.mxu1 %v4665_v12  ;;  %3022 = vmatpush3.bf16.msra.mxu0 %v4671_v44 }
 0x363   :  { %1571 = vmatprep.subr.bf16.mxu1 %v4677_v45  ;;  %3023 = vmatprep.subr.bf16.mxu0 %v5434_v4 }
 0x366   :  { %1572 = vmatpush1.bf16.msra.mxu1 %v4684_v47  ;;  %3024 = vmatpush3.bf16.msra.mxu0 %v4690_v49 }
 0x367   :  { %1573 = vmatprep.subr.bf16.mxu1 %v4696_v48  ;;  %3025 = vmatprep.subr.bf16.mxu0 %v5434_v4 }
 0x369   :  { %v3346_v52 = vpop.eup %3345 }
 0x36a   :  { %1574 = vmatpush1.bf16.msra.mxu1 %v4703_v57  ;;  %3026 = vmatpush3.bf16.msra.mxu0 %v4709_v1  ;;  %v1465_v18 = vmul.f32 %v3346_v52, %v1464_v50 }
 0x36b   :  { %1575 = vmatprep.subr.bf16.mxu1 %v4716_v13  ;;  %3027 = vmatprep.subr.bf16.mxu0 %v5434_v4 }
 0x36c   :  { %v1467_v29 = vadd.f32 %v1466_v20, %v1465_v18 }
 0x36e   :  { %1576 = vmatpush1.bf16.msra.mxu1 %v4724_v22  ;;  %3028 = vmatpush3.bf16.msra.mxu0 %v4730_v46  ;;  %v1473_v50 = vsel %vm1469_vm9, %v1467_v29, 0.0  ;;  %v4738_v52 = vsel %vm1469_vm9, %v1467_v29, %v4388_v56 }
 0x36f   :  { %2699 = vst [vmem:[%s5318_s7 + $0x58] sm:$0xff] %v1473_v50  ;;  %v1560_v18 = vpack.c.bf16 %v4738_v52, %v4738_v52  ;;  %1707 = vmatprep.subr.bf16.mxu1 %v4398_v58  ;;  %3033 = vmatprep.subr.bf16.mxu0 %v5434_v4 }
 0x371   :  { %1594 = vmatmul.mubr.bf16.vlgmr.msra.gmra.mrb[52].mxu1 %v1560_v18  ;;  %3030 = vmatmul.mubr.bf16.vlgmr.msra.gmra.mrb[52].mxu0 %v1560_v18 }
 0x372   :  { %1708 = vmatpush1.bf16.msra.mxu1 %v4405_v59  ;;  %3034 = vmatpush3.bf16.msra.mxu0 %v4411_v60 }
 0x373   :  { %1709 = vmatprep.subr.bf16.mxu1 %v4417_v61  ;;  %3035 = vmatprep.subr.bf16.mxu0 %v5434_v4 }
 0x374   :  { %1739 = vmatprep.mubr.bf16.mxu1 %v5435_v32  ;;  %3049 = vmatprep.mubr.msk.bf16.mxu0 %vm3545_vm1, %v5434_v4 }
 0x376   :  { %1710 = vmatpush1.bf16.msra.mxu1 %v4427_v62  ;;  %3036 = vmatpush3.bf16.msra.mxu0 %v4433_v63 }
 0x377   :  { %1711 = vmatprep.subr.bf16.mxu1 %v4439_v0  ;;  %3037 = vmatprep.subr.bf16.mxu0 %v5434_v4 }
 0x37a   :  { %1712 = vmatpush1.bf16.msra.mxu1 %v4446_v2  ;;  %3038 = vmatpush3.bf16.msra.mxu0 %v4452_v3 }
 0x37b   :  { %1713 = vmatprep.subr.bf16.mxu1 %v4458_v19  ;;  %3039 = vmatprep.subr.bf16.mxu0 %v5434_v4 }
 0x37e   :  { %1714 = vmatpush1.bf16.msra.mxu1 %v4465_v5  ;;  %3040 = vmatpush3.bf16.msra.mxu0 %v4471_v27 }
 0x37f   :  { %1715 = vmatprep.subr.bf16.mxu1 %v4477_v30  ;;  %3041 = vmatprep.subr.bf16.mxu0 %v5434_v4 }
 0x382   :  { %1716 = vmatpush1.bf16.msra.mxu1 %v4484_v33  ;;  %3042 = vmatpush3.bf16.msra.mxu0 %v4490_v37 }
 0x383   :  { %1717 = vmatprep.subr.bf16.mxu1 %v4496_v6  ;;  %3043 = vmatprep.subr.bf16.mxu0 %v5434_v4  ;;  %v5480_v6 = vld [vmem:[#allocation34_spill] sm:$0xff] }
 0x386   :  { %1718 = vmatpush1.bf16.msra.mxu1 %v4503_v16  ;;  %3044 = vmatpush3.bf16.msra.mxu0 %v4509_v8 }
 0x387   :  { %1719 = vmatprep.subr.bf16.mxu1 %v4515_v10  ;;  %3045 = vmatprep.subr.bf16.mxu0 %v5434_v4  ;;  %v5479_v10 = vld [vmem:[#allocation33_spill] sm:$0xff] }
 0x38a   :  { %1720 = vmatpush1.bf16.msra.mxu1 %v4522_v35  ;;  %3046 = vmatpush3.bf16.msra.mxu0 %v4528_v9 }
 0x38b   :  { %1721 = vmatprep.subr.bf16.mxu1 %v4534_v39  ;;  %3047 = vmatprep.subr.bf16.mxu0 %v5434_v4 }
 0x38e   :  { %1722 = vmatpush1.bf16.msra.mxu1 %v4541_v14  ;;  %3048 = vmatpush3.bf16.msra.mxu0 %v4547_v43 }
 0x38f   :  { %1789 = vmatprep.subr.bf16.mxu1 %v4553_v40  ;;  %3053 = vmatprep.subr.bf16.mxu0 %v5434_v4 }
 0x424   :  { %v1513_v56 = vpop.f32.mrb[48].mxu1  ;;  %v1554_v20 = vpop.f32.mrb[48].mxu0 }
 0x425   :  { %v1514_v29 = vadd.f32 %v1513_v56, %v4188_v15  ;;  %v1515_v50 = vpop.f32.mrb[49].mxu1  ;;  %v3011_v18 = vpop.f32.mrb[49].mxu0 }
 0x426   :  { %v1516_v9 = vadd.f32 %v1515_v50, %v4193_v36  ;;  %v1517_v35 = vpop.f32.mrb[50].mxu1  ;;  %v1557_v39 = vpop.f32.mrb[50].mxu0  ;;  %v1555_v18 = vadd.f32 %v1554_v20, %v4202_v17 }
 0x427   :  { %v1654_v8 = vadd.f32 %v1514_v29, %v5479_v10  ;;  %v1518_v16 = vpop.f32.mrb[51].mxu1  ;;  %v3012_v14 = vpop.f32.mrb[51].mxu0 }
 0x428   :  { %v1655_v43 = vadd.f32 %v1516_v9, %v5480_v6  ;;  %v5481_v16 = vld [vmem:[#allocation44_spill] sm:$0xff] }
 0x429   :  { %v2700_v37 = vmul.f32 -1.442695, %v1654_v8 }
 0x42a   :  { %v2701_v40 = vmul.f32 -1.442695, %v1655_v43 }
 0x42b   :  { %3347 = vpow2.f32 %v2700_v37 }
 0x42c   :  { %3349 = vpow2.f32 %v2701_v40 }
 0x435   :  { %v3348_v33 = vpop.eup %3347 }
 0x436   :  { %v1662_v30 = vadd.f32 1.0, %v3348_v33  ;;  %v3350_v56 = vpop.eup %3349 }
 0x437   :  { %v1663_v15 = vadd.f32 1.0, %v3350_v56  ;;  %v5483_v56 = vld [vmem:[#allocation53_spill] sm:$0xff] }
 0x438   :  { %3351 = vrcp.f32 %v1662_v30  ;;  %v5482_v30 = vld [vmem:[#allocation51_spill] sm:$0xff] }
 0x439   :  { %3353 = vrcp.f32 %v1663_v15 }
 0x442   :  { %v3352_v50 = vpop.eup %3351 }
 0x443   :  { %v1668_v35 = vmul.f32 %v3352_v50, %v1555_v18  ;;  %v3354_v50 = vpop.eup %3353 }
 0x444   :  { %v1595_v39 = vpop.f32.mrb[52].mxu1  ;;  %v1636_v10 = vpop.f32.mrb[52].mxu0 }
 0x445   :  { %v1669_v14 = vadd.f32 %v1668_v35, %v5481_v16  ;;  %v1596_v6 = vadd.f32 %v1595_v39, %v4209_v28  ;;  %v1597_v8 = vpop.f32.mrb[53].mxu1  ;;  %v3031_v37 = vpop.f32.mrb[53].mxu0  ;;  %v1671_v35 = vsub.f32 1.0, %v3354_v50 }
 0x446   :  { %v1598_v9 = vadd.f32 %v1597_v8, %v4212_v25  ;;  %v1599_v43 = vpop.f32.mrb[54].mxu1  ;;  %v1639_v33 = vpop.f32.mrb[54].mxu0  ;;  %v1673_v37 = vmul.f32 %v3354_v50, %v4574_v51 }
 0x447   :  { %3355 = vtanh.f32 %v1669_v14  ;;  %v1675_v40 = vadd.f32 %v1596_v6, %v5482_v30  ;;  %v1600_v29 = vpop.f32.mrb[55].mxu1  ;;  %v3032_v20 = vpop.f32.mrb[55].mxu0  ;;  %v1637_v30 = vadd.f32 %v1636_v10, %v4239_v7 }
 0x448   :  { %v1676_v18 = vadd.f32 %v1598_v9, %v5483_v56  ;;  %v5484_v20 = vld [vmem:[#allocation55_spill] sm:$0xff] }
 0x449   :  { %v2702_v15 = vmul.f32 -1.442695, %v1675_v40 }
 0x44a   :  { %v2703_v17 = vmul.f32 -1.442695, %v1676_v18 }
 0x44b   :  { %3357 = vpow2.f32 %v2702_v15 }
 0x44c   :  { %3359 = vpow2.f32 %v2703_v17 }
 0x451   :  { %v3356_v16 = vpop.eup %3355 }
 0x452   :  { %v1672_v39 = vmul.f32 %v3356_v16, %v1671_v35 }
 0x454   :  { %v1674_v8 = vadd.f32 %v1673_v37, %v1672_v39 }
 0x455   :  { %v3358_v43 = vpop.eup %3357 }
 0x456   :  { %v1683_v14 = vadd.f32 1.0, %v3358_v43  ;;  %v1698_v6 = vsel %vm1696_vm10, %v1674_v8, 0.0  ;;  %v4799_v9 = vsel %vm1696_vm10, %v1674_v8, %v4574_v51  ;;  %v3360_v51 = vpop.eup %3359  ;;  %v5486_v43 = vld [vmem:[#allocation5_spill] sm:$0xff] }
 0x457   :  { %2704 = vst [vmem:[%s5318_s7 + $0x30] sm:$0xff] %v1698_v6  ;;  %v1706_v17 = vpack.c.bf16 %v4799_v9, %v4799_v9  ;;  %v1684_v33 = vadd.f32 1.0, %v3360_v51  ;;  %v5488_v6 = vld [vmem:[#allocation6_spill] sm:$0xff]  ;;  %v5490_v51 = vld [vmem:[#allocation7_spill] sm:$0xff] }
 0x458   :  { %3361 = vrcp.f32 %v1683_v14  ;;  %v5487_v14 = vld [vmem:[#allocation4_spill] sm:$0xff] }
 0x459   :  { %1740 = vmatmul.mubr.bf16.vlgmr.msra.gmra.mrb[56].mxu1 %v1706_v17  ;;  %3050 = vmatmul.mubr.bf16.vlgmr.msra.gmra.mrb[56].mxu0 %v1706_v17  ;;  %3363 = vrcp.f32 %v1684_v33  ;;  %v5489_v17 = vld [vmem:[#allocation8_spill] sm:$0xff]  ;;  %v5491_v33 = vld [vmem:[#allocation9_spill] sm:$0xff] }
 0x45a   :  { %1790 = vmatpush1.bf16.msra.mxu1 %v4584_v54  ;;  %3054 = vmatpush3.bf16.msra.mxu0 %v4590_v24 }
 0x45b   :  { %1791 = vmatprep.subr.bf16.mxu1 %v4596_v55  ;;  %3055 = vmatprep.subr.bf16.mxu0 %v5434_v4 }
 0x45c   :  { %1821 = vmatprep.mubr.bf16.mxu1 %v5435_v32  ;;  %3069 = vmatprep.mubr.msk.bf16.mxu0 %vm3545_vm1, %v5434_v4 }
 0x45e   :  { %1792 = vmatpush1.bf16.msra.mxu1 %v4606_v42  ;;  %3056 = vmatpush3.bf16.msra.mxu0 %v4612_v34 }
 0x45f   :  { %1793 = vmatprep.subr.bf16.mxu1 %v4618_v11  ;;  %3057 = vmatprep.subr.bf16.mxu0 %v5434_v4 }
 0x462   :  { %v3362_v40 = vpop.eup %3361  ;;  %1794 = vmatpush1.bf16.msra.mxu1 %v4626_v21  ;;  %3058 = vmatpush3.bf16.msra.mxu0 %v4632_v41 }
 0x463   :  { %v1689_v29 = vmul.f32 %v3362_v40, %v1637_v30  ;;  %1795 = vmatprep.subr.bf16.mxu1 %v4638_v53  ;;  %3059 = vmatprep.subr.bf16.mxu0 %v5434_v4  ;;  %v3364_v10 = vpop.eup %3363  ;;  %v5492_v30 = vld [vmem:[#allocation11_spill] sm:$0xff]  ;;  %v5493_v40 = vld [vmem:[#allocation10_spill] sm:$0xff] }
 0x464   :  { %v1692_v18 = vsub.f32 1.0, %v3364_v10  ;;  %v1694_v35 = vmul.f32 %v3364_v10, %v4738_v52  ;;  %v5497_v10 = vld [vmem:[#allocation15_spill] sm:$0xff] }
 0x465   :  { %v1690_v56 = vadd.f32 %v1689_v29, %v5484_v20  ;;  %v5494_v29 = vld [vmem:[#allocation12_spill] sm:$0xff]  ;;  %v5495_v20 = vld [vmem:[#allocation14_spill] sm:$0xff] }
 0x466   :  { %1796 = vmatpush1.bf16.msra.mxu1 %v4646_v23  ;;  %3060 = vmatpush3.bf16.msra.mxu0 %v4652_v26 }
 0x467   :  { %3365 = vtanh.f32 %v1690_v56  ;;  %1797 = vmatprep.subr.bf16.mxu1 %v4658_v38  ;;  %3061 = vmatprep.subr.bf16.mxu0 %v5434_v4  ;;  %v5496_v56 = vld [vmem:[#allocation13_spill] sm:$0xff] }
 0x46a   :  { %1798 = vmatpush1.bf16.msra.mxu1 %v4665_v12  ;;  %3062 = vmatpush3.bf16.msra.mxu0 %v4671_v44 }
 0x46b   :  { %1799 = vmatprep.subr.bf16.mxu1 %v4677_v45  ;;  %3063 = vmatprep.subr.bf16.mxu0 %v5434_v4 }
 0x46e   :  { %1800 = vmatpush1.bf16.msra.mxu1 %v4684_v47  ;;  %3064 = vmatpush3.bf16.msra.mxu0 %v4690_v49 }
 0x46f   :  { %1801 = vmatprep.subr.bf16.mxu1 %v4696_v48  ;;  %3065 = vmatprep.subr.bf16.mxu0 %v5434_v4 }
 0x471   :  { %v3366_v15 = vpop.eup %3365 }
 0x472   :  { %1802 = vmatpush1.bf16.msra.mxu1 %v4703_v57  ;;  %3066 = vmatpush3.bf16.msra.mxu0 %v4709_v1  ;;  %v1693_v50 = vmul.f32 %v3366_v15, %v1692_v18 }
 0x473   :  { %1803 = vmatprep.subr.bf16.mxu1 %v4716_v13  ;;  %3067 = vmatprep.subr.bf16.mxu0 %v5434_v4 }
 0x474   :  { %v1695_v16 = vadd.f32 %v1694_v35, %v1693_v50  ;;  %v5498_v50 = vld [vmem:[#allocation63_spill] sm:$0xff] }
 0x476   :  { %1804 = vmatpush1.bf16.msra.mxu1 %v4724_v22  ;;  %3068 = vmatpush3.bf16.msra.mxu0 %v4730_v46  ;;  %v1701_v39 = vsel %vm1697_vm11, %v1695_v16, 0.0  ;;  %v4848_v37 = vsel %vm1697_vm11, %v1695_v16, %v4738_v52  ;;  %v5485_v52 = vld [vmem:[#allocation3_spill] sm:$0xff] }
 0x477   :  { %2705 = vst [vmem:[%s5318_s7 + $0x48] sm:$0xff] %v1701_v39  ;;  %v1788_v8 = vpack.c.bf16 %v4848_v37, %v4848_v37  ;;  %1925 = vmatprep.subr.bf16.mxu1 %v4398_v58  ;;  %3073 = vmatprep.subr.bf16.mxu0 %v5434_v4 }
 0x479   :  { %1822 = vmatmul.mubr.bf16.vlgmr.msra.gmra.mrb[60].mxu1 %v1788_v8  ;;  %3070 = vmatmul.mubr.bf16.vlgmr.msra.gmra.mrb[60].mxu0 %v1788_v8 }
 0x47a   :  { %1926 = vmatpush1.bf16.msra.mxu1 %v4405_v59  ;;  %3074 = vmatpush3.bf16.msra.mxu0 %v4411_v60 }
 0x47b   :  { %1927 = vmatprep.subr.bf16.mxu1 %v4417_v61  ;;  %3075 = vmatprep.subr.bf16.mxu0 %v5434_v4 }
 0x47c   :  { %1957 = vmatprep.mubr.bf16.mxu1 %v5435_v32  ;;  %3089 = vmatprep.mubr.msk.bf16.mxu0 %vm3545_vm1, %v5434_v4 }
 0x47e   :  { %1928 = vmatpush1.bf16.msra.mxu1 %v4427_v62  ;;  %3076 = vmatpush3.bf16.msra.mxu0 %v4433_v63 }
 0x47f   :  { %1929 = vmatprep.subr.bf16.mxu1 %v4439_v0  ;;  %3077 = vmatprep.subr.bf16.mxu0 %v5434_v4 }
 0x482   :  { %1930 = vmatpush1.bf16.msra.mxu1 %v4446_v2  ;;  %3078 = vmatpush3.bf16.msra.mxu0 %v4452_v3 }
 0x483   :  { %1931 = vmatprep.subr.bf16.mxu1 %v4458_v19  ;;  %3079 = vmatprep.subr.bf16.mxu0 %v5434_v4 }
 0x486   :  { %1932 = vmatpush1.bf16.msra.mxu1 %v4465_v5  ;;  %3080 = vmatpush3.bf16.msra.mxu0 %v4471_v27 }
 0x487   :  { %1933 = vmatprep.subr.bf16.mxu1 %v5485_v52  ;;  %3081 = vmatprep.subr.bf16.mxu0 %v5434_v4 }
 0x48a   :  { %1934 = vmatpush1.bf16.msra.mxu1 %v5486_v43  ;;  %3082 = vmatpush3.bf16.msra.mxu0 %v5487_v14 }
 0x48b   :  { %1935 = vmatprep.subr.bf16.mxu1 %v5488_v6  ;;  %3083 = vmatprep.subr.bf16.mxu0 %v5434_v4 }
 0x48e   :  { %1936 = vmatpush1.bf16.msra.mxu1 %v5489_v17  ;;  %3084 = vmatpush3.bf16.msra.mxu0 %v5490_v51  ;;  %v5500_v17 = vld [vmem:[#allocation22_spill] sm:$0xff] }
 0x48f   :  { %1937 = vmatprep.subr.bf16.mxu1 %v5491_v33  ;;  %3085 = vmatprep.subr.bf16.mxu0 %v5434_v4 }
 0x492   :  { %1938 = vmatpush1.bf16.msra.mxu1 %v5492_v30  ;;  %3086 = vmatpush3.bf16.msra.mxu0 %v5493_v40  ;;  %v5499_v30 = vld [vmem:[#allocation21_spill] sm:$0xff] }
 0x493   :  { %1939 = vmatprep.subr.bf16.mxu1 %v5494_v29  ;;  %3087 = vmatprep.subr.bf16.mxu0 %v5434_v4 }
 0x496   :  { %1940 = vmatpush1.bf16.msra.mxu1 %v5495_v20  ;;  %3088 = vmatpush3.bf16.msra.mxu0 %v5496_v56 }
 0x497   :  { %2007 = vmatprep.subr.bf16.mxu1 %v5497_v10  ;;  %3093 = vmatprep.subr.bf16.mxu0 %v5434_v4 }
 0x52c   :  { %v1741_v18 = vpop.f32.mrb[56].mxu1  ;;  %v1782_v15 = vpop.f32.mrb[56].mxu0 }
 0x52d   :  { %v1742_v35 = vadd.f32 %v1741_v18, %v5498_v50  ;;  %v1743_v16 = vpop.f32.mrb[57].mxu1  ;;  %v3051_v39 = vpop.f32.mrb[57].mxu0 }
 0x52e   :  { %v1744_v8 = vadd.f32 %v1743_v16, %v4193_v36  ;;  %v1745_v40 = vpop.f32.mrb[58].mxu1  ;;  %v1785_v29 = vpop.f32.mrb[58].mxu0  ;;  %v5501_v39 = vld [vmem:[#allocation64_spill] sm:$0xff] }
 0x52f   :  { %v1876_v33 = vadd.f32 %v1742_v35, %v5499_v30  ;;  %v1746_v51 = vpop.f32.mrb[59].mxu1  ;;  %v3052_v20 = vpop.f32.mrb[59].mxu0  ;;  %v1783_v52 = vadd.f32 %v1782_v15, %v5501_v39 }
 0x530   :  { %v1877_v56 = vadd.f32 %v1744_v8, %v5500_v17  ;;  %v5502_v51 = vld [vmem:[#allocation50_spill] sm:$0xff] }
 0x531   :  { %v2706_v6 = vmul.f32 -1.442695, %v1876_v33 }
 0x532   :  { %v2707_v10 = vmul.f32 -1.442695, %v1877_v56 }
 0x533   :  { %3367 = vpow2.f32 %v2706_v6 }
 0x534   :  { %3369 = vpow2.f32 %v2707_v10 }
 0x53d   :  { %v3368_v14 = vpop.eup %3367 }
 0x53e   :  { %v1884_v43 = vadd.f32 1.0, %v3368_v14  ;;  %v3370_v18 = vpop.eup %3369 }
 0x53f   :  { %v1885_v50 = vadd.f32 1.0, %v3370_v18  ;;  %v5504_v18 = vld [vmem:[#allocation48_spill] sm:$0xff] }
 0x540   :  { %3371 = vrcp.f32 %v1884_v43  ;;  %v5503_v43 = vld [vmem:[#allocation46_spill] sm:$0xff] }
 0x541   :  { %3373 = vrcp.f32 %v1885_v50 }
 0x54a   :  { %v3372_v16 = vpop.eup %3371 }
 0x54b   :  { %v1890_v40 = vmul.f32 %v3372_v16, %v1783_v52  ;;  %v3374_v16 = vpop.eup %3373 }
 0x54c   :  { %v1823_v29 = vpop.f32.mrb[60].mxu1  ;;  %v1864_v30 = vpop.f32.mrb[60].mxu0 }
 0x54d   :  { %v1891_v20 = vadd.f32 %v1890_v40, %v5502_v51  ;;  %v1824_v17 = vadd.f32 %v1823_v29, %v4209_v28  ;;  %v1825_v33 = vpop.f32.mrb[61].mxu1  ;;  %v3071_v6 = vpop.f32.mrb[61].mxu0  ;;  %v1893_v40 = vsub.f32 1.0, %v3374_v16 }
 0x54e   :  { %v1826_v56 = vadd.f32 %v1825_v33, %v4212_v25  ;;  %v1827_v10 = vpop.f32.mrb[62].mxu1  ;;  %v1867_v14 = vpop.f32.mrb[62].mxu0  ;;  %v1895_v6 = vmul.f32 %v3374_v16, %v4799_v9 }
 0x54f   :  { %3375 = vtanh.f32 %v1891_v20  ;;  %v1897_v35 = vadd.f32 %v1824_v17, %v5503_v43  ;;  %v1828_v8 = vpop.f32.mrb[63].mxu1  ;;  %v3072_v15 = vpop.f32.mrb[63].mxu0  ;;  %v1865_v43 = vadd.f32 %v1864_v30, %v4239_v7 }
 0x550   :  { %v1898_v52 = vadd.f32 %v1826_v56, %v5504_v18  ;;  %v5505_v15 = vld [vmem:[#allocation49_spill] sm:$0xff] }
 0x551   :  { %v2708_v50 = vmul.f32 -1.442695, %v1897_v35 }
 0x552   :  { %v2709_v39 = vmul.f32 -1.442695, %v1898_v52 }
 0x553   :  { %3377 = vpow2.f32 %v2708_v50 }
 0x554   :  { %3379 = vpow2.f32 %v2709_v39 }
 0x559   :  { %v3376_v51 = vpop.eup %3375 }
 0x55a   :  { %v1894_v29 = vmul.f32 %v3376_v51, %v1893_v40 }
 0x55c   :  { %v1896_v33 = vadd.f32 %v1895_v6, %v1894_v29 }
 0x55d   :  { %v3378_v10 = vpop.eup %3377 }
 0x55e   :  { %v1905_v14 = vadd.f32 1.0, %v3378_v10  ;;  %v1918_v20 = vsel %vm1697_vm11, %v1896_v33, 0.0  ;;  %v4908_v17 = vsel %vm1697_vm11, %v1896_v33, %v4799_v9  ;;  %v3380_v9 = vpop.eup %3379 }
 0x55f   :  { %2710 = vst [vmem:[%s5318_s7 + $0x40] sm:$0xff] %v1918_v20  ;;  %v1924_v39 = vpack.c.bf16 %v4908_v17, %v4908_v17  ;;  %v1906_v56 = vadd.f32 1.0, %v3380_v9  ;;  %v5519_v20 = vld [vmem:[#allocation63_spill] sm:$0xff] }
 0x560   :  { %3381 = vrcp.f32 %v1905_v14 }
 0x561   :  { %1958 = vmatmul.mubr.bf16.vlgmr.msra.gmra.mrb[64].mxu1 %v1924_v39  ;;  %3090 = vmatmul.mubr.bf16.vlgmr.msra.gmra.mrb[64].mxu0 %v1924_v39  ;;  %3383 = vrcp.f32 %v1906_v56 }
 0x562   :  { %2008 = vmatpush1.bf16.msra.mxu1 %v4584_v54  ;;  %3094 = vmatpush3.bf16.msra.mxu0 %v4590_v24 }
 0x563   :  { %2009 = vmatprep.subr.bf16.mxu1 %v4596_v55  ;;  %3095 = vmatprep.subr.bf16.mxu0 %v5434_v4 }
 0x564   :  { %2039 = vmatprep.mubr.bf16.mxu1 %v5435_v32  ;;  %3109 = vmatprep.mubr.msk.bf16.mxu0 %vm3545_vm1, %v5434_v4 }
 0x566   :  { %2010 = vmatpush1.bf16.msra.mxu1 %v4606_v42  ;;  %3096 = vmatpush3.bf16.msra.mxu0 %v4612_v34 }
 0x567   :  { %2011 = vmatprep.subr.bf16.mxu1 %v4618_v11  ;;  %3097 = vmatprep.subr.bf16.mxu0 %v5434_v4 }
 0x56a   :  { %v3382_v35 = vpop.eup %3381  ;;  %2012 = vmatpush1.bf16.msra.mxu1 %v4626_v21  ;;  %3098 = vmatpush3.bf16.msra.mxu0 %v4632_v41 }
 0x56b   :  { %v1911_v8 = vmul.f32 %v3382_v35, %v1865_v43  ;;  %2013 = vmatprep.subr.bf16.mxu1 %v4638_v53  ;;  %3099 = vmatprep.subr.bf16.mxu0 %v5434_v4  ;;  %v3384_v30 = vpop.eup %3383 }
 0x56c   :  { %v1914_v52 = vsub.f32 1.0, %v3384_v30  ;;  %v1916_v40 = vmul.f32 %v3384_v30, %v4848_v37 }
 0x56d   :  { %v1912_v18 = vadd.f32 %v1911_v8, %v5505_v15  ;;  %v5520_v15 = vld [vmem:[#allocation23_spill] sm:$0xff] }
 0x56e   :  { %2014 = vmatpush1.bf16.msra.mxu1 %v4646_v23  ;;  %3100 = vmatpush3.bf16.msra.mxu0 %v4652_v26 }
 0x56f   :  { %3385 = vtanh.f32 %v1912_v18  ;;  %2015 = vmatprep.subr.bf16.mxu1 %v4658_v38  ;;  %3101 = vmatprep.subr.bf16.mxu0 %v5434_v4 }
 0x572   :  { %2016 = vmatpush1.bf16.msra.mxu1 %v4665_v12  ;;  %3102 = vmatpush3.bf16.msra.mxu0 %v4671_v44 }
 0x573   :  { %2017 = vmatprep.subr.bf16.mxu1 %v4677_v45  ;;  %3103 = vmatprep.subr.bf16.mxu0 %v5434_v4 }
 0x576   :  { %2018 = vmatpush1.bf16.msra.mxu1 %v4684_v47  ;;  %3104 = vmatpush3.bf16.msra.mxu0 %v4690_v49 }
 0x577   :  { %2019 = vmatprep.subr.bf16.mxu1 %v4696_v48  ;;  %3105 = vmatprep.subr.bf16.mxu0 %v5434_v4 }
 0x579   :  { %v3386_v50 = vpop.eup %3385 }
 0x57a   :  { %2020 = vmatpush1.bf16.msra.mxu1 %v4703_v57  ;;  %3106 = vmatpush3.bf16.msra.mxu0 %v4709_v1  ;;  %v1915_v16 = vmul.f32 %v3386_v50, %v1914_v52  ;;  %v5521_v50 = vld [vmem:[#allocation24_spill] sm:$0xff] }
 0x57b   :  { %2021 = vmatprep.subr.bf16.mxu1 %v4716_v13  ;;  %3107 = vmatprep.subr.bf16.mxu0 %v5434_v4 }
 0x57c   :  { %v1917_v51 = vadd.f32 %v1916_v40, %v1915_v16 }
 0x57e   :  { %2022 = vmatpush1.bf16.msra.mxu1 %v4724_v22  ;;  %3108 = vmatpush3.bf16.msra.mxu0 %v4730_v46  ;;  %v1920_v29 = vsel %vm1696_vm10, %v1917_v51, 0.0  ;;  %v4956_v6 = vsel %vm1696_vm10, %v1917_v51, %v4848_v37  ;;  %v5518_v37 = vld [vmem:[#allocation15_spill] sm:$0xff] }
 0x57f   :  { %2711 = vst [vmem:[%s5318_s7 + $0x38] sm:$0xff] %v1920_v29  ;;  %v2006_v33 = vpack.c.bf16 %v4956_v6, %v4956_v6  ;;  %2143 = vmatprep.subr.bf16.mxu1 %v4398_v58  ;;  %3113 = vmatprep.subr.bf16.mxu0 %v5434_v4  ;;  %v5506_v58 = vld [vmem:[#allocation3_spill] sm:$0xff] }
 0x581   :  { %2040 = vmatmul.mubr.bf16.vlgmr.msra.gmra.mrb[68].mxu1 %v2006_v33  ;;  %3110 = vmatmul.mubr.bf16.vlgmr.msra.gmra.mrb[68].mxu0 %v2006_v33 }
 0x582   :  { %2144 = vmatpush1.bf16.msra.mxu1 %v4405_v59  ;;  %3114 = vmatpush3.bf16.msra.mxu0 %v4411_v60  ;;  %v5507_v59 = vld [vmem:[#allocation5_spill] sm:$0xff]  ;;  %v5508_v60 = vld [vmem:[#allocation4_spill] sm:$0xff] }
 0x583   :  { %2145 = vmatprep.subr.bf16.mxu1 %v4417_v61  ;;  %3115 = vmatprep.subr.bf16.mxu0 %v5434_v4  ;;  %v5509_v61 = vld [vmem:[#allocation6_spill] sm:$0xff] }
 0x584   :  { %2175 = vmatprep.mubr.bf16.mxu1 %v5435_v32  ;;  %3129 = vmatprep.mubr.msk.bf16.mxu0 %vm3545_vm1, %v5434_v4 }
 0x586   :  { %2146 = vmatpush1.bf16.msra.mxu1 %v4427_v62  ;;  %3116 = vmatpush3.bf16.msra.mxu0 %v4433_v63  ;;  %v5510_v62 = vld [vmem:[#allocation8_spill] sm:$0xff]  ;;  %v5511_v63 = vld [vmem:[#allocation7_spill] sm:$0xff] }
 0x587   :  { %2147 = vmatprep.subr.bf16.mxu1 %v4439_v0  ;;  %3117 = vmatprep.subr.bf16.mxu0 %v5434_v4  ;;  %v5512_v0 = vld [vmem:[#allocation9_spill] sm:$0xff] }
 0x58a   :  { %2148 = vmatpush1.bf16.msra.mxu1 %v4446_v2  ;;  %3118 = vmatpush3.bf16.msra.mxu0 %v4452_v3  ;;  %v5513_v2 = vld [vmem:[#allocation11_spill] sm:$0xff]  ;;  %v5514_v3 = vld [vmem:[#allocation10_spill] sm:$0xff] }
 0x58b   :  { %2149 = vmatprep.subr.bf16.mxu1 %v4458_v19  ;;  %3119 = vmatprep.subr.bf16.mxu0 %v5434_v4  ;;  %v5515_v19 = vld [vmem:[#allocation12_spill] sm:$0xff] }
 0x58e   :  { %2150 = vmatpush1.bf16.msra.mxu1 %v4465_v5  ;;  %3120 = vmatpush3.bf16.msra.mxu0 %v4471_v27  ;;  %v5516_v5 = vld [vmem:[#allocation14_spill] sm:$0xff]  ;;  %v5517_v27 = vld [vmem:[#allocation13_spill] sm:$0xff] }
 0x58f   :  { %2151 = vmatprep.subr.bf16.mxu1 %v5506_v58  ;;  %3121 = vmatprep.subr.bf16.mxu0 %v5434_v4 }
 0x592   :  { %2152 = vmatpush1.bf16.msra.mxu1 %v5507_v59  ;;  %3122 = vmatpush3.bf16.msra.mxu0 %v5508_v60  ;;  %v5522_v60 = vld [vmem:[#allocation64_spill] sm:$0xff] }
 0x593   :  { %2153 = vmatprep.subr.bf16.mxu1 %v5509_v61  ;;  %3123 = vmatprep.subr.bf16.mxu0 %v5434_v4 }
 0x596   :  { %2154 = vmatpush1.bf16.msra.mxu1 %v5510_v62  ;;  %3124 = vmatpush3.bf16.msra.mxu0 %v5511_v63 }
 0x597   :  { %2155 = vmatprep.subr.bf16.mxu1 %v5512_v0  ;;  %3125 = vmatprep.subr.bf16.mxu0 %v5434_v4 }
 0x59a   :  { %2156 = vmatpush1.bf16.msra.mxu1 %v5513_v2  ;;  %3126 = vmatpush3.bf16.msra.mxu0 %v5514_v3  ;;  %v5523_v3 = vld [vmem:[#allocation52_spill] sm:$0xff] }
 0x59b   :  { %2157 = vmatprep.subr.bf16.mxu1 %v5515_v19  ;;  %3127 = vmatprep.subr.bf16.mxu0 %v5434_v4 }
 0x59e   :  { %2158 = vmatpush1.bf16.msra.mxu1 %v5516_v5  ;;  %3128 = vmatpush3.bf16.msra.mxu0 %v5517_v27 }
 0x59f   :  { %2225 = vmatprep.subr.bf16.mxu1 %v5518_v37  ;;  %3133 = vmatprep.subr.bf16.mxu0 %v5434_v4 }
 0x634   :  { %v1959_v10 = vpop.f32.mrb[64].mxu1  ;;  %v2000_v14 = vpop.f32.mrb[64].mxu0 }
 0x635   :  { %v1960_v39 = vadd.f32 %v1959_v10, %v5519_v20  ;;  %v1961_v9 = vpop.f32.mrb[65].mxu1  ;;  %v3091_v56 = vpop.f32.mrb[65].mxu0  ;;  %v2001_v61 = vadd.f32 %v2000_v14, %v5522_v60 }
 0x636   :  { %v1962_v43 = vadd.f32 %v1961_v9, %v4193_v36  ;;  %v1963_v35 = vpop.f32.mrb[66].mxu1  ;;  %v2003_v8 = vpop.f32.mrb[66].mxu0  ;;  %v5524_v56 = vld [vmem:[#allocation43_spill] sm:$0xff] }
 0x637   :  { %v2094_v18 = vadd.f32 %v1960_v39, %v5520_v15  ;;  %v1964_v30 = vpop.f32.mrb[67].mxu1  ;;  %v3092_v52 = vpop.f32.mrb[67].mxu0  ;;  %v5525_v8 = vld [vmem:[#allocation45_spill] sm:$0xff] }
 0x638   :  { %v2095_v16 = vadd.f32 %v1962_v43, %v5521_v50 }
 0x639   :  { %v2712_v40 = vmul.f32 -1.442695, %v2094_v18 }
 0x63a   :  { %v2713_v51 = vmul.f32 -1.442695, %v2095_v16 }
 0x63b   :  { %3387 = vpow2.f32 %v2712_v40 }
 0x63c   :  { %3389 = vpow2.f32 %v2713_v51 }
 0x645   :  { %v3388_v29 = vpop.eup %3387 }
 0x646   :  { %v2102_v33 = vadd.f32 1.0, %v3388_v29  ;;  %v3390_v58 = vpop.eup %3389 }
 0x647   :  { %v2103_v59 = vadd.f32 1.0, %v3390_v58 }
 0x648   :  { %3391 = vrcp.f32 %v2102_v33 }
 0x649   :  { %3393 = vrcp.f32 %v2103_v59 }
 0x652   :  { %v3392_v62 = vpop.eup %3391 }
 0x653   :  { %v2108_v63 = vmul.f32 %v3392_v62, %v2001_v61  ;;  %v3394_v30 = vpop.eup %3393 }
 0x654   :  { %v2041_v0 = vpop.f32.mrb[68].mxu1  ;;  %v2082_v2 = vpop.f32.mrb[68].mxu0  ;;  %v2111_v50 = vsub.f32 1.0, %v3394_v30  ;;  %v2113_v51 = vmul.f32 %v3394_v30, %v4908_v17 }
 0x655   :  { %v2109_v19 = vadd.f32 %v2108_v63, %v5523_v3  ;;  %v2042_v5 = vadd.f32 %v2041_v0, %v4209_v28  ;;  %v2043_v27 = vpop.f32.mrb[69].mxu1  ;;  %v3111_v37 = vpop.f32.mrb[69].mxu0  ;;  %v3505_v0 = vld [vmem:[%s5313_s3 + $0x48] ss:$12 sps:$4 sm:$0xff]   ;;  %v3507_v3 = vld [vmem:[%s5313_s3 + $0x64] ss:$12 sps:$4 sm:$0xff]  }
 0x656   :  { %v2044_v10 = vadd.f32 %v2043_v27, %v4212_v25  ;;  %v2045_v39 = vpop.f32.mrb[70].mxu1  ;;  %v2085_v9 = vpop.f32.mrb[70].mxu0  ;;  %v3510_v27 = vld [vmem:[%s5313_s3 + $0x7c] ss:$12 sps:$4 sm:$0xff]   ;;  %v3511_v37 = vld [vmem:[%s5313_s3 + $0x78] ss:$12 sps:$4 sm:$0xff]  }
 0x657   :  { %3395 = vtanh.f32 %v2109_v19  ;;  %v2115_v43 = vadd.f32 %v2042_v5, %v5524_v56  ;;  %v2046_v35 = vpop.f32.mrb[71].mxu1  ;;  %v3112_v14 = vpop.f32.mrb[71].mxu0  ;;  %v3508_v19 = vld [vmem:[%s5313_s3 + $0x60] ss:$12 sps:$4 sm:$0xff]   ;;  %v3509_v5 = vld [vmem:[%s5313_s3 + $0x68] ss:$12 sps:$4 sm:$0xff]  }
 0x658   :  { %v2116_v15 = vadd.f32 %v2044_v10, %v5525_v8  ;;  %v3512_v10 = vld [vmem:[%s5313_s3 + $0x80] ss:$12 sps:$4 sm:$0xff]   ;;  %v3514_v9 = vld [vmem:[%s5313_s3 + $0x90] ss:$12 sps:$4 sm:$0xff]   ;;  %v3515_v56 = vld [vmem:[%s5313_s3 + $0x98] ss:$12 sps:$4 sm:$0xff]  }
 0x659   :  { %v2714_v18 = vmul.f32 -1.442695, %v2115_v43  ;;  %v3513_v39 = vld [vmem:[%s5313_s3 + $0x94] ss:$12 sps:$4 sm:$0xff]   ;;  %v3516_v43 = vld [vmem:[%s5313_s3 + $0xac] ss:$12 sps:$4 sm:$0xff]  }
 0x65a   :  { %v2715_v52 = vmul.f32 -1.442695, %v2116_v15  ;;  %v3517_v35 = vld [vmem:[%s5313_s3 + $0xa8] ss:$12 sps:$4 sm:$0xff]   ;;  %v3518_v14 = vld [vmem:[%s5313_s3 + $0xb0] ss:$12 sps:$4 sm:$0xff]  }
 0x65b   :  { %3397 = vpow2.f32 %v2714_v18  ;;  %v3519_v8 = vld [vmem:[%s5314_s4 + $0x4] ss:$12 sps:$4 sm:$0xff]  }
 0x65c   :  { %3399 = vpow2.f32 %v2715_v52 }
 0x661   :  { %v3396_v16 = vpop.eup %3395 }
 0x662   :  { %v2112_v40 = vmul.f32 %v3396_v16, %v2111_v50 }
 0x664   :  { %v2114_v29 = vadd.f32 %v2113_v51, %v2112_v40 }
 0x665   :  { %v3398_v33 = vpop.eup %3397 }
 0x666   :  { %v2123_v58 = vadd.f32 1.0, %v3398_v33  ;;  %v2136_v59 = vsel %vm1469_vm9, %v2114_v29, 0.0  ;;  %v5016_v61 = vsel %vm1469_vm9, %v2114_v29, %v4908_v17  ;;  %v3400_v17 = vpop.eup %3399  ;;  %v5527_v29 = vld [vmem:[#allocation27_spill] sm:$0xff] }
 0x667   :  { %2716 = vst [vmem:[%s5318_s7 + $0x50] sm:$0xff] %v2136_v59  ;;  %v2142_v62 = vpack.c.bf16 %v5016_v61, %v5016_v61  ;;  %v2124_v63 = vadd.f32 1.0, %v3400_v17 }
 0x668   :  { %3401 = vrcp.f32 %v2123_v58 }
 0x669   :  { %2176 = vmatmul.mubr.bf16.vlgmr.msra.gmra.mrb[72].mxu1 %v2142_v62  ;;  %3130 = vmatmul.mubr.bf16.vlgmr.msra.gmra.mrb[72].mxu0 %v2142_v62  ;;  %3403 = vrcp.f32 %v2124_v63  ;;  %v5528_v62 = vld [vmem:[#allocation28_spill] sm:$0xff] }
 0x66a   :  { %2226 = vmatpush1.bf16.msra.mxu1 %v4584_v54  ;;  %3134 = vmatpush3.bf16.msra.mxu0 %v4590_v24  ;;  %v2083_v54 = vadd.f32 %v2082_v2, %v4239_v7  ;;  %v3506_v2 = vld [vmem:[%s5313_s3 + $0x50] ss:$12 sps:$4 sm:$0xff]  }
 0x66b   :  { %2227 = vmatprep.subr.bf16.mxu1 %v4596_v55  ;;  %3135 = vmatprep.subr.bf16.mxu0 %v5434_v4 }
 0x66c   :  { %2257 = vmatprep.mubr.bf16.mxu1 %v5435_v32  ;;  %3149 = vmatprep.mubr.msk.bf16.mxu0 %vm3545_vm1, %v5434_v4 }
 0x66e   :  { %2228 = vmatpush1.bf16.msra.mxu1 %v4606_v42  ;;  %3136 = vmatpush3.bf16.msra.mxu0 %v4612_v34  ;;  %v5526_v42 = vld [vmem:[#allocation47_spill] sm:$0xff] }
 0x66f   :  { %2229 = vmatprep.subr.bf16.mxu1 %v4618_v11  ;;  %3137 = vmatprep.subr.bf16.mxu0 %v5434_v4 }
 0x672   :  { %v3402_v24 = vpop.eup %3401  ;;  %2230 = vmatpush1.bf16.msra.mxu1 %v4626_v21  ;;  %3138 = vmatpush3.bf16.msra.mxu0 %v4632_v41 }
 0x673   :  { %v2129_v55 = vmul.f32 %v3402_v24, %v2083_v54  ;;  %2231 = vmatprep.subr.bf16.mxu1 %v4638_v53  ;;  %3139 = vmatprep.subr.bf16.mxu0 %v5434_v4  ;;  %v3404_v11 = vpop.eup %3403 }
 0x674   :  { %v2132_v21 = vsub.f32 1.0, %v3404_v11 }
 0x675   :  { %v2130_v34 = vadd.f32 %v2129_v55, %v5526_v42 }
 0x676   :  { %2232 = vmatpush1.bf16.msra.mxu1 %v4646_v23  ;;  %3140 = vmatpush3.bf16.msra.mxu0 %v4652_v26  ;;  %v2134_v23 = vmul.f32 %v3404_v11, %v4956_v6 }
 0x677   :  { %3405 = vtanh.f32 %v2130_v34  ;;  %2233 = vmatprep.subr.bf16.mxu1 %v4658_v38  ;;  %3141 = vmatprep.subr.bf16.mxu0 %v5434_v4 }
 0x67a   :  { %2234 = vmatpush1.bf16.msra.mxu1 %v4665_v12  ;;  %3142 = vmatpush3.bf16.msra.mxu0 %v4671_v44 }
 0x67b   :  { %2235 = vmatprep.subr.bf16.mxu1 %v4677_v45  ;;  %3143 = vmatprep.subr.bf16.mxu0 %v5434_v4  ;;  %v3495_v45 = vld [vmem:[%s5313_s3 + $0x4] ss:$12 sps:$4 sm:$0xff]  }
 0x67e   :  { %2236 = vmatpush1.bf16.msra.mxu1 %v4684_v47  ;;  %3144 = vmatpush3.bf16.msra.mxu0 %v4690_v49  ;;  %v3496_v47 = vld [vmem:[%s5313_s3] ss:$12 sps:$4 sm:$0xff]   ;;  %v3497_v49 = vld [vmem:[%s5313_s3 + $0x8] ss:$12 sps:$4 sm:$0xff]  }
 0x67f   :  { %2237 = vmatprep.subr.bf16.mxu1 %v4696_v48  ;;  %3145 = vmatprep.subr.bf16.mxu0 %v5434_v4  ;;  %v3498_v48 = vld [vmem:[%s5313_s3 + $0x1c] ss:$12 sps:$4 sm:$0xff]  }
 0x681   :  { %v3406_v41 = vpop.eup %3405 }
 0x682   :  { %2238 = vmatpush1.bf16.msra.mxu1 %v4703_v57  ;;  %3146 = vmatpush3.bf16.msra.mxu0 %v4709_v1  ;;  %v2133_v53 = vmul.f32 %v3406_v41, %v2132_v21  ;;  %v3499_v57 = vld [vmem:[%s5313_s3 + $0x18] ss:$12 sps:$4 sm:$0xff]   ;;  %v3500_v1 = vld [vmem:[%s5313_s3 + $0x20] ss:$12 sps:$4 sm:$0xff]  }
 0x683   :  { %2239 = vmatprep.subr.bf16.mxu1 %v4716_v13  ;;  %3147 = vmatprep.subr.bf16.mxu0 %v5434_v4  ;;  %v3501_v13 = vld [vmem:[%s5313_s3 + $0x34] ss:$12 sps:$4 sm:$0xff]  }
 0x684   :  { %v2135_v26 = vadd.f32 %v2134_v23, %v2133_v53 }
 0x686   :  { %2240 = vmatpush1.bf16.msra.mxu1 %v4724_v22  ;;  %3148 = vmatpush3.bf16.msra.mxu0 %v4730_v46  ;;  %v2138_v38 = vsel %vm1468_vm8, %v2135_v26, 0.0  ;;  %v5064_v12 = vsel %vm1468_vm8, %v2135_v26, %v4956_v6  ;;  %v3502_v22 = vld [vmem:[%s5313_s3 + $0x30] ss:$12 sps:$4 sm:$0xff]   ;;  %v3503_v46 = vld [vmem:[%s5313_s3 + $0x38] ss:$12 sps:$4 sm:$0xff]  }
 0x687   :  { %2717 = vst [vmem:[%s5318_s7 + $0x28] sm:$0xff] %v2138_v38  ;;  %v2224_v44 = vpack.c.bf16 %v5064_v12, %v5064_v12  ;;  %2361 = vmatprep.subr.bf16.mxu1 %v3495_v45  ;;  %3153 = vmatprep.subr.bf16.mxu0 %v5434_v4  ;;  %v3504_v6 = vld [vmem:[%s5313_s3 + $0x4c] ss:$12 sps:$4 sm:$0xff]  }
 0x688   :  { %v5529_v26 = vld [vmem:[#allocation58_spill] sm:$0xff] }
 0x689   :  { %2258 = vmatmul.mubr.bf16.vlgmr.msra.gmra.mrb[76].mxu1 %v2224_v44  ;;  %3150 = vmatmul.mubr.bf16.vlgmr.msra.gmra.mrb[76].mxu0 %v2224_v44 }
 0x68a   :  { %2362 = vmatpush1.bf16.msra.mxu1 %v3496_v47  ;;  %3154 = vmatpush3.bf16.msra.mxu0 %v3497_v49 }
 0x68b   :  { %2363 = vmatprep.subr.bf16.mxu1 %v3498_v48  ;;  %3155 = vmatprep.subr.bf16.mxu0 %v5434_v4 }
 0x68c   :  { %2393 = vmatprep.mubr.bf16.mxu1 %v5435_v32  ;;  %3169 = vmatprep.mubr.msk.bf16.mxu0 %vm3545_vm1, %v5434_v4 }
 0x68e   :  { %2364 = vmatpush1.bf16.msra.mxu1 %v3499_v57  ;;  %3156 = vmatpush3.bf16.msra.mxu0 %v3500_v1  ;;  %v5530_v1 = vld [vmem:[#allocation38_spill] sm:$0xff] }
 0x68f   :  { %2365 = vmatprep.subr.bf16.mxu1 %v3501_v13  ;;  %3157 = vmatprep.subr.bf16.mxu0 %v5434_v4 }
 0x692   :  { %2366 = vmatpush1.bf16.msra.mxu1 %v3502_v22  ;;  %3158 = vmatpush3.bf16.msra.mxu0 %v3503_v46 }
 0x693   :  { %2367 = vmatprep.subr.bf16.mxu1 %v3504_v6  ;;  %3159 = vmatprep.subr.bf16.mxu0 %v5434_v4  ;;  %v5531_v6 = vld [vmem:[#allocation40_spill] sm:$0xff] }
 0x696   :  { %2368 = vmatpush1.bf16.msra.mxu1 %v3505_v0  ;;  %3160 = vmatpush3.bf16.msra.mxu0 %v3506_v2 }
 0x697   :  { %2369 = vmatprep.subr.bf16.mxu1 %v3507_v3  ;;  %3161 = vmatprep.subr.bf16.mxu0 %v5434_v4 }
 0x69a   :  { %2370 = vmatpush1.bf16.msra.mxu1 %v3508_v19  ;;  %3162 = vmatpush3.bf16.msra.mxu0 %v3509_v5 }
 0x69b   :  { %2371 = vmatprep.subr.bf16.mxu1 %v3510_v27  ;;  %3163 = vmatprep.subr.bf16.mxu0 %v5434_v4 }
 0x69e   :  { %2372 = vmatpush1.bf16.msra.mxu1 %v3511_v37  ;;  %3164 = vmatpush3.bf16.msra.mxu0 %v3512_v10 }
 0x69f   :  { %2373 = vmatprep.subr.bf16.mxu1 %v3513_v39  ;;  %3165 = vmatprep.subr.bf16.mxu0 %v5434_v4 }
 0x6a2   :  { %2374 = vmatpush1.bf16.msra.mxu1 %v3514_v9  ;;  %3166 = vmatpush3.bf16.msra.mxu0 %v3515_v56 }
 0x6a3   :  { %2375 = vmatprep.subr.bf16.mxu1 %v3516_v43  ;;  %3167 = vmatprep.subr.bf16.mxu0 %v5434_v4 }
 0x6a6   :  { %2376 = vmatpush1.bf16.msra.mxu1 %v3517_v35  ;;  %3168 = vmatpush3.bf16.msra.mxu0 %v3518_v14 }
 0x6a7   :  { %2443 = vmatprep.subr.bf16.mxu1 %v3519_v8  ;;  %3173 = vmatprep.subr.bf16.mxu0 %v5434_v4  ;;  %v3520_v8 = vld [vmem:[%s5314_s4] ss:$12 sps:$4 sm:$0xff]  }
 0x73c   :  { %v2177_v15 = vpop.f32.mrb[72].mxu1  ;;  %v2218_v18 = vpop.f32.mrb[72].mxu0 }
 0x73d   :  { %v2178_v30 = vadd.f32 %v2177_v15, %v5519_v20  ;;  %v2179_v52 = vpop.f32.mrb[73].mxu1  ;;  %v3131_v50 = vpop.f32.mrb[73].mxu0  ;;  %v2219_v11 = vadd.f32 %v2218_v18, %v5522_v60  ;;  %v3522_v15 = vld [vmem:[%s5314_s4 + $0x1c] ss:$12 sps:$4 sm:$0xff]  }
 0x73e   :  { %v2180_v16 = vadd.f32 %v2179_v52, %v4193_v36  ;;  %v2181_v40 = vpop.f32.mrb[74].mxu1  ;;  %v2221_v51 = vpop.f32.mrb[74].mxu0  ;;  %v3524_v52 = vld [vmem:[%s5314_s4 + $0x20] ss:$12 sps:$4 sm:$0xff]  }
 0x73f   :  { %v2312_v33 = vadd.f32 %v2178_v30, %v5527_v29  ;;  %v2182_v58 = vpop.f32.mrb[75].mxu1  ;;  %v3132_v59 = vpop.f32.mrb[75].mxu0  ;;  %v3523_v30 = vld [vmem:[%s5314_s4 + $0x18] ss:$12 sps:$4 sm:$0xff]   ;;  %v3526_v51 = vld [vmem:[%s5314_s4 + $0x30] ss:$12 sps:$4 sm:$0xff]  }
 0x740   :  { %v2313_v17 = vadd.f32 %v2180_v16, %v5528_v62  ;;  %v3525_v16 = vld [vmem:[%s5314_s4 + $0x34] ss:$12 sps:$4 sm:$0xff]   ;;  %v3527_v29 = vld [vmem:[%s5314_s4 + $0x38] ss:$12 sps:$4 sm:$0xff]  }
 0x741   :  { %v2718_v63 = vmul.f32 -1.442695, %v2312_v33  ;;  %v3528_v58 = vld [vmem:[%s5314_s4 + $0x4c] ss:$12 sps:$4 sm:$0xff]   ;;  %v5532_v59 = vld [vmem:[#allocation41_spill] sm:$0xff] }
 0x742   :  { %v2719_v54 = vmul.f32 -1.442695, %v2313_v17  ;;  %v3529_v17 = vld [vmem:[%s5314_s4 + $0x48] ss:$12 sps:$4 sm:$0xff]  }
 0x743   :  { %3407 = vpow2.f32 %v2718_v63  ;;  %v3530_v63 = vld [vmem:[%s5314_s4 + $0x50] ss:$12 sps:$4 sm:$0xff]  }
 0x744   :  { %3409 = vpow2.f32 %v2719_v54  ;;  %v3531_v54 = vld [vmem:[%s5314_s4 + $0x64] ss:$12 sps:$4 sm:$0xff]  }
 0x74d   :  { %v3408_v24 = vpop.eup %3407 }
 0x74e   :  { %v2320_v55 = vadd.f32 1.0, %v3408_v24  ;;  %v3410_v42 = vpop.eup %3409  ;;  %v3532_v24 = vld [vmem:[%s5314_s4 + $0x60] ss:$12 sps:$4 sm:$0xff]  }
 0x74f   :  { %v2321_v34 = vadd.f32 1.0, %v3410_v42  ;;  %v3534_v42 = vld [vmem:[%s5314_s4 + $0x7c] ss:$12 sps:$4 sm:$0xff]  }
 0x750   :  { %3411 = vrcp.f32 %v2320_v55  ;;  %v3533_v55 = vld [vmem:[%s5314_s4 + $0x68] ss:$12 sps:$4 sm:$0xff]  }
 0x751   :  { %3413 = vrcp.f32 %v2321_v34 }
 0x75a   :  { %v3412_v21 = vpop.eup %3411 }
 0x75b   :  { %v2326_v41 = vmul.f32 %v3412_v21, %v2219_v11  ;;  %v3414_v3 = vpop.eup %3413  ;;  %v3535_v11 = vld [vmem:[%s5314_s4 + $0x78] ss:$12 sps:$4 sm:$0xff]   ;;  %v3536_v21 = vld [vmem:[%s5314_s4 + $0x80] ss:$12 sps:$4 sm:$0xff]  }
 0x75c   :  { %v2259_v53 = vpop.f32.mrb[76].mxu1  ;;  %v2300_v23 = vpop.f32.mrb[76].mxu0  ;;  %v2329_v5 = vsub.f32 1.0, %v3414_v3  ;;  %v2331_v10 = vmul.f32 %v3414_v3, %v5016_v61 }
 0x75d   :  { %v2327_v38 = vadd.f32 %v2326_v41, %v5529_v26  ;;  %v2260_v44 = vadd.f32 %v2259_v53, %v4209_v28  ;;  %v2261_v45 = vpop.f32.mrb[77].mxu1  ;;  %v3151_v47 = vpop.f32.mrb[77].mxu0  ;;  %v3537_v41 = vld [vmem:[%s5314_s4 + $0x94] ss:$12 sps:$4 sm:$0xff]   ;;  %v3538_v26 = vld [vmem:[%s5314_s4 + $0x90] ss:$12 sps:$4 sm:$0xff]  }
 0x75e   :  { %v2262_v49 = vadd.f32 %v2261_v45, %v4212_v25  ;;  %v2263_v48 = vpop.f32.mrb[78].mxu1  ;;  %v2303_v57 = vpop.f32.mrb[78].mxu0  ;;  %v3540_v47 = vld [vmem:[%s5314_s4 + $0xac] ss:$12 sps:$4 sm:$0xff]  }
 0x75f   :  { %3415 = vtanh.f32 %v2327_v38  ;;  %v2333_v13 = vadd.f32 %v2260_v44, %v5530_v1  ;;  %v2264_v22 = vpop.f32.mrb[79].mxu1  ;;  %v3152_v46 = vpop.f32.mrb[79].mxu0  ;;  %v3539_v38 = vld [vmem:[%s5314_s4 + $0x98] ss:$12 sps:$4 sm:$0xff]   ;;  %v3541_v48 = vld [vmem:[%s5314_s4 + $0xa8] ss:$12 sps:$4 sm:$0xff]  }
 0x760   :  { %v2334_v0 = vadd.f32 %v2262_v49, %v5531_v6  ;;  %v3542_v57 = vld [vmem:[%s5314_s4 + $0xb0] ss:$12 sps:$4 sm:$0xff]  }
 0x761   :  { %v2720_v2 = vmul.f32 -1.442695, %v2333_v13 }
 0x762   :  { %v2721_v19 = vmul.f32 -1.442695, %v2334_v0 }
 0x763   :  { %3417 = vpow2.f32 %v2720_v2 }
 0x764   :  { %3419 = vpow2.f32 %v2721_v19 }
 0x769   :  { %v3416_v27 = vpop.eup %3415 }
 0x76a   :  { %v2330_v37 = vmul.f32 %v3416_v27, %v2329_v5  ;;  %v5533_v5 = vld [vmem:[#allocation29_spill] sm:$0xff] }
 0x76c   :  { %v2332_v39 = vadd.f32 %v2331_v10, %v2330_v37 }
 0x76d   :  { %v3418_v9 = vpop.eup %3417 }
 0x76e   :  { %v2341_v56 = vadd.f32 1.0, %v3418_v9  ;;  %v2354_v43 = vsel %vm1241_vm7, %v2332_v39, 0.0  ;;  %v5174_v35 = vsel %vm1241_vm7, %v2332_v39, %v5016_v61  ;;  %v3521_v61 = vld [vmem:[%s5314_s4 + $0x8] ss:$12 sps:$4 sm:$0xff]   ;;  %v3420_v18 = vpop.eup %3419  ;;  %v5534_v39 = vld [vmem:[#allocation31_spill] sm:$0xff] }
 0x76f   :  { %2722 = vst [vmem:[%s5318_s7 + $0x60] sm:$0xff] %v2354_v43  ;;  %v2360_v14 = vpack.c.bf16 %v5174_v35, %v5174_v35  ;;  %v2342_v50 = vadd.f32 1.0, %v3420_v18 }
 0x770   :  { %3421 = vrcp.f32 %v2341_v56 }
 0x771   :  { %2394 = vmatmul.mubr.bf16.vlgmr.msra.gmra.mrb[80].mxu1 %v2360_v14  ;;  %3170 = vmatmul.mubr.bf16.vlgmr.msra.gmra.mrb[80].mxu0 %v2360_v14  ;;  %3423 = vrcp.f32 %v2342_v50  ;;  %v5535_v50 = vld [vmem:[#allocation60_spill] sm:$0xff] }
 0x772   :  { %2444 = vmatpush1.bf16.msra.mxu1 %v3520_v8  ;;  %3174 = vmatpush3.bf16.msra.mxu0 %v3521_v61 }
 0x773   :  { %2445 = vmatprep.subr.bf16.mxu1 %v3522_v15  ;;  %3175 = vmatprep.subr.bf16.mxu0 %v5434_v4 }
 0x774   :  { %2475 = vmatprep.mubr.bf16.mxu1 %v5435_v32  ;;  %3189 = vmatprep.mubr.msk.bf16.mxu0 %vm3545_vm1, %v5434_v4  ;;  %v2301_v32 = vadd.f32 %v2300_v23, %v4239_v7 }
 0x776   :  { %2446 = vmatpush1.bf16.msra.mxu1 %v3523_v30  ;;  %3176 = vmatpush3.bf16.msra.mxu0 %v3524_v52 }
 0x777   :  { %2447 = vmatprep.subr.bf16.mxu1 %v3525_v16  ;;  %3177 = vmatprep.subr.bf16.mxu0 %v5434_v4 }
 0x77a   :  { %v3422_v40 = vpop.eup %3421  ;;  %2448 = vmatpush1.bf16.msra.mxu1 %v3526_v51  ;;  %3178 = vmatpush3.bf16.msra.mxu0 %v3527_v29 }
 0x77b   :  { %v2347_v33 = vmul.f32 %v3422_v40, %v2301_v32  ;;  %2449 = vmatprep.subr.bf16.mxu1 %v3528_v58  ;;  %3179 = vmatprep.subr.bf16.mxu0 %v5434_v4  ;;  %v3424_v34 = vpop.eup %3423 }
 0x77c   :  { %v2350_v53 = vsub.f32 1.0, %v3424_v34  ;;  %v2352_v45 = vmul.f32 %v3424_v34, %v5064_v12 }
 0x77d   :  { %v2348_v62 = vadd.f32 %v2347_v33, %v5532_v59  ;;  %v5536_v59 = vld [vmem:[#allocation35_spill] sm:$0xff] }
 0x77e   :  { %2450 = vmatpush1.bf16.msra.mxu1 %v3529_v17  ;;  %3180 = vmatpush3.bf16.msra.mxu0 %v3530_v63  ;;  %v5537_v63 = vld [vmem:[#allocation37_spill] sm:$0xff] }
 0x77f   :  { %3425 = vtanh.f32 %v2348_v62  ;;  %2451 = vmatprep.subr.bf16.mxu1 %v3531_v54  ;;  %3181 = vmatprep.subr.bf16.mxu0 %v5434_v4 }
 0x782   :  { %2452 = vmatpush1.bf16.msra.mxu1 %v3532_v24  ;;  %3182 = vmatpush3.bf16.msra.mxu0 %v3533_v55 }
 0x783   :  { %2453 = vmatprep.subr.bf16.mxu1 %v3534_v42  ;;  %3183 = vmatprep.subr.bf16.mxu0 %v5434_v4 }
 0x786   :  { %2454 = vmatpush1.bf16.msra.mxu1 %v3535_v11  ;;  %3184 = vmatpush3.bf16.msra.mxu0 %v3536_v21 }
 0x787   :  { %2455 = vmatprep.subr.bf16.mxu1 %v3537_v41  ;;  %3185 = vmatprep.subr.bf16.mxu0 %v5434_v4 }
 0x789   :  { %v3426_v23 = vpop.eup %3425 }
 0x78a   :  { %2456 = vmatpush1.bf16.msra.mxu1 %v3538_v26  ;;  %3186 = vmatpush3.bf16.msra.mxu0 %v3539_v38  ;;  %v2351_v44 = vmul.f32 %v3426_v23, %v2350_v53 }
 0x78b   :  { %2457 = vmatprep.subr.bf16.mxu1 %v3540_v47  ;;  %3187 = vmatprep.subr.bf16.mxu0 %v5434_v4 }
 0x78c   :  { %v2353_v49 = vadd.f32 %v2352_v45, %v2351_v44 }
 0x78e   :  { %2458 = vmatpush1.bf16.msra.mxu1 %v3541_v48  ;;  %3188 = vmatpush3.bf16.msra.mxu0 %v3542_v57  ;;  %v2356_v1 = vsel %vm1240_vm6, %v2353_v49, 0.0  ;;  %v5268_v13 = vsel %vm1240_vm6, %v2353_v49, %v5064_v12  ;;  %v5538_v48 = vld [vmem:[#allocation39_spill] sm:$0xff] }
 0x78f   :  { %2723 = vst [vmem:[%s5318_s7 + $0x18] sm:$0xff] %v2356_v1  ;;  %v2442_v4 = vpack.c.bf16 %v5268_v13, %v5268_v13 }
 0x791   :  { %2476 = vmatmul.mubr.bf16.vlgmr.msra.gmra.mrb[84].mxu1 %v2442_v4  ;;  %3190 = vmatmul.mubr.bf16.vlgmr.msra.gmra.mrb[84].mxu0 %v2442_v4 }
 0x844   :  { %v2395_v22 = vpop.f32.mrb[80].mxu1  ;;  %v2436_v46 = vpop.f32.mrb[80].mxu0 }
 0x845   :  { %v2396_v6 = vadd.f32 %v2395_v22, %v5519_v20  ;;  %v2397_v0 = vpop.f32.mrb[81].mxu1  ;;  %v3171_v2 = vpop.f32.mrb[81].mxu0  ;;  %v2437_v15 = vadd.f32 %v2436_v46, %v5522_v60 }
 0x846   :  { %v2398_v3 = vadd.f32 %v2397_v0, %v4193_v36  ;;  %v2399_v19 = vpop.f32.mrb[82].mxu1  ;;  %v2439_v12 = vpop.f32.mrb[82].mxu0 }
 0x847   :  { %v2530_v27 = vadd.f32 %v2396_v6, %v5533_v5  ;;  %v2400_v37 = vpop.f32.mrb[83].mxu1  ;;  %v3172_v10 = vpop.f32.mrb[83].mxu0 }
 0x848   :  { %v2531_v9 = vadd.f32 %v2398_v3, %v5534_v39 }
 0x849   :  { %v2724_v56 = vmul.f32 -1.442695, %v2530_v27 }
 0x84a   :  { %v2725_v43 = vmul.f32 -1.442695, %v2531_v9 }
 0x84b   :  { %3427 = vpow2.f32 %v2724_v56 }
 0x84c   :  { %3429 = vpow2.f32 %v2725_v43 }
 0x855   :  { %v3428_v14 = vpop.eup %3427 }
 0x856   :  { %v2538_v8 = vadd.f32 1.0, %v3428_v14  ;;  %v3430_v20 = vpop.eup %3429 }
 0x857   :  { %v2539_v61 = vadd.f32 1.0, %v3430_v20 }
 0x858   :  { %3431 = vrcp.f32 %v2538_v8 }
 0x859   :  { %3433 = vrcp.f32 %v2539_v61 }
 0x862   :  { %v3432_v36 = vpop.eup %3431 }
 0x863   :  { %v2544_v18 = vmul.f32 %v3432_v36, %v2437_v15  ;;  %v3434_v55 = vpop.eup %3433 }
 0x864   :  { %v2477_v30 = vpop.f32.mrb[84].mxu1  ;;  %v2518_v52 = vpop.f32.mrb[84].mxu0  ;;  %v2547_v34 = vsub.f32 1.0, %v3434_v55  ;;  %v2549_v21 = vmul.f32 %v3434_v55, %v5174_v35 }
 0x865   :  { %v2545_v16 = vadd.f32 %v2544_v18, %v5535_v50  ;;  %v2478_v32 = vadd.f32 %v2477_v30, %v4209_v28  ;;  %v2479_v40 = vpop.f32.mrb[85].mxu1  ;;  %v3191_v51 = vpop.f32.mrb[85].mxu0  ;;  %v2519_v45 = vadd.f32 %v2518_v52, %v4239_v7 }
 0x866   :  { %v2480_v29 = vadd.f32 %v2479_v40, %v4212_v25  ;;  %v2481_v33 = vpop.f32.mrb[86].mxu1  ;;  %v2521_v58 = vpop.f32.mrb[86].mxu0 }
 0x867   :  { %3435 = vtanh.f32 %v2545_v16  ;;  %v2551_v62 = vadd.f32 %v2478_v32, %v5536_v59  ;;  %v2482_v17 = vpop.f32.mrb[87].mxu1  ;;  %v3192_v60 = vpop.f32.mrb[87].mxu0 }
 0x868   :  { %v2552_v54 = vadd.f32 %v2480_v29, %v5537_v63 }
 0x869   :  { %v2726_v24 = vmul.f32 -1.442695, %v2551_v62 }
 0x86a   :  { %v2727_v42 = vmul.f32 -1.442695, %v2552_v54 }
 0x86b   :  { %3437 = vpow2.f32 %v2726_v24 }
 0x86c   :  { %3439 = vpow2.f32 %v2727_v42 }
 0x871   :  { %v3436_v11 = vpop.eup %3435 }
 0x872   :  { %v2548_v28 = vmul.f32 %v3436_v11, %v2547_v34 }
 0x874   :  { %v2550_v25 = vadd.f32 %v2549_v21, %v2548_v28 }
 0x875   :  { %v3438_v41 = vpop.eup %3437 }
 0x876   :  { %v2572_v53 = vsel %vm1016_vm4, %v2550_v25, 0.0  ;;  %v2576_v23 = vsel %vm1016_vm4, %v2550_v25, %v5174_v35  ;;  %v2559_v26 = vadd.f32 1.0, %v3438_v41  ;;  %v3440_v38 = vpop.eup %3439 }
 0x877   :  { %2728 = vst [vmem:[%s5318_s7 + $0x70] sm:$0xff] %v2572_v53  ;;  %2578 = vst [vmem:[%s5319_s8] sm:$0xff] %v2576_v23  ;;  %v2560_v44 = vadd.f32 1.0, %v3440_v38 }
 0x878   :  { %3441 = vrcp.f32 %v2559_v26 }
 0x879   :  { %3443 = vrcp.f32 %v2560_v44 }
 0x882   :  { %v3442_v47 = vpop.eup %3441 }
 0x883   :  { %v2565_v49 = vmul.f32 %v3442_v47, %v2519_v45  ;;  %v3444_v35 = vpop.eup %3443 }
 0x884   :  { %v2568_v1 = vsub.f32 1.0, %v3444_v35  ;;  %v2570_v46 = vmul.f32 %v3444_v35, %v5268_v13 }
 0x885   :  { %v2566_v57 = vadd.f32 %v2565_v49, %v5538_v48 }
 0x887   :  { %3445 = vtanh.f32 %v2566_v57 }
 0x891   :  { %v3446_v4 = vpop.eup %3445 }
 0x892   :  { %v2569_v22 = vmul.f32 %v3446_v4, %v2568_v1 }
 0x894   :  { %v2571_v6 = vadd.f32 %v2570_v46, %v2569_v22 }
 0x896   :  { %v2574_v0 = vsel %vm1015_vm2, %v2571_v6, 0.0  ;;  %v2577_v7 = vsel %vm1015_vm2, %v2571_v6, %v5268_v13 }
 0x897   :  { %2575 = vst [vmem:[%s5318_s7 + $0x8] sm:$0xff] %v2574_v0  ;;  %2579 = vst [vmem:[%s5319_s8 + $0x8] sm:$0xff] %v2577_v7 }

</bundles_post_ra>
